<compile_context>
chip_gen: v7x
topology: tpu7x:2x2x1
jax: 0.10.0
libtpu: 0.0.40
codegen_flags: <defaults>
</compile_context>

<pallas_src>
import functools
import math

import jax
import jax.numpy as jnp
from jax import lax
from jax.experimental import pallas as pl
from jax.experimental.pallas import tpu as pltpu


def _gelu_tanh(z):
    c = math.sqrt(2.0 / math.pi)
    return 0.5 * z * (1.0 + jnp.tanh(c * (z + 0.044715 * z * z * z)))


def _round_up(v, m):
    return ((v + m - 1) // m) * m


def _gtb_kernel(
    # scalar prefetch (SMEM)
    cnt_ref,
    # tiled / resident inputs
    x_ref, adj_ref, ea_ref, k_ref, v_ref,
    wqse_ref, bqse_ref, wep_ref, w1_ref, b1_ref, w2_ref, b2_ref,
    # output
    out_ref,
    # VMEM scratch, persistent across the src axis of one row tile
    m_scr, l_scr, acc_scr, acce_scr, q_scr, qe_scr, skip_scr,
    *, hidden, hidden_p, edge_dim,
):
    f32 = jnp.float32
    bf16 = jnp.bfloat16
    i = pl.program_id(0)
    j = pl.program_id(1)

    # ---- once per destination row tile: fused skip|q|qe projection + accumulator init ----
    @pl.when(j == 0)
    def _():
        qse = lax.dot_general(x_ref[...].astype(bf16), wqse_ref[...],
                              (((1,), (0,)), ((), ())),
                              preferred_element_type=f32) + bqse_ref[...]
        skip_scr[...] = qse[:, :hidden_p]                              # x Wskip + bskip (lane padded)
        q_scr[...] = qse[:, hidden_p:hidden_p + hidden].astype(bf16)   # q / sqrt(C)
        qe_scr[...] = qse[:, hidden_p + hidden:]                       # q . We (edge score term)
        # m starts at 0 (not -inf): softmax is shift-invariant, and masked scores (-1e30)
        # then underflow exp() to exactly 0, so no extra `* adj` pass is needed.
        m_scr[...] = jnp.zeros_like(m_scr)
        l_scr[...] = jnp.zeros_like(l_scr)
        acc_scr[...] = jnp.zeros_like(acc_scr)
        acce_scr[...] = jnp.zeros_like(acce_scr)

    # ---- online-softmax accumulation over this source tile (skipped if it has no edges) ----
    @pl.when(cnt_ref[i, j] > 0)
    def _():
        k_t = k_ref[...]                                   # [Tk, C ] bf16 (hoisted projection)
        v_t = v_ref[...]                                   # [Tk, Cp] bf16 (hoisted, lane padded)
        madj = adj_ref[...].astype(f32)                    # [Ti, Tk] int8 edge mask -> f32

        s = lax.dot_general(q_scr[...], k_t, (((1,), (1,)), ((), ())),
                            preferred_element_type=f32)    # [Ti, Tk]  q . k
        qe = qe_scr[...]
        for d in range(edge_dim):                          # q . e_ij  without forming e
            s = s + qe[:, d:d + 1] * ea_ref[d]

        neg = jnp.where(madj > 0.0, s, -1e30)
        m_prev = m_scr[...]
        m_new = jnp.maximum(m_prev, jnp.max(neg, axis=1, keepdims=True))
        a = jnp.exp(m_prev - m_new)
        p = jnp.exp(neg - m_new)                           # masked entries -> exactly 0.0

        l_scr[...] = a * l_scr[...] + jnp.sum(p, axis=1, keepdims=True)
        acc_scr[...] = a * acc_scr[...] + lax.dot_general(
            p.astype(bf16), v_t, (((1,), (0,)), ((), ())),
            preferred_element_type=f32)                    # sum_j p_ij v_j
        pe = jnp.concatenate(
            [jnp.sum(p * ea_ref[d], axis=1, keepdims=True) for d in range(edge_dim)],
            axis=1)                                        # [Ti, De]  sum_j p_ij ea_ij
        acce_scr[...] = a * acce_scr[...] + pe
        m_scr[...] = m_new

    # ---- once per row tile: normalize, skip connection, MLP, residual ----
    @pl.when(j == pl.num_programs(1) - 1)
    def _():
        l = l_scr[...]
        inv_l = pl.reciprocal(jnp.where(l > 0.0, l, 1.0), approx=True)   # zero-in-degree guard
        # edge aggregation (sum_j alpha ea) @ We as one small MXU matmul at finalization
        agg = acc_scr[...] + lax.dot_general(
            acce_scr[...].astype(bf16), wep_ref[...], (((1,), (0,)), ((), ())),
            preferred_element_type=f32)
        att = agg * inv_l + skip_scr[...]

        h1 = _gelu_tanh(lax.dot_general(att.astype(bf16), w1_ref[...],
                                        (((1,), (0,)), ((), ())),
                                        preferred_element_type=f32) + b1_ref[...])
        h2 = _gelu_tanh(lax.dot_general(h1.astype(bf16), w2_ref[...],
                                        (((1,), (0,)), ((), ())),
                                        preferred_element_type=f32) + b2_ref[...])
        out_ref[...] = (att + h2).astype(out_ref.dtype)


def graph_transformer_block(x, adj_i8, ea_t, params, *, row_tile=None, src_tile=None,
                            out_dtype=jnp.float32):
    """x: [N, F_in] f32 ; adj_i8: [N, N] int8 (adj[dst, src]) ; ea_t: [De, N, N] bf16."""
    n_nodes, f_in = x.shape
    hidden = params["wq"].shape[1]
    edge_dim = params["we"].shape[0]
    hidden_p = _round_up(hidden, 128)          # lane-dense V / skip / MLP / output width

    # ---- generation-aware sizing (v7x: 64 MiB VMEM / 2 TC; v5e & v6e: 128 MiB) ----
    try:
        vmem_cap = int(pltpu.get_tpu_info().vmem_capacity_bytes)
    except Exception:                           # conservative fallback if query unavailable
        vmem_cap = 64 * 1024 * 1024
    tile_cap = 1024 if vmem_cap >= 96 * 1024 * 1024 else 512
    if row_tile is None:
        row_tile = n_nodes if n_nodes <= tile_cap else tile_cap
    if src_tile is None:
        src_tile = n_nodes if n_nodes <= tile_cap else tile_cap
    assert n_nodes % row_tile == 0 and n_nodes % src_tile == 0
    n_rt, n_st = n_nodes // row_tile, n_nodes // src_tile

    f32, bf16 = jnp.float32, jnp.bfloat16

    def pad_cols(w, to):
        return jnp.pad(w, ((0, 0), (0, to - w.shape[1])))

    def pad_mat(w, rows, cols):
        return jnp.pad(w, ((0, rows - w.shape[0]), (0, cols - w.shape[1])))

    # Weight fusion (all wrapper-side, zero runtime cost):
    #   1/sqrt(C) folded into Wq/bq; We folded in so the projection also emits qe;
    #   skip | q | qe fused into one destination-tile projection; weights pre-cast to bf16.
    inv = 1.0 / math.sqrt(hidden)
    wq_s, bq_s = params["wq"] * inv, params["bq"] * inv
    w_qse = jnp.concatenate(
        [pad_cols(params["wskip"], hidden_p), wq_s, wq_s @ params["we"].T],
        axis=1).astype(bf16)                                              # [F, Cp + C + De]
    b_qse = jnp.concatenate(
        [pad_cols(params["bskip"], hidden_p), bq_s, bq_s @ params["we"].T],
        axis=1).astype(f32)                                               # [1, Cp + C + De]

    # Hoisted K / V projections: computed ONCE here instead of once per grid step.
    k_all = (x @ params["wk"] + params["bk"]).astype(bf16)                        # [N, C]
    v_all = pad_cols(x @ params["wv"] + params["bv"], hidden_p).astype(bf16)      # [N, Cp]

    we_p = pad_cols(params["we"], hidden_p).astype(bf16)                          # [De, Cp]
    w1_p = pad_mat(params["w1"], hidden_p, hidden_p).astype(bf16)
    b1_p = pad_cols(params["b1"], hidden_p).astype(f32)
    w2_p = pad_mat(params["w2"], hidden_p, hidden_p).astype(bf16)
    b2_p = pad_cols(params["b2"], hidden_p).astype(f32)

    # Per-(row tile, src tile) edge counts -> SMEM; empty source tiles are skipped.
    cnt = adj_i8.astype(jnp.int32).reshape(n_rt, row_tile, n_st, src_tile).sum(axis=(1, 3))

    weights = [w_qse, b_qse, we_p, w1_p, b1_p, w2_p, b2_p]

    def resident(a):
        nd = a.ndim
        return pl.BlockSpec(a.shape, lambda i, j, c, _nd=nd: (0,) * _nd)

    in_specs = [
        pl.BlockSpec((row_tile, f_in), lambda i, j, c: (i, 0)),                     # x (dst rows)
        pl.BlockSpec((row_tile, src_tile), lambda i, j, c: (i, j)),                 # adj tile (int8)
        pl.BlockSpec((edge_dim, row_tile, src_tile), lambda i, j, c: (0, i, j)),    # edge attrs (bf16)
        pl.BlockSpec((src_tile, hidden), lambda i, j, c: (j, 0)),                   # K tile (bf16)
        pl.BlockSpec((src_tile, hidden_p), lambda i, j, c: (j, 0)),                 # V tile (bf16)
    ] + [resident(w) for w in weights]

    scratch_shapes = [
        pltpu.VMEM((row_tile, 1), f32),            # running max m
        pltpu.VMEM((row_tile, 1), f32),            # running denom l
        pltpu.VMEM((row_tile, hidden_p), f32),     # sum p * v
        pltpu.VMEM((row_tile, edge_dim), f32),     # sum p * ea
        pltpu.VMEM((row_tile, hidden), bf16),      # q / sqrt(C)
        pltpu.VMEM((row_tile, edge_dim), f32),     # q . We
        pltpu.VMEM((row_tile, hidden_p), f32),     # skip projection
    ]

    flops = int(
        2 * n_nodes * n_nodes * (hidden + hidden_p + 2 * edge_dim)
        + 2 * n_nodes * f_in * (hidden_p + hidden + edge_dim)
        + 2 * n_nodes * edge_dim * hidden_p
        + 4 * n_nodes * hidden_p * hidden_p)
    transcendentals = int(n_nodes * n_nodes + 2 * n_nodes * hidden_p + n_nodes * n_st)
    bytes_accessed = int(
        n_nodes * n_nodes * (1 + 2 * edge_dim)
        + 2 * n_nodes * (hidden + hidden_p)
        + 4 * n_nodes * (f_in + hidden_p)
        + sum(int(w.size) * w.dtype.itemsize for w in weights))

    kernel = functools.partial(_gtb_kernel, hidden=hidden, hidden_p=hidden_p,
                               edge_dim=edge_dim)
    out_p = pl.pallas_call(
        kernel,
        out_shape=jax.ShapeDtypeStruct((n_nodes, hidden_p), out_dtype),
        grid_spec=pltpu.PrefetchScalarGridSpec(
            num_scalar_prefetch=1,
            grid=(n_rt, n_st),
            in_specs=in_specs,
            out_specs=pl.BlockSpec((row_tile, hidden_p), lambda i, j, c: (i, 0)),
            scratch_shapes=scratch_shapes),
        compiler_params=pltpu.CompilerParams(
            dimension_semantics=("parallel", "arbitrary"),
            vmem_limit_bytes=min(int(vmem_cap * 3 // 4), 112 * 1024 * 1024)),
        cost_estimate=pl.CostEstimate(
            flops=flops, transcendentals=transcendentals, bytes_accessed=bytes_accessed),
    )(cnt, x, adj_i8, ea_t, k_all, v_all, *weights)
    return out_p[:, :hidden]


def _reference(x, adj, ea_dense, prm, *, lowp=False):
    """Pure-JAX mirror (PyG TransformerConv form with e materialized)."""
    hidden = prm["wq"].shape[1]

    def dot(a, b):
        if lowp:
            a, b = a.astype(jnp.bfloat16), b.astype(jnp.bfloat16)
        return jnp.dot(a, b, preferred_element_type=jnp.float32)

    q = dot(x, prm["wq"]) + prm["bq"]
    k = dot(x, prm["wk"]) + prm["bk"]
    v = dot(x, prm["wv"]) + prm["bv"]
    e = jnp.einsum("ijd,dc->ijc", ea_dense, prm["we"])
    scores = (dot(q, k.T) + jnp.einsum("ic,ijc->ij", q, e)) / math.sqrt(hidden)
    neg = jnp.where(adj > 0, scores, -1e30)
    m = jnp.max(neg, axis=1, keepdims=True)
    pnum = jnp.exp(neg - m) * adj
    denom = jnp.sum(pnum, axis=1, keepdims=True)
    alpha = pnum / jnp.where(denom > 0, denom, 1.0)
    agg = dot(alpha, v) + jnp.einsum("ij,ijc->ic", alpha, e)
    att = agg + dot(x, prm["wskip"]) + prm["bskip"]
    h1 = _gelu_tanh(dot(att, prm["w1"]) + prm["b1"])
    h2 = _gelu_tanh(dot(h1, prm["w2"]) + prm["b2"])
    return att + h2


if __name__ == "__main__":
    N = 256           # nodes -> 2x2 grid at the demo tile size
    F_IN = 8          # in_channels
    HID = 32          # hidden_channels
    EDGE_DIM = 3      # module default edge_dim
    ROW_TILE = 128
    SRC_TILE = 128

    key = jax.random.PRNGKey(0)
    ks = jax.random.split(key, 16)

    x = jax.random.normal(ks[0], (N, F_IN), dtype=jnp.float32)

    # Deterministic sparse graph: edges i -> i+1 and i -> i+3 (no wrap).  Node 0 has no
    # incoming edges (exercises the zero-in-degree guard) and the (dst<128, src>=128)
    # tile is empty (exercises block skipping); row tile 1 spans both src tiles
    # (exercises the multi-step online softmax).
    src = jnp.concatenate([jnp.arange(N - 1), jnp.arange(N - 3)])
    dst = jnp.concatenate([jnp.arange(1, N), jnp.arange(3, N)])
    E = src.shape[0]
    edge_attr = jax.random.normal(ks[1], (E, EDGE_DIM), dtype=jnp.float32)

    adj = jnp.zeros((N, N), jnp.float32).at[dst, src].set(1.0)       # f32 for the reference
    adj_i8 = adj.astype(jnp.int8)                                    # int8 edge mask for the kernel
    ea_dense = jnp.zeros((N, N, EDGE_DIM), jnp.float32).at[dst, src].set(edge_attr)
    ea_t = jnp.transpose(ea_dense, (2, 0, 1)).astype(jnp.bfloat16)   # [De, dst, src] lane-dense bf16

    def lin(kw, kb, fan_in, fan_out, bias=True):
        w = 0.2 * jax.random.normal(kw, (fan_in, fan_out), dtype=jnp.float32)
        b = (0.1 * jax.random.normal(kb, (1, fan_out), dtype=jnp.float32) if bias else None)
        return w, b

    wq, bq = lin(ks[2], ks[3], F_IN, HID)
    wk, bk = lin(ks[4], ks[5], F_IN, HID)
    wv, bv = lin(ks[6], ks[7], F_IN, HID)
    we, _ = lin(ks[8], ks[8], EDGE_DIM, HID, bias=False)             # lin_edge has no bias
    wskip, bskip = lin(ks[9], ks[10], F_IN, HID)
    w1, b1 = lin(ks[11], ks[12], HID, HID)
    w2, b2 = lin(ks[13], ks[14], HID, HID)

    params = dict(wq=wq, bq=bq, wk=wk, bk=bk, wv=wv, bv=bv, we=we,
                  wskip=wskip, bskip=bskip, w1=w1, b1=b1, w2=w2, b2=b2)

    run = jax.jit(functools.partial(graph_transformer_block,
                                    row_tile=ROW_TILE, src_tile=SRC_TILE))
    out = jax.block_until_ready(run(x, adj_i8, ea_t, params))

    ref_lowp = _reference(x, adj, ea_dense, params, lowp=True)    # bf16-MXU mirror
    ref_f32 = _reference(x, adj, ea_dense, params, lowp=False)    # full-f32 semantics

    assert out.shape == (N, HID)
    assert jnp.all(jnp.isfinite(out))
    assert jnp.allclose(out, ref_lowp, atol=2e-2, rtol=2e-2), float(
        jnp.max(jnp.abs(out - ref_lowp)))
    assert jnp.allclose(out, ref_f32, atol=6e-2, rtol=6e-2), float(
        jnp.max(jnp.abs(out - ref_f32)))

    print("KERNEL_OK")
</pallas_src>

<mosaic_0001>
module attributes {stable_mosaic.version = 11 : i64} {
  func.func @_gtb_kernel(%arg0: i32, %arg1: i32, %arg2: memref<2x2xi32, #tpu.memory_space<smem>>, %arg3: memref<128x8xf32, #tpu.memory_space<vmem>>, %arg4: memref<128x128xi8, #tpu.memory_space<vmem>>, %arg5: memref<3x128x128xbf16, #tpu.memory_space<vmem>>, %arg6: memref<128x32xbf16, #tpu.memory_space<vmem>>, %arg7: memref<128x128xbf16, #tpu.memory_space<vmem>>, %arg8: memref<8x163xbf16, #tpu.memory_space<vmem>>, %arg9: memref<1x163xf32, #tpu.memory_space<vmem>>, %arg10: memref<3x128xbf16, #tpu.memory_space<vmem>>, %arg11: memref<128x128xbf16, #tpu.memory_space<vmem>>, %arg12: memref<1x128xf32, #tpu.memory_space<vmem>>, %arg13: memref<128x128xbf16, #tpu.memory_space<vmem>>, %arg14: memref<1x128xf32, #tpu.memory_space<vmem>>, %arg15: memref<128x128xf32, #tpu.memory_space<vmem>>, %arg16: memref<128x1xf32, #tpu.memory_space<vmem>>, %arg17: memref<128x1xf32, #tpu.memory_space<vmem>>, %arg18: memref<128x128xf32, #tpu.memory_space<vmem>>, %arg19: memref<128x3xf32, #tpu.memory_space<vmem>>, %arg20: memref<128x32xbf16, #tpu.memory_space<vmem>>, %arg21: memref<128x3xf32, #tpu.memory_space<vmem>>, %arg22: memref<128x128xf32, #tpu.memory_space<vmem>>) attributes {dimension_semantics = [#tpu.dimension_semantics<parallel>, #tpu.dimension_semantics<arbitrary>], iteration_bounds = array<i64: 2, 2>, scalar_prefetch = 1 : i64, scratch_operands = 7 : i64, tpu.core_type = #tpu.core_type<tc>, window_params = [{transform_indices = @transform_0, window_bounds = array<i64: 128, 8>}, {transform_indices = @transform_1, window_bounds = array<i64: 128, 128>}, {transform_indices = @transform_2, window_bounds = array<i64: 3, 128, 128>}, {transform_indices = @transform_3, window_bounds = array<i64: 128, 32>}, {transform_indices = @transform_4, window_bounds = array<i64: 128, 128>}, {pipeline_mode = #tpu.pipeline_mode<synchronous>, transform_indices = @transform_5, window_bounds = array<i64: 8, 163>}, {pipeline_mode = #tpu.pipeline_mode<synchronous>, transform_indices = @transform_6, window_bounds = array<i64: 1, 163>}, {pipeline_mode = #tpu.pipeline_mode<synchronous>, transform_indices = @transform_7, window_bounds = array<i64: 3, 128>}, {pipeline_mode = #tpu.pipeline_mode<synchronous>, transform_indices = @transform_8, window_bounds = array<i64: 128, 128>}, {pipeline_mode = #tpu.pipeline_mode<synchronous>, transform_indices = @transform_9, window_bounds = array<i64: 1, 128>}, {pipeline_mode = #tpu.pipeline_mode<synchronous>, transform_indices = @transform_10, window_bounds = array<i64: 128, 128>}, {pipeline_mode = #tpu.pipeline_mode<synchronous>, transform_indices = @transform_11, window_bounds = array<i64: 1, 128>}, {transform_indices = @transform_12, window_bounds = array<i64: 128, 128>}]} {
    %c0_i32 = arith.constant 0 : i32
    %0 = arith.cmpi eq, %arg1, %c0_i32 : i32
    %1 = arith.extui %0 : i1 to i32
    %c0_i32_0 = arith.constant 0 : i32
    %2 = arith.cmpi ne, %1, %c0_i32_0 : i32
    scf.if %2 {
      %c0 = arith.constant 0 : index
      %c0_4 = arith.constant 0 : index
      %12 = vector.load %arg3[%c0, %c0_4] : memref<128x8xf32, #tpu.memory_space<vmem>>, vector<128x8xf32>
      %13 = arith.truncf %12 : vector<128x8xf32> to vector<128x8xbf16>
      %c0_5 = arith.constant 0 : index
      %c0_6 = arith.constant 0 : index
      %14 = vector.load %arg8[%c0_5, %c0_6] : memref<8x163xbf16, #tpu.memory_space<vmem>>, vector<8x163xbf16>
      %cst = arith.constant dense<0.000000e+00> : vector<128x163xf32>
      %15 = tpu.matmul %13, %14, %cst {dimension_numbers = #tpu.dot_dimension_numbers<[1], [0], [0], [1], [0, 0, 1, 1], [], []>} : vector<128x8xbf16>, vector<8x163xbf16>, vector<128x163xf32> -> vector<128x163xf32>
      %c0_7 = arith.constant 0 : index
      %c0_8 = arith.constant 0 : index
      %16 = vector.load %arg9[%c0_7, %c0_8] : memref<1x163xf32, #tpu.memory_space<vmem>>, vector<1x163xf32>
      %17 = vector.broadcast %16 : vector<1x163xf32> to vector<128x163xf32>
      %18 = arith.addf %15, %17 : vector<128x163xf32>
      %19 = vector.extract_strided_slice %18 {offsets = [0, 0], sizes = [128, 128], strides = [1, 1]} : vector<128x163xf32> to vector<128x128xf32>
      %c0_9 = arith.constant 0 : index
      %c0_10 = arith.constant 0 : index
      %20 = vector.load %arg22[%c0_9, %c0_10] : memref<128x128xf32, #tpu.memory_space<vmem>>, vector<128x128xf32>
      tpu.vector_store %arg22[%c0_9, %c0_10], %19 {strides = array<i32>} : memref<128x128xf32, #tpu.memory_space<vmem>>, vector<128x128xf32>,
      %21 = vector.extract_strided_slice %18 {offsets = [0, 128], sizes = [128, 32], strides = [1, 1]} : vector<128x163xf32> to vector<128x32xf32>
      %22 = arith.truncf %21 : vector<128x32xf32> to vector<128x32xbf16>
      %c0_11 = arith.constant 0 : index
      %c0_12 = arith.constant 0 : index
      %23 = vector.load %arg20[%c0_11, %c0_12] : memref<128x32xbf16, #tpu.memory_space<vmem>>, vector<128x32xbf16>
      tpu.vector_store %arg20[%c0_11, %c0_12], %22 {strides = array<i32>} : memref<128x32xbf16, #tpu.memory_space<vmem>>, vector<128x32xbf16>,
      %24 = vector.extract_strided_slice %18 {offsets = [0, 160], sizes = [128, 3], strides = [1, 1]} : vector<128x163xf32> to vector<128x3xf32>
      %c0_13 = arith.constant 0 : index
      %c0_14 = arith.constant 0 : index
      %25 = vector.load %arg21[%c0_13, %c0_14] : memref<128x3xf32, #tpu.memory_space<vmem>>, vector<128x3xf32>
      tpu.vector_store %arg21[%c0_13, %c0_14], %24 {strides = array<i32>} : memref<128x3xf32, #tpu.memory_space<vmem>>, vector<128x3xf32>,
      %cst_15 = arith.constant 0.000000e+00 : f32
      %26 = vector.broadcast %cst_15 : f32 to vector<128x1xf32>
      %c0_16 = arith.constant 0 : index
      %c0_17 = arith.constant 0 : index
      %27 = vector.load %arg16[%c0_16, %c0_17] : memref<128x1xf32, #tpu.memory_space<vmem>>, vector<128x1xf32>
      tpu.vector_store %arg16[%c0_16, %c0_17], %26 {strides = array<i32>} : memref<128x1xf32, #tpu.memory_space<vmem>>, vector<128x1xf32>,
      %cst_18 = arith.constant 0.000000e+00 : f32
      %28 = vector.broadcast %cst_18 : f32 to vector<128x1xf32>
      %c0_19 = arith.constant 0 : index
      %c0_20 = arith.constant 0 : index
      %29 = vector.load %arg17[%c0_19, %c0_20] : memref<128x1xf32, #tpu.memory_space<vmem>>, vector<128x1xf32>
      tpu.vector_store %arg17[%c0_19, %c0_20], %28 {strides = array<i32>} : memref<128x1xf32, #tpu.memory_space<vmem>>, vector<128x1xf32>,
      %cst_21 = arith.constant 0.000000e+00 : f32
      %30 = vector.broadcast %cst_21 : f32 to vector<128x128xf32>
      %c0_22 = arith.constant 0 : index
      %c0_23 = arith.constant 0 : index
      %31 = vector.load %arg18[%c0_22, %c0_23] : memref<128x128xf32, #tpu.memory_space<vmem>>, vector<128x128xf32>
      tpu.vector_store %arg18[%c0_22, %c0_23], %30 {strides = array<i32>} : memref<128x128xf32, #tpu.memory_space<vmem>>, vector<128x128xf32>,
      %cst_24 = arith.constant 0.000000e+00 : f32
      %32 = vector.broadcast %cst_24 : f32 to vector<128x3xf32>
      %c0_25 = arith.constant 0 : index
      %c0_26 = arith.constant 0 : index
      %33 = vector.load %arg19[%c0_25, %c0_26] : memref<128x3xf32, #tpu.memory_space<vmem>>, vector<128x3xf32>
      tpu.vector_store %arg19[%c0_25, %c0_26], %32 {strides = array<i32>} : memref<128x3xf32, #tpu.memory_space<vmem>>, vector<128x3xf32>,
    } else {
    }
    %3 = arith.index_cast %arg0 : i32 to index
    %4 = arith.index_cast %arg1 : i32 to index
    %5 = memref.load %arg2[%3, %4] : memref<2x2xi32, #tpu.memory_space<smem>>
    %c0_i32_1 = arith.constant 0 : i32
    %6 = arith.cmpi sgt, %5, %c0_i32_1 : i32
    %7 = arith.extui %6 : i1 to i32
    %c0_i32_2 = arith.constant 0 : i32
    %8 = arith.cmpi ne, %7, %c0_i32_2 : i32
    scf.if %8 {
      %c0 = arith.constant 0 : index
      %c0_4 = arith.constant 0 : index
      %12 = vector.load %arg6[%c0, %c0_4] : memref<128x32xbf16, #tpu.memory_space<vmem>>, vector<128x32xbf16>
      %c0_5 = arith.constant 0 : index
      %c0_6 = arith.constant 0 : index
      %13 = vector.load %arg7[%c0_5, %c0_6] : memref<128x128xbf16, #tpu.memory_space<vmem>>, vector<128x128xbf16>
      %c0_7 = arith.constant 0 : index
      %c0_8 = arith.constant 0 : index
      %14 = vector.load %arg4[%c0_7, %c0_8] : memref<128x128xi8, #tpu.memory_space<vmem>>, vector<128x128xi8>
      %15 = arith.sitofp %14 : vector<128x128xi8> to vector<128x128xf32>
      %c0_9 = arith.constant 0 : index
      %c0_10 = arith.constant 0 : index
      %16 = vector.load %arg20[%c0_9, %c0_10] : memref<128x32xbf16, #tpu.memory_space<vmem>>, vector<128x32xbf16>
      %cst = arith.constant dense<0.000000e+00> : vector<128x128xf32>
      %17 = tpu.matmul %16, %12, %cst {dimension_numbers = #tpu.dot_dimension_numbers<[1], [1], [0], [0], [0, 0, 1, 0], [], []>} : vector<128x32xbf16>, vector<128x32xbf16>, vector<128x128xf32> -> vector<128x128xf32>
      %c0_11 = arith.constant 0 : index
      %c0_12 = arith.constant 0 : index
      %18 = vector.load %arg21[%c0_11, %c0_12] : memref<128x3xf32, #tpu.memory_space<vmem>>, vector<128x3xf32>
      %19 = vector.extract_strided_slice %18 {offsets = [0, 0], sizes = [128, 1], strides = [1, 1]} : vector<128x3xf32> to vector<128x1xf32>
      %c0_13 = arith.constant 0 : index
      %c0_14 = arith.constant 0 : index
      %c0_15 = arith.constant 0 : index
      %20 = vector.load %arg5[%c0_13, %c0_14, %c0_15] : memref<3x128x128xbf16, #tpu.memory_space<vmem>>, vector<1x128x128xbf16>
      %21 = vector.shape_cast %20 : vector<1x128x128xbf16> to vector<128x128xbf16>
      %22 = arith.extf %21 : vector<128x128xbf16> to vector<128x128xf32>
      %23 = vector.broadcast %19 : vector<128x1xf32> to vector<128x128xf32>
      %24 = arith.mulf %23, %22 : vector<128x128xf32>
      %25 = arith.addf %17, %24 : vector<128x128xf32>
      %26 = vector.extract_strided_slice %18 {offsets = [0, 1], sizes = [128, 1], strides = [1, 1]} : vector<128x3xf32> to vector<128x1xf32>
      %c1 = arith.constant 1 : index
      %c0_16 = arith.constant 0 : index
      %c0_17 = arith.constant 0 : index
      %27 = vector.load %arg5[%c1, %c0_16, %c0_17] : memref<3x128x128xbf16, #tpu.memory_space<vmem>>, vector<1x128x128xbf16>
      %28 = vector.shape_cast %27 : vector<1x128x128xbf16> to vector<128x128xbf16>
      %29 = arith.extf %28 : vector<128x128xbf16> to vector<128x128xf32>
      %30 = vector.broadcast %26 : vector<128x1xf32> to vector<128x128xf32>
      %31 = arith.mulf %30, %29 : vector<128x128xf32>
      %32 = arith.addf %25, %31 : vector<128x128xf32>
      %33 = vector.extract_strided_slice %18 {offsets = [0, 2], sizes = [128, 1], strides = [1, 1]} : vector<128x3xf32> to vector<128x1xf32>
      %c2 = arith.constant 2 : index
      %c0_18 = arith.constant 0 : index
      %c0_19 = arith.constant 0 : index
      %34 = vector.load %arg5[%c2, %c0_18, %c0_19] : memref<3x128x128xbf16, #tpu.memory_space<vmem>>, vector<1x128x128xbf16>
      %35 = vector.shape_cast %34 : vector<1x128x128xbf16> to vector<128x128xbf16>
      %36 = arith.extf %35 : vector<128x128xbf16> to vector<128x128xf32>
      %37 = vector.broadcast %33 : vector<128x1xf32> to vector<128x128xf32>
      %38 = arith.mulf %37, %36 : vector<128x128xf32>
      %39 = arith.addf %32, %38 : vector<128x128xf32>
      %cst_20 = arith.constant 0.000000e+00 : f32
      %40 = vector.broadcast %cst_20 : f32 to vector<128x128xf32>
      %41 = arith.cmpf ogt, %15, %40 : vector<128x128xf32>
      %cst_21 = arith.constant -1.000000e+30 : f32
      %42 = vector.broadcast %cst_21 : f32 to vector<128x128xf32>
      %43 = arith.select %41, %39, %42 : vector<128x128xi1>, vector<128x128xf32>
      %c0_22 = arith.constant 0 : index
      %c0_23 = arith.constant 0 : index
      %44 = vector.load %arg16[%c0_22, %c0_23] : memref<128x1xf32, #tpu.memory_space<vmem>>, vector<128x1xf32>
      %cst_24 = arith.constant dense<0xFF800000> : vector<128xf32>
      %45 = vector.multi_reduction <maximumf>, %43, %cst_24 [1] : vector<128x128xf32> to vector<128xf32>
      %46 = vector.shape_cast %45 : vector<128xf32> to vector<128x1xf32>
      %47 = arith.maximumf %44, %46 : vector<128x1xf32>
      %48 = arith.subf %44, %47 : vector<128x1xf32>
      %49 = math.exp %48 : vector<128x1xf32>
      %50 = vector.broadcast %47 : vector<128x1xf32> to vector<128x128xf32>
      %51 = arith.subf %43, %50 : vector<128x128xf32>
      %52 = math.exp %51 : vector<128x128xf32>
      %c0_25 = arith.constant 0 : index
      %c0_26 = arith.constant 0 : index
      %53 = vector.load %arg17[%c0_25, %c0_26] : memref<128x1xf32, #tpu.memory_space<vmem>>, vector<128x1xf32>
      %54 = arith.mulf %49, %53 : vector<128x1xf32>
      %cst_27 = arith.constant dense<0.000000e+00> : vector<128xf32>
      %55 = vector.multi_reduction <add>, %52, %cst_27 [1] : vector<128x128xf32> to vector<128xf32>
      %56 = vector.shape_cast %55 : vector<128xf32> to vector<128x1xf32>
      %57 = arith.addf %54, %56 : vector<128x1xf32>
      %c0_28 = arith.constant 0 : index
      %c0_29 = arith.constant 0 : index
      %58 = vector.load %arg17[%c0_28, %c0_29] : memref<128x1xf32, #tpu.memory_space<vmem>>, vector<128x1xf32>
      tpu.vector_store %arg17[%c0_28, %c0_29], %57 {strides = array<i32>} : memref<128x1xf32, #tpu.memory_space<vmem>>, vector<128x1xf32>,
      %c0_30 = arith.constant 0 : index
      %c0_31 = arith.constant 0 : index
      %59 = vector.load %arg18[%c0_30, %c0_31] : memref<128x128xf32, #tpu.memory_space<vmem>>, vector<128x128xf32>
      %60 = vector.broadcast %49 : vector<128x1xf32> to vector<128x128xf32>
      %61 = arith.mulf %60, %59 : vector<128x128xf32>
      %62 = arith.truncf %52 : vector<128x128xf32> to vector<128x128xbf16>
      %cst_32 = arith.constant dense<0.000000e+00> : vector<128x128xf32>
      %63 = tpu.matmul %62, %13, %cst_32 {dimension_numbers = #tpu.dot_dimension_numbers<[1], [0], [0], [1], [0, 0, 1, 1], [], []>} : vector<128x128xbf16>, vector<128x128xbf16>, vector<128x128xf32> -> vector<128x128xf32>
      %64 = arith.addf %61, %63 : vector<128x128xf32>
      %c0_33 = arith.constant 0 : index
      %c0_34 = arith.constant 0 : index
      %65 = vector.load %arg18[%c0_33, %c0_34] : memref<128x128xf32, #tpu.memory_space<vmem>>, vector<128x128xf32>
      tpu.vector_store %arg18[%c0_33, %c0_34], %64 {strides = array<i32>} : memref<128x128xf32, #tpu.memory_space<vmem>>, vector<128x128xf32>,
      %c0_35 = arith.constant 0 : index
      %c0_36 = arith.constant 0 : index
      %c0_37 = arith.constant 0 : index
      %66 = vector.load %arg5[%c0_35, %c0_36, %c0_37] : memref<3x128x128xbf16, #tpu.memory_space<vmem>>, vector<1x128x128xbf16>
      %67 = vector.shape_cast %66 : vector<1x128x128xbf16> to vector<128x128xbf16>
      %68 = arith.extf %67 : vector<128x128xbf16> to vector<128x128xf32>
      %69 = arith.mulf %52, %68 : vector<128x128xf32>
      %cst_38 = arith.constant dense<0.000000e+00> : vector<128xf32>
      %70 = vector.multi_reduction <add>, %69, %cst_38 [1] : vector<128x128xf32> to vector<128xf32>
      %71 = vector.shape_cast %70 : vector<128xf32> to vector<128x1xf32>
      %c1_39 = arith.constant 1 : index
      %c0_40 = arith.constant 0 : index
      %c0_41 = arith.constant 0 : index
      %72 = vector.load %arg5[%c1_39, %c0_40, %c0_41] : memref<3x128x128xbf16, #tpu.memory_space<vmem>>, vector<1x128x128xbf16>
      %73 = vector.shape_cast %72 : vector<1x128x128xbf16> to vector<128x128xbf16>
      %74 = arith.extf %73 : vector<128x128xbf16> to vector<128x128xf32>
      %75 = arith.mulf %52, %74 : vector<128x128xf32>
      %cst_42 = arith.constant dense<0.000000e+00> : vector<128xf32>
      %76 = vector.multi_reduction <add>, %75, %cst_42 [1] : vector<128x128xf32> to vector<128xf32>
      %77 = vector.shape_cast %76 : vector<128xf32> to vector<128x1xf32>
      %c2_43 = arith.constant 2 : index
      %c0_44 = arith.constant 0 : index
      %c0_45 = arith.constant 0 : index
      %78 = vector.load %arg5[%c2_43, %c0_44, %c0_45] : memref<3x128x128xbf16, #tpu.memory_space<vmem>>, vector<1x128x128xbf16>
      %79 = vector.shape_cast %78 : vector<1x128x128xbf16> to vector<128x128xbf16>
      %80 = arith.extf %79 : vector<128x128xbf16> to vector<128x128xf32>
      %81 = arith.mulf %52, %80 : vector<128x128xf32>
      %cst_46 = arith.constant dense<0.000000e+00> : vector<128xf32>
      %82 = vector.multi_reduction <add>, %81, %cst_46 [1] : vector<128x128xf32> to vector<128xf32>
      %83 = vector.shape_cast %82 : vector<128xf32> to vector<128x1xf32>
      %84 = tpu.concatenate %71, %77, %83 in 1 : vector<128x1xf32>, vector<128x1xf32>, vector<128x1xf32> -> vector<128x3xf32>
      %c0_47 = arith.constant 0 : index
      %c0_48 = arith.constant 0 : index
      %85 = vector.load %arg19[%c0_47, %c0_48] : memref<128x3xf32, #tpu.memory_space<vmem>>, vector<128x3xf32>
      %86 = vector.broadcast %49 : vector<128x1xf32> to vector<128x3xf32>
      %87 = arith.mulf %86, %85 : vector<128x3xf32>
      %88 = arith.addf %87, %84 : vector<128x3xf32>
      %c0_49 = arith.constant 0 : index
      %c0_50 = arith.constant 0 : index
      %89 = vector.load %arg19[%c0_49, %c0_50] : memref<128x3xf32, #tpu.memory_space<vmem>>, vector<128x3xf32>
      tpu.vector_store %arg19[%c0_49, %c0_50], %88 {strides = array<i32>} : memref<128x3xf32, #tpu.memory_space<vmem>>, vector<128x3xf32>,
      %c0_51 = arith.constant 0 : index
      %c0_52 = arith.constant 0 : index
      %90 = vector.load %arg16[%c0_51, %c0_52] : memref<128x1xf32, #tpu.memory_space<vmem>>, vector<128x1xf32>
      tpu.vector_store %arg16[%c0_51, %c0_52], %47 {strides = array<i32>} : memref<128x1xf32, #tpu.memory_space<vmem>>, vector<128x1xf32>,
    } else {
    }
    %c1_i32 = arith.constant 1 : i32
    %9 = arith.cmpi eq, %arg1, %c1_i32 : i32
    %10 = arith.extui %9 : i1 to i32
    %c0_i32_3 = arith.constant 0 : i32
    %11 = arith.cmpi ne, %10, %c0_i32_3 : i32
    scf.if %11 {
      %c0 = arith.constant 0 : index
      %c0_4 = arith.constant 0 : index
      %12 = vector.load %arg17[%c0, %c0_4] : memref<128x1xf32, #tpu.memory_space<vmem>>, vector<128x1xf32>
      %cst = arith.constant 0.000000e+00 : f32
      %13 = vector.broadcast %cst : f32 to vector<128x1xf32>
      %14 = arith.cmpf ogt, %12, %13 : vector<128x1xf32>
      %cst_5 = arith.constant 1.000000e+00 : f32
      %15 = vector.broadcast %cst_5 : f32 to vector<128x1xf32>
      %16 = arith.select %14, %12, %15 : vector<128x1xi1>, vector<128x1xf32>
      %17 = tpu.reciprocal %16 {approx = true} : vector<128x1xf32> -> vector<128x1xf32>
      %c0_6 = arith.constant 0 : index
      %c0_7 = arith.constant 0 : index
      %18 = vector.load %arg18[%c0_6, %c0_7] : memref<128x128xf32, #tpu.memory_space<vmem>>, vector<128x128xf32>
      %c0_8 = arith.constant 0 : index
      %c0_9 = arith.constant 0 : index
      %19 = vector.load %arg19[%c0_8, %c0_9] : memref<128x3xf32, #tpu.memory_space<vmem>>, vector<128x3xf32>
      %20 = arith.truncf %19 : vector<128x3xf32> to vector<128x3xbf16>
      %c0_10 = arith.constant 0 : index
      %c0_11 = arith.constant 0 : index
      %21 = vector.load %arg10[%c0_10, %c0_11] : memref<3x128xbf16, #tpu.memory_space<vmem>>, vector<3x128xbf16>
      %cst_12 = arith.constant dense<0.000000e+00> : vector<128x128xf32>
      %22 = tpu.matmul %20, %21, %cst_12 {dimension_numbers = #tpu.dot_dimension_numbers<[1], [0], [0], [1], [0, 0, 1, 1], [], []>} : vector<128x3xbf16>, vector<3x128xbf16>, vector<128x128xf32> -> vector<128x128xf32>
      %23 = arith.addf %18, %22 : vector<128x128xf32>
      %24 = vector.broadcast %17 : vector<128x1xf32> to vector<128x128xf32>
      %25 = arith.mulf %23, %24 : vector<128x128xf32>
      %c0_13 = arith.constant 0 : index
      %c0_14 = arith.constant 0 : index
      %26 = vector.load %arg22[%c0_13, %c0_14] : memref<128x128xf32, #tpu.memory_space<vmem>>, vector<128x128xf32>
      %27 = arith.addf %25, %26 : vector<128x128xf32>
      %28 = arith.truncf %27 : vector<128x128xf32> to vector<128x128xbf16>
      %c0_15 = arith.constant 0 : index
      %c0_16 = arith.constant 0 : index
      %29 = vector.load %arg11[%c0_15, %c0_16] : memref<128x128xbf16, #tpu.memory_space<vmem>>, vector<128x128xbf16>
      %cst_17 = arith.constant dense<0.000000e+00> : vector<128x128xf32>
      %30 = tpu.matmul %28, %29, %cst_17 {dimension_numbers = #tpu.dot_dimension_numbers<[1], [0], [0], [1], [0, 0, 1, 1], [], []>} : vector<128x128xbf16>, vector<128x128xbf16>, vector<128x128xf32> -> vector<128x128xf32>
      %c0_18 = arith.constant 0 : index
      %c0_19 = arith.constant 0 : index
      %31 = vector.load %arg12[%c0_18, %c0_19] : memref<1x128xf32, #tpu.memory_space<vmem>>, vector<1x128xf32>
      %32 = vector.broadcast %31 : vector<1x128xf32> to vector<128x128xf32>
      %33 = arith.addf %30, %32 : vector<128x128xf32>
      %cst_20 = arith.constant 5.000000e-01 : f32
      %34 = vector.broadcast %cst_20 : f32 to vector<128x128xf32>
      %35 = arith.mulf %34, %33 : vector<128x128xf32>
      %cst_21 = arith.constant 4.471500e-02 : f32
      %36 = vector.broadcast %cst_21 : f32 to vector<128x128xf32>
      %37 = arith.mulf %36, %33 : vector<128x128xf32>
      %38 = arith.mulf %37, %33 : vector<128x128xf32>
      %39 = arith.mulf %38, %33 : vector<128x128xf32>
      %40 = arith.addf %33, %39 : vector<128x128xf32>
      %cst_22 = arith.constant 0.797884583 : f32
      %41 = vector.broadcast %cst_22 : f32 to vector<128x128xf32>
      %42 = arith.mulf %41, %40 : vector<128x128xf32>
      %43 = math.tanh %42 : vector<128x128xf32>
      %cst_23 = arith.constant 1.000000e+00 : f32
      %44 = vector.broadcast %cst_23 : f32 to vector<128x128xf32>
      %45 = arith.addf %44, %43 : vector<128x128xf32>
      %46 = arith.mulf %35, %45 : vector<128x128xf32>
      %47 = arith.truncf %46 : vector<128x128xf32> to vector<128x128xbf16>
      %c0_24 = arith.constant 0 : index
      %c0_25 = arith.constant 0 : index
      %48 = vector.load %arg13[%c0_24, %c0_25] : memref<128x128xbf16, #tpu.memory_space<vmem>>, vector<128x128xbf16>
      %cst_26 = arith.constant dense<0.000000e+00> : vector<128x128xf32>
      %49 = tpu.matmul %47, %48, %cst_26 {dimension_numbers = #tpu.dot_dimension_numbers<[1], [0], [0], [1], [0, 0, 1, 1], [], []>} : vector<128x128xbf16>, vector<128x128xbf16>, vector<128x128xf32> -> vector<128x128xf32>
      %c0_27 = arith.constant 0 : index
      %c0_28 = arith.constant 0 : index
      %50 = vector.load %arg14[%c0_27, %c0_28] : memref<1x128xf32, #tpu.memory_space<vmem>>, vector<1x128xf32>
      %51 = vector.broadcast %50 : vector<1x128xf32> to vector<128x128xf32>
      %52 = arith.addf %49, %51 : vector<128x128xf32>
      %cst_29 = arith.constant 5.000000e-01 : f32
      %53 = vector.broadcast %cst_29 : f32 to vector<128x128xf32>
      %54 = arith.mulf %53, %52 : vector<128x128xf32>
      %cst_30 = arith.constant 4.471500e-02 : f32
      %55 = vector.broadcast %cst_30 : f32 to vector<128x128xf32>
      %56 = arith.mulf %55, %52 : vector<128x128xf32>
      %57 = arith.mulf %56, %52 : vector<128x128xf32>
      %58 = arith.mulf %57, %52 : vector<128x128xf32>
      %59 = arith.addf %52, %58 : vector<128x128xf32>
      %cst_31 = arith.constant 0.797884583 : f32
      %60 = vector.broadcast %cst_31 : f32 to vector<128x128xf32>
      %61 = arith.mulf %60, %59 : vector<128x128xf32>
      %62 = math.tanh %61 : vector<128x128xf32>
      %cst_32 = arith.constant 1.000000e+00 : f32
      %63 = vector.broadcast %cst_32 : f32 to vector<128x128xf32>
      %64 = arith.addf %63, %62 : vector<128x128xf32>
      %65 = arith.mulf %54, %64 : vector<128x128xf32>
      %66 = arith.addf %27, %65 : vector<128x128xf32>
      %c0_33 = arith.constant 0 : index
      %c0_34 = arith.constant 0 : index
      %67 = vector.load %arg15[%c0_33, %c0_34] : memref<128x128xf32, #tpu.memory_space<vmem>>, vector<128x128xf32>
      tpu.vector_store %arg15[%c0_33, %c0_34], %66 {strides = array<i32>} : memref<128x128xf32, #tpu.memory_space<vmem>>, vector<128x128xf32>,
    } else {
    }
    return
  }
  func.func @transform_0(%arg0: i32, %arg1: i32, %arg2: memref<2x2xi32, #tpu.memory_space<smem>>) -> (i32, i32) {
    %c0_i32 = arith.constant 0 : i32
    %c0_i32_0 = arith.constant 0 : i32
    return %arg0, %c0_i32 : i32, i32
  }
  func.func @transform_1(%arg0: i32, %arg1: i32, %arg2: memref<2x2xi32, #tpu.memory_space<smem>>) -> (i32, i32) {
    %c0_i32 = arith.constant 0 : i32
    return %arg0, %arg1 : i32, i32
  }
  func.func @transform_2(%arg0: i32, %arg1: i32, %arg2: memref<2x2xi32, #tpu.memory_space<smem>>) -> (i32, i32, i32) {
    %c0_i32 = arith.constant 0 : i32
    %c0_i32_0 = arith.constant 0 : i32
    return %c0_i32, %arg0, %arg1 : i32, i32, i32
  }
  func.func @transform_3(%arg0: i32, %arg1: i32, %arg2: memref<2x2xi32, #tpu.memory_space<smem>>) -> (i32, i32) {
    %c0_i32 = arith.constant 0 : i32
    %c0_i32_0 = arith.constant 0 : i32
    return %arg1, %c0_i32 : i32, i32
  }
  func.func @transform_4(%arg0: i32, %arg1: i32, %arg2: memref<2x2xi32, #tpu.memory_space<smem>>) -> (i32, i32) {
    %c0_i32 = arith.constant 0 : i32
    %c0_i32_0 = arith.constant 0 : i32
    return %arg1, %c0_i32 : i32, i32
  }
  func.func @transform_5(%arg0: i32, %arg1: i32, %arg2: memref<2x2xi32, #tpu.memory_space<smem>>) -> (i32, i32) {
    %c0_i32 = arith.constant 0 : i32
    %c0_i32_0 = arith.constant 0 : i32
    %c0_i32_1 = arith.constant 0 : i32
    return %c0_i32, %c0_i32_0 : i32, i32
  }
  func.func @transform_6(%arg0: i32, %arg1: i32, %arg2: memref<2x2xi32, #tpu.memory_space<smem>>) -> (i32, i32) {
    %c0_i32 = arith.constant 0 : i32
    %c0_i32_0 = arith.constant 0 : i32
    %c0_i32_1 = arith.constant 0 : i32
    return %c0_i32, %c0_i32_0 : i32, i32
  }
  func.func @transform_7(%arg0: i32, %arg1: i32, %arg2: memref<2x2xi32, #tpu.memory_space<smem>>) -> (i32, i32) {
    %c0_i32 = arith.constant 0 : i32
    %c0_i32_0 = arith.constant 0 : i32
    %c0_i32_1 = arith.constant 0 : i32
    return %c0_i32, %c0_i32_0 : i32, i32
  }
  func.func @transform_8(%arg0: i32, %arg1: i32, %arg2: memref<2x2xi32, #tpu.memory_space<smem>>) -> (i32, i32) {
    %c0_i32 = arith.constant 0 : i32
    %c0_i32_0 = arith.constant 0 : i32
    %c0_i32_1 = arith.constant 0 : i32
    return %c0_i32, %c0_i32_0 : i32, i32
  }
  func.func @transform_9(%arg0: i32, %arg1: i32, %arg2: memref<2x2xi32, #tpu.memory_space<smem>>) -> (i32, i32) {
    %c0_i32 = arith.constant 0 : i32
    %c0_i32_0 = arith.constant 0 : i32
    %c0_i32_1 = arith.constant 0 : i32
    return %c0_i32, %c0_i32_0 : i32, i32
  }
  func.func @transform_10(%arg0: i32, %arg1: i32, %arg2: memref<2x2xi32, #tpu.memory_space<smem>>) -> (i32, i32) {
    %c0_i32 = arith.constant 0 : i32
    %c0_i32_0 = arith.constant 0 : i32
    %c0_i32_1 = arith.constant 0 : i32
    return %c0_i32, %c0_i32_0 : i32, i32
  }
  func.func @transform_11(%arg0: i32, %arg1: i32, %arg2: memref<2x2xi32, #tpu.memory_space<smem>>) -> (i32, i32) {
    %c0_i32 = arith.constant 0 : i32
    %c0_i32_0 = arith.constant 0 : i32
    %c0_i32_1 = arith.constant 0 : i32
    return %c0_i32, %c0_i32_0 : i32, i32
  }
  func.func @transform_12(%arg0: i32, %arg1: i32, %arg2: memref<2x2xi32, #tpu.memory_space<smem>>) -> (i32, i32) {
    %c0_i32 = arith.constant 0 : i32
    %c0_i32_0 = arith.constant 0 : i32
    return %arg0, %c0_i32 : i32, i32
  }
}

</mosaic_0001>

<bundles_post_ra>
// kernel: graph_transformer_block.1
= control target key start
LH: loop header
LB: loop body
LE: loop exit
PB: predicated region body
PF: predicated region fallthrough
CT: control target
= control target key end

     0   :  { %s6988_s0 = inlined_call_operand.vmem [shape: s32[2,2], index: 0, kind: input, shape index: {}]   ;;  %s6989_s1 = inlined_call_operand.vmem [shape: f32[256,8], index: 1, kind: input, shape index: {}]   ;;  %s6990_s2 = inlined_call_operand.vmem [shape: s8[256,256], index: 2, kind: input, shape index: {}]   ;;  %s6991_s3 = inlined_call_operand.vmem [shape: bf16[3,256,256], index: 3, kind: input, shape index: {}]   ;;  %s6992_s4 = inlined_call_operand.vmem [shape: bf16[256,32], index: 4, kind: input, shape index: {}]   ;;  %s6993_s5 = inlined_call_operand.vmem [shape: bf16[256,128], index: 5, kind: input, shape index: {}]   ;;  %s6994_s6 = inlined_call_operand.vmem [shape: bf16[8,163], index: 6, kind: input, shape index: {}]   ;;  %s6995_s7 = inlined_call_operand.vmem [shape: f32[1,163], index: 7, kind: input, shape index: {}]   ;;  %s6996_s8 = inlined_call_operand.vmem [shape: bf16[3,128], index: 8, kind: input, shape index: {}]   ;;  %s6997_s9 = inlined_call_operand.vmem [shape: bf16[128,128], index: 9, kind: input, shape index: {}]   ;;  %s6998_s10 = inlined_call_operand.vmem [shape: f32[1,128], index: 10, kind: input, shape index: {}]   ;;  %s6999_s11 = inlined_call_operand.vmem [shape: bf16[128,128], index: 11, kind: input, shape index: {}]   ;;  %s7000_s12 = inlined_call_operand.vmem [shape: f32[1,128], index: 12, kind: input, shape index: {}]   ;;  %s7001_s13 = inlined_call_operand.vmem [shape: f32[256,128], index: 13, kind: output, shape index: {}]  }
   0x1   :  { %7014 = sst [smem:[#allocation33_spill]] %s6990_s2  ;;  %s18_s27 = sshll.u32 %s6988_s0, 4  ;;  %s19_s27 = int_to_ptr.vmem [resolvable:$true] %s18_s27 }
   0x2   :  { %7015 = sst [smem:[#allocation34_spill]] %s6991_s3  ;;  %s4961_s28 = scalar_lea.vmem %s19_s27, 32 }
   0x3   :  { %7016 = sst [smem:[#allocation35_spill]] %s7000_s12  ;;  %p4962_p0 = scmp.ne.s32.totalorder %s19_s27, %s4961_s28 }
   0x4   :  { %p4966_p1 = scmp.lt.s32.totalorder %s19_s27, %s19_s27  ;;  %p4967_p2 = scmp.lt.s32.totalorder %s4961_s28, %s4961_s28 }
   0x6   :  { %p4968_p3 = por %p4967_p2, %p4966_p1 }
   0x8   :  { %p4969_p4 = pnand %p4968_p3, %p4962_p0 }
   0xa   :  { %4972 = shalt.err (!%p4969_p4)  }
   0xb   :  { %s5031_s29 = smov [#allocation10]  }
   0xc   :  { %21 = dma.vmem_to_smem %s19_s27, 32, %s5031_s29, [#allocation9] }
   0xd   :  { %5001 = dma.done.wait [#allocation9], 32 }
   0xe   :  { %5002 = vsyncadd [#allocation9], 4294967264 }
   0xf   :  { %23 = sfence }
  0x10   :  { %s5113_s30 = smov 0   ;;  %s5115_s14 = smov 0  }
  0x11   :  { %s5117_s15 = smov 0   ;;  %s5119_s0 = smov 0  }
  0x12   :  { %s5121_s16 = smov 0   ;;  %s5123_s17 = smov 0  }
  0x13   :  { %s5125_s18 = smov 0  }
  0x14 LB: > { %7017 = sst [smem:[#allocation14_spill]] %s5021_s16  ;;  %s38_s19 = sadd.s32 1, %s5021_s16  ;;  %s5029_s18 = sphi %s5125_s18, %s29_s18   ;;  %s5025_s17 = sphi %s5123_s17, %s7097_s17   ;;  %s5021_s16 = sphi %s5121_s16, %s7096_s16   ;;  %s5017_s0 = sphi %s5119_s0, %s7095_s0   ;;  %s5013_s15 = sphi %s5117_s15, %s7094_s15   ;;  %s5009_s14 = sphi %s5115_s14, %s7099_s14   ;;  %s5005_s30 = sphi %s5113_s30, %s7098_s30  }
  0x15   : > { %7018 = sst [smem:[#allocation15_spill]] %s5025_s17  ;;  %p39_p5 = scmp.ge.s32.totalorder %s38_s19, 2 }
  0x16   : > { %s41_s20 = sadd.s32 1, %s5025_s17  ;;  %p83_p6 = scmp.ne.s32.totalorder %s5009_s14, %s5005_s30 }
  0x17   : > { %p84_p7 = scmp.eq.s32.totalorder %s5029_s18, 0  ;;  %s7101_s19 = smov (%p39_p5, %s38_s19), 0 }
  0x18   : > { %7019 = sst [smem:[#allocation16_spill]] %s7101_s19  ;;  %s7103_s20 = smov (!%p39_p5, %s41_s20), %s5025_s17 }
  0x19   : > { %p5156_p8 = por %p84_p7, %p83_p6  ;;  %p43_p9 = scmp.ge.s32.totalorder %s7103_s20, 2 }
  0x1a   : > { %s72_s22 = ssub.s32 %s5021_s16, %s7101_s19  ;;  %s76_s25 = sadd.s32 1, %s5009_s14 }
  0x1b   : > { %s7105_s20 = smov (%p43_p9, %s7103_s20), 0  ;;  %p4063_p11 = scmp.ge.s32.totalorder %s5029_s18, 4 }
  0x1c   : > { %7021 = sst [smem:[#allocation17_spill]] %s7105_s20  ;;  %s71_s23 = ssub.s32 %s5025_s17, %s7105_s20 }
  0x1d   : > { %s73_s24 = sor.u32 %s72_s22, %s71_s23  ;;  %383 = sbr.rel (%p4063_p11) target bundleno = 90 (0x5a), region = 44 }
  0x1e   : > { %p74_p10 = scmp.eq.s32.totalorder %s73_s24, 0 }
  0x20   : > { %s5168_s26 = scalar_select %p74_p10, %s5009_s14, %s76_s25  }
  0x22   : > { %7022 = sst [smem:[#allocation18_spill]] %s5168_s26 }
  0x24   : > { %395 = sbr.rel (!%p5156_p8) target bundleno = 48 (0x30), region = 52  ;;  %s397_s27 = sand.u32 (%p5156_p8), 1, %s5009_s14  }
  0x25   : > { %s4212_s28 = sshll.u32 (%p5156_p8), %s5025_s17, 3  ;;  %s4064_s29 = sshll.u32 (%p5156_p8), %s397_s27, 5 }
  0x26   : > { %s402_s19 = sadd.s32 (%p5156_p8), %s5021_s16, %s4212_s28  ;;  %s7023_s2 = sld [smem:[#allocation33_spill]] (%p5156_p8) }
  0x27   : > { %s4067_s12 = sshll.u32 (%p5156_p8), %s402_s19, 3  ;;  %s399_s24 = scalar_lea.vmem (%p5156_p8), [#allocation11], %s4064_s29 }
  0x2c   : > { %s404_s23 = scalar_lea.vmem %s7023_s2, %s4067_s12 }
  0x2d   : > { %v438_v0 = vld [vmem:[%s404_s23] sm:$0xff]  ;;  %v440_v1 = vld [vmem:[%s404_s23 + $0x10] sm:$0xff] }
  0x2e   : > { %v442_v2 = vld [vmem:[%s404_s23 + $0x20] sm:$0xff]  ;;  %439 = vst [vmem:[%s399_s24] sm:$0xff] %v438_v0  ;;  %441 = vst [vmem:[%s399_s24 + $0x8] sm:$0xff] %v440_v1  ;;  %v444_v3 = vld [vmem:[%s404_s23 + $0x30] sm:$0xff] }
  0x2f   : > { %443 = vst [vmem:[%s399_s24 + $0x10] sm:$0xff] %v442_v2  ;;  %445 = vst [vmem:[%s399_s24 + $0x18] sm:$0xff] %v444_v3 }
  0x30 PF: > { %451 = sbr.rel (!%p5156_p8) target bundleno = 90 (0x5a), region = 90  ;;  %s453_s19 = sand.u32 (%p5156_p8), 1, %s5009_s14  }
  0x31   : > { %s4213_s25 = sshll.u32 (%p5156_p8), %s5025_s17, 5  ;;  %s4681_s20 = smul.u32 (%p5156_p8), 192, %s453_s19 }
  0x32   : > { %s458_s12 = sadd.s32 (%p5156_p8), %s5021_s16, %s4213_s25  ;;  %s7024_s3 = sld [smem:[#allocation34_spill]] (%p5156_p8) }
  0x33   : > { %s4070_s27 = sshll.u32 (%p5156_p8), %s458_s12, 2  ;;  %s5192_s21 = scalar_lea.vmem (%p5156_p8), [#allocation12], %s4681_s20 }
  0x38   : > { %s5187_s29 = scalar_lea.vmem %s7024_s3, %s4070_s27 }
  0x39   : > { %v476_v4 = vld [vmem:[%s5187_s29] sm:$0xf]  ;;  %v478_v5 = vld [vmem:[%s5187_s29 + $0x8] sm:$0xf]  ;;  %v480_v6 = vld [vmem:[%s5187_s29 + $0x10] sm:$0xf] }
  0x3a   : > { %477 = vst [vmem:[%s5192_s21] sm:$0xf] %v476_v4  ;;  %479 = vst [vmem:[%s5192_s21 + $0x4] sm:$0xf] %v478_v5  ;;  %v482_v7 = vld [vmem:[%s5187_s29 + $0x18] sm:$0xf] }
  0x3b   : > { %481 = vst [vmem:[%s5192_s21 + $0x8] sm:$0xf] %v480_v6  ;;  %v484_v8 = vld [vmem:[%s5187_s29 + $0x20] sm:$0xf]  ;;  %v486_v9 = vld [vmem:[%s5187_s29 + $0x28] sm:$0xf] }
  0x3c   : > { %483 = vst [vmem:[%s5192_s21 + $0xc] sm:$0xf] %v482_v7  ;;  %485 = vst [vmem:[%s5192_s21 + $0x10] sm:$0xf] %v484_v8  ;;  %v488_v10 = vld [vmem:[%s5187_s29 + $0x30] sm:$0xf] }
  0x3d   : > { %487 = vst [vmem:[%s5192_s21 + $0x14] sm:$0xf] %v486_v9  ;;  %v490_v11 = vld [vmem:[%s5187_s29 + $0x38] sm:$0xf]  ;;  %v492_v12 = vld [vmem:[%s5187_s29 + $0x40] sm:$0xf] }
  0x3e   : > { %489 = vst [vmem:[%s5192_s21 + $0x18] sm:$0xf] %v488_v10  ;;  %491 = vst [vmem:[%s5192_s21 + $0x1c] sm:$0xf] %v490_v11  ;;  %v494_v13 = vld [vmem:[%s5187_s29 + $0x48] sm:$0xf] }
  0x3f   : > { %493 = vst [vmem:[%s5192_s21 + $0x20] sm:$0xf] %v492_v12  ;;  %v496_v14 = vld [vmem:[%s5187_s29 + $0x50] sm:$0xf]  ;;  %v498_v15 = vld [vmem:[%s5187_s29 + $0x58] sm:$0xf] }
  0x40   : > { %495 = vst [vmem:[%s5192_s21 + $0x24] sm:$0xf] %v494_v13  ;;  %497 = vst [vmem:[%s5192_s21 + $0x28] sm:$0xf] %v496_v14  ;;  %v500_v16 = vld [vmem:[%s5187_s29 + $0x60] sm:$0xf] }
  0x41   : > { %499 = vst [vmem:[%s5192_s21 + $0x2c] sm:$0xf] %v498_v15  ;;  %v502_v17 = vld [vmem:[%s5187_s29 + $0x68] sm:$0xf]  ;;  %v504_v18 = vld [vmem:[%s5187_s29 + $0x70] sm:$0xf] }
  0x42   : > { %501 = vst [vmem:[%s5192_s21 + $0x30] sm:$0xf] %v500_v16  ;;  %503 = vst [vmem:[%s5192_s21 + $0x34] sm:$0xf] %v502_v17  ;;  %v506_v19 = vld [vmem:[%s5187_s29 + $0x78] sm:$0xf] }
  0x43   : > { %505 = vst [vmem:[%s5192_s21 + $0x38] sm:$0xf] %v504_v18  ;;  %v508_v20 = vld [vmem:[%s5187_s29 + $0x100] sm:$0xf]  ;;  %v510_v21 = vld [vmem:[%s5187_s29 + $0x108] sm:$0xf] }
  0x44   : > { %507 = vst [vmem:[%s5192_s21 + $0x3c] sm:$0xf] %v506_v19  ;;  %509 = vst [vmem:[%s5192_s21 + $0x40] sm:$0xf] %v508_v20  ;;  %v512_v22 = vld [vmem:[%s5187_s29 + $0x110] sm:$0xf] }
  0x45   : > { %511 = vst [vmem:[%s5192_s21 + $0x44] sm:$0xf] %v510_v21  ;;  %v514_v23 = vld [vmem:[%s5187_s29 + $0x118] sm:$0xf]  ;;  %v516_v24 = vld [vmem:[%s5187_s29 + $0x120] sm:$0xf] }
  0x46   : > { %513 = vst [vmem:[%s5192_s21 + $0x48] sm:$0xf] %v512_v22  ;;  %515 = vst [vmem:[%s5192_s21 + $0x4c] sm:$0xf] %v514_v23  ;;  %v518_v25 = vld [vmem:[%s5187_s29 + $0x128] sm:$0xf] }
  0x47   : > { %517 = vst [vmem:[%s5192_s21 + $0x50] sm:$0xf] %v516_v24  ;;  %v520_v26 = vld [vmem:[%s5187_s29 + $0x130] sm:$0xf]  ;;  %v522_v27 = vld [vmem:[%s5187_s29 + $0x138] sm:$0xf] }
  0x48   : > { %519 = vst [vmem:[%s5192_s21 + $0x54] sm:$0xf] %v518_v25  ;;  %521 = vst [vmem:[%s5192_s21 + $0x58] sm:$0xf] %v520_v26  ;;  %v524_v28 = vld [vmem:[%s5187_s29 + $0x140] sm:$0xf] }
  0x49   : > { %523 = vst [vmem:[%s5192_s21 + $0x5c] sm:$0xf] %v522_v27  ;;  %v526_v29 = vld [vmem:[%s5187_s29 + $0x148] sm:$0xf]  ;;  %v528_v30 = vld [vmem:[%s5187_s29 + $0x150] sm:$0xf] }
  0x4a   : > { %525 = vst [vmem:[%s5192_s21 + $0x60] sm:$0xf] %v524_v28  ;;  %527 = vst [vmem:[%s5192_s21 + $0x64] sm:$0xf] %v526_v29  ;;  %v530_v31 = vld [vmem:[%s5187_s29 + $0x158] sm:$0xf] }
  0x4b   : > { %529 = vst [vmem:[%s5192_s21 + $0x68] sm:$0xf] %v528_v30  ;;  %v532_v32 = vld [vmem:[%s5187_s29 + $0x160] sm:$0xf]  ;;  %v534_v33 = vld [vmem:[%s5187_s29 + $0x168] sm:$0xf] }
  0x4c   : > { %531 = vst [vmem:[%s5192_s21 + $0x6c] sm:$0xf] %v530_v31  ;;  %533 = vst [vmem:[%s5192_s21 + $0x70] sm:$0xf] %v532_v32  ;;  %v536_v34 = vld [vmem:[%s5187_s29 + $0x170] sm:$0xf] }
  0x4d   : > { %535 = vst [vmem:[%s5192_s21 + $0x74] sm:$0xf] %v534_v33  ;;  %v538_v35 = vld [vmem:[%s5187_s29 + $0x178] sm:$0xf]  ;;  %v540_v36 = vld [vmem:[%s5187_s29 + $0x200] sm:$0xf] }
  0x4e   : > { %537 = vst [vmem:[%s5192_s21 + $0x78] sm:$0xf] %v536_v34  ;;  %539 = vst [vmem:[%s5192_s21 + $0x7c] sm:$0xf] %v538_v35  ;;  %v542_v37 = vld [vmem:[%s5187_s29 + $0x208] sm:$0xf] }
  0x4f   : > { %541 = vst [vmem:[%s5192_s21 + $0x80] sm:$0xf] %v540_v36  ;;  %v544_v38 = vld [vmem:[%s5187_s29 + $0x210] sm:$0xf]  ;;  %v546_v39 = vld [vmem:[%s5187_s29 + $0x218] sm:$0xf] }
  0x50   : > { %543 = vst [vmem:[%s5192_s21 + $0x84] sm:$0xf] %v542_v37  ;;  %545 = vst [vmem:[%s5192_s21 + $0x88] sm:$0xf] %v544_v38  ;;  %v548_v40 = vld [vmem:[%s5187_s29 + $0x220] sm:$0xf] }
  0x51   : > { %547 = vst [vmem:[%s5192_s21 + $0x8c] sm:$0xf] %v546_v39  ;;  %v550_v41 = vld [vmem:[%s5187_s29 + $0x228] sm:$0xf]  ;;  %v552_v42 = vld [vmem:[%s5187_s29 + $0x230] sm:$0xf] }
  0x52   : > { %549 = vst [vmem:[%s5192_s21 + $0x90] sm:$0xf] %v548_v40  ;;  %551 = vst [vmem:[%s5192_s21 + $0x94] sm:$0xf] %v550_v41  ;;  %v554_v43 = vld [vmem:[%s5187_s29 + $0x238] sm:$0xf] }
  0x53   : > { %553 = vst [vmem:[%s5192_s21 + $0x98] sm:$0xf] %v552_v42  ;;  %v556_v44 = vld [vmem:[%s5187_s29 + $0x240] sm:$0xf]  ;;  %v558_v45 = vld [vmem:[%s5187_s29 + $0x248] sm:$0xf] }
  0x54   : > { %555 = vst [vmem:[%s5192_s21 + $0x9c] sm:$0xf] %v554_v43  ;;  %557 = vst [vmem:[%s5192_s21 + $0xa0] sm:$0xf] %v556_v44  ;;  %v560_v46 = vld [vmem:[%s5187_s29 + $0x250] sm:$0xf] }
  0x55   : > { %559 = vst [vmem:[%s5192_s21 + $0xa4] sm:$0xf] %v558_v45  ;;  %v562_v47 = vld [vmem:[%s5187_s29 + $0x258] sm:$0xf]  ;;  %v564_v48 = vld [vmem:[%s5187_s29 + $0x260] sm:$0xf] }
  0x56   : > { %561 = vst [vmem:[%s5192_s21 + $0xa8] sm:$0xf] %v560_v46  ;;  %563 = vst [vmem:[%s5192_s21 + $0xac] sm:$0xf] %v562_v47  ;;  %v566_v49 = vld [vmem:[%s5187_s29 + $0x268] sm:$0xf] }
  0x57   : > { %565 = vst [vmem:[%s5192_s21 + $0xb0] sm:$0xf] %v564_v48  ;;  %v568_v50 = vld [vmem:[%s5187_s29 + $0x270] sm:$0xf]  ;;  %v570_v51 = vld [vmem:[%s5187_s29 + $0x278] sm:$0xf] }
  0x58   : > { %567 = vst [vmem:[%s5192_s21 + $0xb4] sm:$0xf] %v566_v49  ;;  %569 = vst [vmem:[%s5192_s21 + $0xb8] sm:$0xf] %v568_v50 }
  0x59   : > { %571 = vst [vmem:[%s5192_s21 + $0xbc] sm:$0xf] %v570_v51 }
  0x5a PF: > { %p4071_p12 = scmp.ge.s32.totalorder %s5029_s18, 1  ;;  %p707_p13 = scmp.lt.s32.totalorder %s5029_s18, 5 }
  0x5c   : > { %p708_p0 = pnand %p4071_p12, %p707_p13 }
  0x5d   : > { %s714_s23 = sand.u32 (!%p708_p0), 1, %s5005_s30   ;;  %s4073_s24 = sshll.u32 (!%p708_p0), %s5017_s0, 4 }
  0x5e   : > { %711 = sbr.rel (%p708_p0) target bundleno = 2107 (0x83b), region = 139  ;;  %s4072_s19 = sshll.u32 (!%p708_p0), %s714_s23, 5 }
  0x5f   : > { %s4682_s25 = smul.u32 (!%p708_p0), 192, %s714_s23  ;;  %p782_p1 = scmp.lt.s32.totalorder (!%p708_p0), %s4073_s24, 31 }
  0x60   : > { %s4075_s20 = sshll.u32 (!%p708_p0), %s5013_s15, 4  ;;  %s5312_s27 = scalar_lea.vmem (!%p708_p0), [#allocation11], %s4072_s19 }
  0x61   : > { %p790_p2 = scmp.lt.s32.totalorder (!%p708_p0), %s4075_s20, 31  ;;  %s5314_s28 = scalar_lea.vmem (!%p708_p0), [#allocation12], %s4682_s25 }
  0x62   : > { %p4081_p3 = scmp.ne.s32.totalorder (!%p708_p0), %s5013_s15, 0 }
  0x65   : > { %s7107_s24 = smov (!%p782_p1, %s4073_s24), 31  ;;  %s7109_s20 = smov (!%p790_p2, %s4075_s20), 31 }
  0x66   : > { %s4074_s12 = sshll.u32 %s7107_s24, 3  ;;  %s4076_s30 = sshll.u32 %s7109_s20, 2  ;;  %v836_v52 = vld [vmem:[%s6994_s6] sm:$0xff] (!%p4081_p3)  ;;  %vm879_vm0 = vcmask (!%p4081_p3), 1043456   ;;  %v5032_v57 = vmov (!%p4081_p3), 0   ;;  %vm854_vm1 = vcmask (!%p4081_p3), 64512   ;;  %v839_v18 = vlaneseq (!%p4081_p3) }
  0x67   : > { %s5295_s22 = scalar_lea.vmem %s6989_s1, %s4074_s12  ;;  %s5300_s2 = scalar_lea.vmem %s7001_s13, %s4074_s12  ;;  %v4083_v55 = vcombine.high (!%p4081_p3), %v836_v52, %v836_v52  ;;  %v4082_v56 = vcombine.low (!%p4081_p3), %v836_v52, %v836_v52  ;;  %918 = vmatprep.mubr.bf16.mxu0 (!%p4081_p3), %v5032_v57  ;;  %958 = vmatprep.mubr.bf16.mxu1 (!%p4081_p3), %v5032_v57  ;;  %vm1096_vm2 = vcmask (!%p4081_p3), 23552   ;;  %vm1113_vm3 = vcmask (!%p4081_p3), 7168   ;;  %v837_v21 = vld [vmem:[%s6995_s7] sm:$0x3] (!%p4081_p3) }
  0x68   : > { %s5305_s23 = scalar_lea.vmem %s6992_s4, %s4076_s30  ;;  %s5310_s24 = scalar_lea.vmem %s6993_s5, %s4076_s30  ;;  %v812_v53 = vld [vmem:[%s5295_s22] sm:$0xff] (!%p4081_p3)  ;;  %v813_v54 = vld [vmem:[%s5295_s22 + $0x8] sm:$0xff] (!%p4081_p3)  ;;  %v814_v63 = vld [vmem:[%s5295_s22 + $0x10] sm:$0xff] (!%p4081_p3)  ;;  %v5033_v17 = vmov (!%p4081_p3), 0.0   ;;  %v840_v19 = vshrl.u32 (!%p4081_p3), %v839_v18, 7  ;;  %vm1023_vm4 = vcmask (!%p4081_p3), 261120  }
  0x69   : > { %811 = sbr.rel (%p4081_p3) target bundleno = 472 (0x1d8), region = 151  ;;  %v820_v58 = vld [vmem:[%s5295_s22 + $0x40] sm:$0xff] (!%p4081_p3)  ;;  %v821_v59 = vld [vmem:[%s5295_s22 + $0x48] sm:$0xff] (!%p4081_p3)  ;;  %4084 = vmatprep.subr.msk.bf16.mxu0 (!%p4081_p3), %vm879_vm0, %v4083_v55  ;;  %4671 = vmatprep.subr.msk.bf16.mxu1 (!%p4081_p3), %vm879_vm0, %v4083_v55  ;;  %v881_v60 = vsel (!%p4081_p3), %vm879_vm0, %v4082_v56, 0  ;;  %v828_v61 = vpack.c.bf16 (!%p4081_p3), %v813_v54, %v812_v53  ;;  %v815_v0 = vld [vmem:[%s5295_s22 + $0x18] sm:$0xff] (!%p4081_p3)  ;;  %1114 = vst.msk [vmem:[#allocation2] sm:$0xff] (!%p4081_p3), %vm1113_vm3, %v5033_v17 }
  0x6a   : > { %v832_v62 = vpack.c.bf16 (!%p4081_p3), %v821_v59, %v820_v58  ;;  %887 = vmatpush1.bf16.msra.mxu0 (!%p4081_p3), %v881_v60  ;;  %4672 = vmatpush1.bf16.msra.mxu1 (!%p4081_p3), %v881_v60  ;;  %v822_v1 = vld [vmem:[%s5295_s22 + $0x50] sm:$0xff] (!%p4081_p3)  ;;  %v823_v2 = vld [vmem:[%s5295_s22 + $0x58] sm:$0xff] (!%p4081_p3)  ;;  %v829_v3 = vpack.c.bf16 (!%p4081_p3), %v815_v0, %v814_v63  ;;  %v816_v5 = vld [vmem:[%s5295_s22 + $0x20] sm:$0xff] (!%p4081_p3)  ;;  %1115 = vst.msk [vmem:[#allocation2 + $0x8] sm:$0xff] (!%p4081_p3), %vm1113_vm3, %v5033_v17  ;;  %v841_v20 = vsub.s32 (!%p4081_p3), 0, %v840_v19  ;;  %v845_v22 = vsub.s32 (!%p4081_p3), 1, %v840_v19 }
  0x6b   : > { %v833_v4 = vpack.c.bf16 (!%p4081_p3), %v823_v2, %v822_v1  ;;  %v817_v6 = vld [vmem:[%s5295_s22 + $0x28] sm:$0xff] (!%p4081_p3)  ;;  %v824_v7 = vld [vmem:[%s5295_s22 + $0x60] sm:$0xff] (!%p4081_p3)  ;;  %v818_v11 = vld [vmem:[%s5295_s22 + $0x30] sm:$0xff] (!%p4081_p3)  ;;  %1116 = vst.msk [vmem:[#allocation2 + $0x10] sm:$0xff] (!%p4081_p3), %vm1113_vm3, %v5033_v17  ;;  %s5034_s17 = smov (!%p4081_p3), 96  }
  0x6c   : > { %v825_v8 = vld [vmem:[%s5295_s22 + $0x68] sm:$0xff] (!%p4081_p3)  ;;  %v830_v9 = vpack.c.bf16 (!%p4081_p3), %v817_v6, %v816_v5  ;;  %v819_v12 = vld [vmem:[%s5295_s22 + $0x38] sm:$0xff] (!%p4081_p3)  ;;  %v826_v13 = vld [vmem:[%s5295_s22 + $0x70] sm:$0xff] (!%p4081_p3)  ;;  %1117 = vst.msk [vmem:[#allocation2 + $0x18] sm:$0xff] (!%p4081_p3), %vm1113_vm3, %v5033_v17  ;;  %v5459_v23 = vrot.slane (!%p4081_p3), %v837_v21, %v841_v20  ;;  %v5461_v24 = vrot.slane (!%p4081_p3), %v837_v21, %v845_v22 }
  0x6d   : > { %4085 = vmatmul.mubr.msk.bf16.vlgmr.msra.gmra.mrb[0].mxu0 (!%p4081_p3), %vm854_vm1, %v828_v61  ;;  %4089 = vmatmul.mubr.msk.bf16.vlgmr.msra.gmra.mrb[0].mxu1 (!%p4081_p3), %vm854_vm1, %v832_v62  ;;  %v834_v10 = vpack.c.bf16 (!%p4081_p3), %v825_v8, %v824_v7  ;;  %v827_v14 = vld [vmem:[%s5295_s22 + $0x78] sm:$0xff] (!%p4081_p3)  ;;  %v831_v15 = vpack.c.bf16 (!%p4081_p3), %v819_v12, %v818_v11  ;;  %1118 = vst.msk [vmem:[#allocation2 + $0x20] sm:$0xff] (!%p4081_p3), %vm1113_vm3, %v5033_v17  ;;  %1119 = vst.msk [vmem:[#allocation2 + $0x28] sm:$0xff] (!%p4081_p3), %vm1113_vm3, %v5033_v17 }
  0x6e   : > { %928 = vmatprep.mubr.bf16.mxu0 (!%p4081_p3), %v5032_v57  ;;  %968 = vmatprep.mubr.bf16.mxu1 (!%p4081_p3), %v5032_v57  ;;  %v835_v16 = vpack.c.bf16 (!%p4081_p3), %v827_v14, %v826_v13  ;;  %1120 = vst.msk [vmem:[#allocation2 + $0x30] sm:$0xff] (!%p4081_p3), %vm1113_vm3, %v5033_v17  ;;  %1121 = vst.msk [vmem:[#allocation2 + $0x38] sm:$0xff] (!%p4081_p3), %vm1113_vm3, %v5033_v17 }
  0x6f   : > { %1122 = vst.msk [vmem:[#allocation2 + $0x40] sm:$0xff] (!%p4081_p3), %vm1113_vm3, %v5033_v17  ;;  %1123 = vst.msk [vmem:[#allocation2 + $0x48] sm:$0xff] (!%p4081_p3), %vm1113_vm3, %v5033_v17 }
  0x70   : > { %1124 = vst.msk [vmem:[#allocation2 + $0x50] sm:$0xff] %vm1113_vm3, %v5033_v17  ;;  %1125 = vst.msk [vmem:[#allocation2 + $0x58] sm:$0xff] %vm1113_vm3, %v5033_v17 }
  0x71   : > { %1126 = vst.msk [vmem:[#allocation2 + $0x60] sm:$0xff] %vm1113_vm3, %v5033_v17  ;;  %1127 = vst.msk [vmem:[#allocation2 + $0x68] sm:$0xff] %vm1113_vm3, %v5033_v17 }
  0x72   : > { %1128 = vst.msk [vmem:[#allocation2 + $0x70] sm:$0xff] %vm1113_vm3, %v5033_v17  ;;  %1129 = vst.msk [vmem:[#allocation2 + $0x78] sm:$0xff] %vm1113_vm3, %v5033_v17 }
  0x73   : > { %1130 = vst.msk [vmem:[#allocation3] sm:$0xff] %vm1113_vm3, %v5033_v17  ;;  %1131 = vst.msk [vmem:[#allocation3 + $0x8] sm:$0xff] %vm1113_vm3, %v5033_v17 }
  0x74   : > { %1132 = vst.msk [vmem:[#allocation3 + $0x10] sm:$0xff] %vm1113_vm3, %v5033_v17  ;;  %1133 = vst.msk [vmem:[#allocation3 + $0x18] sm:$0xff] %vm1113_vm3, %v5033_v17 }
  0x75   : > { %4086 = vmatmul.mubr.msk.bf16.gmra.mrb[4].mxu0 %vm854_vm1, %v829_v3  ;;  %4090 = vmatmul.mubr.msk.bf16.gmra.mrb[4].mxu1 %vm854_vm1, %v833_v4  ;;  %1134 = vst.msk [vmem:[#allocation3 + $0x20] sm:$0xff] %vm1113_vm3, %v5033_v17  ;;  %1135 = vst.msk [vmem:[#allocation3 + $0x28] sm:$0xff] %vm1113_vm3, %v5033_v17 }
  0x76   : > { %938 = vmatprep.mubr.bf16.mxu0 %v5032_v57  ;;  %978 = vmatprep.mubr.bf16.mxu1 %v5032_v57  ;;  %1136 = vst.msk [vmem:[#allocation3 + $0x30] sm:$0xff] %vm1113_vm3, %v5033_v17  ;;  %1137 = vst.msk [vmem:[#allocation3 + $0x38] sm:$0xff] %vm1113_vm3, %v5033_v17 }
  0x77   : > { %1138 = vst.msk [vmem:[#allocation3 + $0x40] sm:$0xff] %vm1113_vm3, %v5033_v17  ;;  %1139 = vst.msk [vmem:[#allocation3 + $0x48] sm:$0xff] %vm1113_vm3, %v5033_v17 }
  0x78   : > { %1140 = vst.msk [vmem:[#allocation3 + $0x50] sm:$0xff] %vm1113_vm3, %v5033_v17  ;;  %1141 = vst.msk [vmem:[#allocation3 + $0x58] sm:$0xff] %vm1113_vm3, %v5033_v17 }
  0x79   : > { %1142 = vst.msk [vmem:[#allocation3 + $0x60] sm:$0xff] %vm1113_vm3, %v5033_v17  ;;  %1143 = vst.msk [vmem:[#allocation3 + $0x68] sm:$0xff] %vm1113_vm3, %v5033_v17 }
  0x7a   : > { %1144 = vst.msk [vmem:[#allocation3 + $0x70] sm:$0xff] %vm1113_vm3, %v5033_v17  ;;  %1145 = vst.msk [vmem:[#allocation3 + $0x78] sm:$0xff] %vm1113_vm3, %v5033_v17 }
  0x7b   : > { %1146 = vst [vmem:[#allocation4] sm:$0xff] %v5033_v17  ;;  %1147 = vst [vmem:[#allocation4 + $0x8] sm:$0xff] %v5033_v17 }
  0x7c   : > { %1148 = vst [vmem:[#allocation4 + $0x10] sm:$0xff] %v5033_v17  ;;  %1149 = vst [vmem:[#allocation4 + $0x18] sm:$0xff] %v5033_v17 }
  0x7d   : > { %4087 = vmatmul.mubr.msk.bf16.gmra.mrb[8].mxu0 %vm854_vm1, %v830_v9  ;;  %4091 = vmatmul.mubr.msk.bf16.gmra.mrb[8].mxu1 %vm854_vm1, %v834_v10  ;;  %1150 = vst [vmem:[#allocation4 + $0x20] sm:$0xff] %v5033_v17  ;;  %1151 = vst [vmem:[#allocation4 + $0x28] sm:$0xff] %v5033_v17 }
  0x7e   : > { %948 = vmatprep.mubr.bf16.mxu0 %v5032_v57  ;;  %988 = vmatprep.mubr.bf16.mxu1 %v5032_v57  ;;  %1152 = vst [vmem:[#allocation4 + $0x30] sm:$0xff] %v5033_v17  ;;  %1153 = vst [vmem:[#allocation4 + $0x38] sm:$0xff] %v5033_v17 }
  0x7f   : > { %1154 = vst [vmem:[#allocation4 + $0x40] sm:$0xff] %v5033_v17  ;;  %1155 = vst [vmem:[#allocation4 + $0x48] sm:$0xff] %v5033_v17 }
  0x80   : > { %1156 = vst [vmem:[#allocation4 + $0x50] sm:$0xff] %v5033_v17  ;;  %1157 = vst [vmem:[#allocation4 + $0x58] sm:$0xff] %v5033_v17 }
  0x81   : > { %1158 = vst [vmem:[#allocation4 + $0x60] sm:$0xff] %v5033_v17  ;;  %1159 = vst [vmem:[#allocation4 + $0x68] sm:$0xff] %v5033_v17 }
  0x82   : > { %1160 = vst [vmem:[#allocation4 + $0x70] sm:$0xff] %v5033_v17  ;;  %1161 = vst [vmem:[#allocation4 + $0x78] sm:$0xff] %v5033_v17 }
  0x83   : > { %1162 = vst.msk [vmem:[#allocation5] sm:$0xff] %vm1096_vm2, %v5033_v17  ;;  %1163 = vst.msk [vmem:[#allocation5 + $0x8] sm:$0xff] %vm1096_vm2, %v5033_v17 }
  0x84   : > { %1164 = vst.msk [vmem:[#allocation5 + $0x10] sm:$0xff] %vm1096_vm2, %v5033_v17  ;;  %1165 = vst.msk [vmem:[#allocation5 + $0x18] sm:$0xff] %vm1096_vm2, %v5033_v17 }
  0x85   : > { %4088 = vmatmul.mubr.msk.bf16.gmra.mrb[12].mxu0 %vm854_vm1, %v831_v15  ;;  %4092 = vmatmul.mubr.msk.bf16.gmra.mrb[12].mxu1 %vm854_vm1, %v835_v16  ;;  %1166 = vst.msk [vmem:[#allocation5 + $0x20] sm:$0xff] %vm1096_vm2, %v5033_v17  ;;  %1167 = vst.msk [vmem:[#allocation5 + $0x28] sm:$0xff] %vm1096_vm2, %v5033_v17 }
  0x86   : > { %1168 = vst.msk [vmem:[#allocation5 + $0x30] sm:$0xff] %vm1096_vm2, %v5033_v17  ;;  %1169 = vst.msk [vmem:[#allocation5 + $0x38] sm:$0xff] %vm1096_vm2, %v5033_v17 }
  0x87   : > { %1170 = vst.msk [vmem:[#allocation5 + $0x40] sm:$0xff] %vm1096_vm2, %v5033_v17  ;;  %1171 = vst.msk [vmem:[#allocation5 + $0x48] sm:$0xff] %vm1096_vm2, %v5033_v17 }
  0x88   : > { %1172 = vst.msk [vmem:[#allocation5 + $0x50] sm:$0xff] %vm1096_vm2, %v5033_v17  ;;  %1173 = vst.msk [vmem:[#allocation5 + $0x58] sm:$0xff] %vm1096_vm2, %v5033_v17 }
  0x89   : > { %1174 = vst.msk [vmem:[#allocation5 + $0x60] sm:$0xff] %vm1096_vm2, %v5033_v17  ;;  %1175 = vst.msk [vmem:[#allocation5 + $0x68] sm:$0xff] %vm1096_vm2, %v5033_v17 }
  0x8a   : > { %1176 = vst.msk [vmem:[#allocation5 + $0x70] sm:$0xff] %vm1096_vm2, %v5033_v17  ;;  %1177 = vst.msk [vmem:[#allocation5 + $0x78] sm:$0xff] %vm1096_vm2, %v5033_v17 }
 0x140   : > { %v920_v25 = vpop.f32.mrb[0].mxu0  ;;  %v960_v26 = vpop.f32.mrb[0].mxu1 }
 0x141   : > { %v921_v27 = vadd.f32 %v920_v25, %v5459_v23  ;;  %v961_v28 = vadd.f32 %v960_v26, %v5459_v23  ;;  %v922_v29 = vpop.f32.mrb[1].mxu0  ;;  %v962_v30 = vpop.f32.mrb[1].mxu1 }
 0x142   : > { %v923_v31 = vadd.f32 %v922_v29, %v5461_v24  ;;  %v963_v32 = vadd.f32 %v962_v30, %v5461_v24  ;;  %v924_v33 = vpop.f32.mrb[2].mxu0  ;;  %v964_v34 = vpop.f32.mrb[2].mxu1 }
 0x143   : > { %999 = vst [vmem:[#allocation8] sm:$0xff] %v921_v27  ;;  %1007 = vst [vmem:[#allocation8 + $0x40] sm:$0xff] %v961_v28  ;;  %v925_v35 = vadd.f32 %v924_v33, %v5459_v23  ;;  %v965_v36 = vadd.f32 %v964_v34, %v5459_v23  ;;  %v926_v37 = vpop.f32.mrb[3].mxu0  ;;  %v966_v38 = vpop.f32.mrb[3].mxu1 }
 0x144   : > { %v927_v39 = vadd.f32 %v926_v37, %v5461_v24  ;;  %v967_v40 = vadd.f32 %v966_v38, %v5461_v24  ;;  %1048 = vrot.lane.b32.xlu0 %v923_v31, %s5034_s17 }
 0x145   : > { %1000 = vst [vmem:[#allocation8 + $0x8] sm:$0xff] %v925_v35  ;;  %1008 = vst [vmem:[#allocation8 + $0x48] sm:$0xff] %v965_v36 }
 0x146   : > { %v1015_v41 = vpack.c.bf16 %v927_v39, %v923_v31  ;;  %v1019_v42 = vpack.c.bf16 %v967_v40, %v963_v32  ;;  %1066 = vrot.lane.b32.xlu1 %v967_v40, %s5034_s17 }
 0x148   : > { %1024 = vst.msk [vmem:[#allocation6] sm:$0xff] %vm1023_vm4, %v1015_v41  ;;  %1028 = vst.msk [vmem:[#allocation6 + $0x20] sm:$0xff] %vm1023_vm4, %v1019_v42  ;;  %v930_v43 = vpop.f32.mrb[4].mxu0  ;;  %1064 = vrot.lane.b32.xlu0 %v963_v32, %s5034_s17  ;;  %v970_v44 = vpop.f32.mrb[4].mxu1 }
 0x149   : > { %v931_v45 = vadd.f32 %v930_v43, %v5459_v23  ;;  %v932_v46 = vpop.f32.mrb[5].mxu0  ;;  %v971_v47 = vadd.f32 %v970_v44, %v5459_v23  ;;  %v972_v48 = vpop.f32.mrb[5].mxu1 }
 0x14a   : > { %v933_v49 = vadd.f32 %v932_v46, %v5461_v24  ;;  %v934_v50 = vpop.f32.mrb[6].mxu0  ;;  %v973_v51 = vadd.f32 %v972_v48, %v5461_v24  ;;  %v974_v52 = vpop.f32.mrb[6].mxu1 }
 0x14b   : > { %1001 = vst [vmem:[#allocation8 + $0x10] sm:$0xff] %v931_v45  ;;  %v935_v53 = vadd.f32 %v934_v50, %v5459_v23  ;;  %v936_v54 = vpop.f32.mrb[7].mxu0  ;;  %1009 = vst [vmem:[#allocation8 + $0x50] sm:$0xff] %v971_v47  ;;  %v975_v55 = vadd.f32 %v974_v52, %v5459_v23  ;;  %v976_v56 = vpop.f32.mrb[7].mxu1 }
 0x14c   : > { %v937_v57 = vadd.f32 %v936_v54, %v5461_v24  ;;  %1052 = vrot.lane.b32.xlu1 %v933_v49, %s5034_s17  ;;  %1050 = vrot.lane.b32.xlu0 %v927_v39, %s5034_s17  ;;  %v977_v58 = vadd.f32 %v976_v56, %v5461_v24 }
 0x14d   : > { %1002 = vst [vmem:[#allocation8 + $0x18] sm:$0xff] %v935_v53  ;;  %1010 = vst [vmem:[#allocation8 + $0x58] sm:$0xff] %v975_v55 }
 0x14e   : > { %v1016_v59 = vpack.c.bf16 %v937_v57, %v933_v49  ;;  %v1020_v60 = vpack.c.bf16 %v977_v58, %v973_v51 }
 0x150   : > { %1025 = vst.msk [vmem:[#allocation6 + $0x8] sm:$0xff] %vm1023_vm4, %v1016_v59  ;;  %1029 = vst.msk [vmem:[#allocation6 + $0x28] sm:$0xff] %vm1023_vm4, %v1020_v60  ;;  %v940_v61 = vpop.f32.mrb[8].mxu0  ;;  %1054 = vrot.lane.b32.xlu1 %v937_v57, %s5034_s17  ;;  %1068 = vrot.lane.b32.xlu0 %v973_v51, %s5034_s17  ;;  %v980_v62 = vpop.f32.mrb[8].mxu1 }
 0x151   : > { %v941_v63 = vadd.f32 %v940_v61, %v5459_v23  ;;  %v942_v0 = vpop.f32.mrb[9].mxu0  ;;  %v981_v1 = vadd.f32 %v980_v62, %v5459_v23  ;;  %v982_v2 = vpop.f32.mrb[9].mxu1 }
 0x152   : > { %v943_v3 = vadd.f32 %v942_v0, %v5461_v24  ;;  %v944_v4 = vpop.f32.mrb[10].mxu0  ;;  %v983_v5 = vadd.f32 %v982_v2, %v5461_v24  ;;  %v984_v6 = vpop.f32.mrb[10].mxu1 }
 0x153   : > { %1003 = vst [vmem:[#allocation8 + $0x20] sm:$0xff] %v941_v63  ;;  %v945_v7 = vadd.f32 %v944_v4, %v5459_v23  ;;  %v946_v8 = vpop.f32.mrb[11].mxu0  ;;  %1011 = vst [vmem:[#allocation8 + $0x60] sm:$0xff] %v981_v1  ;;  %v985_v9 = vadd.f32 %v984_v6, %v5459_v23  ;;  %v986_v10 = vpop.f32.mrb[11].mxu1 }
 0x154   : > { %v947_v11 = vadd.f32 %v946_v8, %v5461_v24  ;;  %1070 = vrot.lane.b32.xlu1 %v977_v58, %s5034_s17  ;;  %1056 = vrot.lane.b32.xlu0 %v943_v3, %s5034_s17  ;;  %v987_v12 = vadd.f32 %v986_v10, %v5461_v24 }
 0x155   : > { %1004 = vst [vmem:[#allocation8 + $0x28] sm:$0xff] %v945_v7  ;;  %1012 = vst [vmem:[#allocation8 + $0x68] sm:$0xff] %v985_v9 }
 0x156   : > { %v1017_v13 = vpack.c.bf16 %v947_v11, %v943_v3  ;;  %v1021_v14 = vpack.c.bf16 %v987_v12, %v983_v5 }
 0x158   : > { %1026 = vst.msk [vmem:[#allocation6 + $0x10] sm:$0xff] %vm1023_vm4, %v1017_v13  ;;  %1030 = vst.msk [vmem:[#allocation6 + $0x30] sm:$0xff] %vm1023_vm4, %v1021_v14  ;;  %v950_v15 = vpop.f32.mrb[12].mxu0  ;;  %1058 = vrot.lane.b32.xlu1 %v947_v11, %s5034_s17  ;;  %1072 = vrot.lane.b32.xlu0 %v983_v5, %s5034_s17  ;;  %v990_v16 = vpop.f32.mrb[12].mxu1 }
 0x159   : > { %v951_v17 = vadd.f32 %v950_v15, %v5459_v23  ;;  %v952_v18 = vpop.f32.mrb[13].mxu0  ;;  %v991_v19 = vadd.f32 %v990_v16, %v5459_v23  ;;  %v992_v20 = vpop.f32.mrb[13].mxu1 }
 0x15a   : > { %v953_v21 = vadd.f32 %v952_v18, %v5461_v24  ;;  %v954_v22 = vpop.f32.mrb[14].mxu0  ;;  %v993_v25 = vadd.f32 %v992_v20, %v5461_v24  ;;  %v994_v26 = vpop.f32.mrb[14].mxu1 }
 0x15b   : > { %1005 = vst [vmem:[#allocation8 + $0x30] sm:$0xff] %v951_v17  ;;  %v955_v27 = vadd.f32 %v954_v22, %v5459_v23  ;;  %v956_v28 = vpop.f32.mrb[15].mxu0  ;;  %1013 = vst [vmem:[#allocation8 + $0x70] sm:$0xff] %v991_v19  ;;  %v995_v29 = vadd.f32 %v994_v26, %v5459_v23  ;;  %v996_v30 = vpop.f32.mrb[15].mxu1 }
 0x15c   : > { %v957_v31 = vadd.f32 %v956_v28, %v5461_v24  ;;  %1074 = vrot.lane.b32.xlu1 %v987_v12, %s5034_s17  ;;  %1060 = vrot.lane.b32.xlu0 %v953_v21, %s5034_s17  ;;  %v997_v32 = vadd.f32 %v996_v30, %v5461_v24 }
 0x15d   : > { %1006 = vst [vmem:[#allocation8 + $0x38] sm:$0xff] %v955_v27  ;;  %1014 = vst [vmem:[#allocation8 + $0x78] sm:$0xff] %v995_v29 }
 0x15e   : > { %v1018_v33 = vpack.c.bf16 %v957_v31, %v953_v21  ;;  %v1022_v34 = vpack.c.bf16 %v997_v32, %v993_v25 }
 0x160   : > { %1027 = vst.msk [vmem:[#allocation6 + $0x18] sm:$0xff] %vm1023_vm4, %v1018_v33  ;;  %1031 = vst.msk [vmem:[#allocation6 + $0x38] sm:$0xff] %vm1023_vm4, %v1022_v34  ;;  %1062 = vrot.lane.b32.xlu1 %v957_v31, %s5034_s17  ;;  %1076 = vrot.lane.b32.xlu0 %v993_v25, %s5034_s17 }
 0x164   : > { %1078 = vrot.lane.b32.xlu1 %v997_v32, %s5034_s17 }
 0x1b6   : > { %v1049_v23 = vpop.permute.xlu0 %1048 }
 0x1b7   : > { %1097 = vst.msk [vmem:[#allocation7] sm:$0xff] %vm1096_vm2, %v1049_v23 }
 0x1b8   : > { %v1067_v35 = vpop.permute.xlu1 %1066 }
 0x1b9   : > { %1106 = vst.msk [vmem:[#allocation7 + $0x48] sm:$0xff] %vm1096_vm2, %v1067_v35 }
 0x1ba   : > { %v1065_v24 = vpop.permute.xlu0 %1064 }
 0x1bb   : > { %1105 = vst.msk [vmem:[#allocation7 + $0x40] sm:$0xff] %vm1096_vm2, %v1065_v24 }
 0x1be   : > { %v1053_v36 = vpop.permute.xlu1 %1052  ;;  %v1051_v37 = vpop.permute.xlu0 %1050 }
 0x1bf   : > { %1099 = vst.msk [vmem:[#allocation7 + $0x10] sm:$0xff] %vm1096_vm2, %v1053_v36  ;;  %1098 = vst.msk [vmem:[#allocation7 + $0x8] sm:$0xff] %vm1096_vm2, %v1051_v37 }
 0x1c2   : > { %v1055_v38 = vpop.permute.xlu1 %1054  ;;  %v1069_v39 = vpop.permute.xlu0 %1068 }
 0x1c3   : > { %1100 = vst.msk [vmem:[#allocation7 + $0x18] sm:$0xff] %vm1096_vm2, %v1055_v38  ;;  %1107 = vst.msk [vmem:[#allocation7 + $0x50] sm:$0xff] %vm1096_vm2, %v1069_v39 }
 0x1c6   : > { %v1071_v40 = vpop.permute.xlu1 %1070  ;;  %v1057_v41 = vpop.permute.xlu0 %1056 }
 0x1c7   : > { %1108 = vst.msk [vmem:[#allocation7 + $0x58] sm:$0xff] %vm1096_vm2, %v1071_v40  ;;  %1101 = vst.msk [vmem:[#allocation7 + $0x20] sm:$0xff] %vm1096_vm2, %v1057_v41 }
 0x1ca   : > { %v1059_v42 = vpop.permute.xlu1 %1058  ;;  %v1073_v43 = vpop.permute.xlu0 %1072 }
 0x1cb   : > { %1102 = vst.msk [vmem:[#allocation7 + $0x28] sm:$0xff] %vm1096_vm2, %v1059_v42  ;;  %1109 = vst.msk [vmem:[#allocation7 + $0x60] sm:$0xff] %vm1096_vm2, %v1073_v43 }
 0x1ce   : > { %v1075_v44 = vpop.permute.xlu1 %1074  ;;  %v1061_v45 = vpop.permute.xlu0 %1060 }
 0x1cf   : > { %1110 = vst.msk [vmem:[#allocation7 + $0x68] sm:$0xff] %vm1096_vm2, %v1075_v44  ;;  %1103 = vst.msk [vmem:[#allocation7 + $0x30] sm:$0xff] %vm1096_vm2, %v1061_v45 }
 0x1d2   : > { %v1063_v46 = vpop.permute.xlu1 %1062  ;;  %v1077_v47 = vpop.permute.xlu0 %1076 }
 0x1d3   : > { %1104 = vst.msk [vmem:[#allocation7 + $0x38] sm:$0xff] %vm1096_vm2, %v1063_v46  ;;  %1111 = vst.msk [vmem:[#allocation7 + $0x70] sm:$0xff] %vm1096_vm2, %v1077_v47 }
 0x1d6   : > { %v1079_v48 = vpop.permute.xlu1 %1078 }
 0x1d7   : > { %1112 = vst.msk [vmem:[#allocation7 + $0x78] sm:$0xff] %vm1096_vm2, %v1079_v48 }
 0x1d8 PF: > { %s1178_s26 = sshra.s32 %s5013_s15, 7  ;;  %s1183_s19 = sand.u32 127, %s5013_s15 }
 0x1d9   : > { %s1180_s25 = sadd.s32 %s5017_s0, %s1178_s26 }
 0x1da   : > { %s4093_s20 = sshll.u32 %s1180_s25, 7 }
 0x1db   : > { %s1184_s22 = sadd.s32 %s4093_s20, %s1183_s19 }
 0x1dc   : > { %s1185_s21 = sld [smem:[#allocation10 + %s1184_s22]] }
 0x1e2   : > { %p4094_p4 = scmp.le.s32.totalorder %s1185_s21, 0 }
 0x1e4   : > { %1189 = sbr.rel (%p4094_p4) target bundleno = 1349 (0x545), region = 155 }
 0x1eb   : > { %v4765_v49 = vld [vmem:[%s5305_s23] sm:$0xff]   ;;  %vm1450_vm5 = vcmask 261120   ;;  %v4766_v50 = vld [vmem:[%s5305_s23 + $0x8] sm:$0xff]   ;;  %v5035_v52 = vmov 0   ;;  %v4767_v54 = vld [vmem:[%s5305_s23 + $0x10] sm:$0xff]   ;;  %v5036_v16 = vmov 1  }
 0x1ec   : > { %4673 = vmatprep.subr.msk.bf16.mxu0 %vm1450_vm5, %v4765_v49  ;;  %v1476_v51 = vsel %vm1450_vm5, %v4765_v49, 0  ;;  %4751 = vset.pattern.permute.xlu1 %v5035_v52  ;;  %v1479_v53 = vsel %vm1450_vm5, %v4766_v50, 0  ;;  %v1258_v55 = vld [vmem:[#allocation6] sm:$0xff]  ;;  %v5547_v56 = vld [vmem:[#allocation7 + $0x10] sm:$0xff]  ;;  %v5551_v57 = vld [vmem:[#allocation7 + $0x18] sm:$0xff]  ;;  %v1482_v61 = vsel %vm1450_vm5, %v4767_v54, 0 }
 0x1ed   : > { %4526 = vmatpush3.bf16.xpose.msra.mxu0 %v1476_v51  ;;  %4750 = vset.pattern.permute.xlu0 %v5035_v52  ;;  %v5553_v58 = vld [vmem:[#allocation7] sm:$0xff]  ;;  %v1267_v59 = vld [vmem:[#allocation7 + $0x8] sm:$0xff]  ;;  %v4768_v62 = vld [vmem:[%s5305_s23 + $0x18] sm:$0xff]   ;;  %v5037_v17 = vmov 2  }
 0x1ee   : > { %4674 = vmatprep.subr.msk.bf16.mxu0 %vm1450_vm5, %v4766_v50  ;;  %4541 = vmatprep.mubr.msk.bf16.mxu0 %vm1450_vm5, %v1258_v55  ;;  %v5558_v60 = vld [vmem:[#allocation7 + $0x28] sm:$0xff]  ;;  %v1270_v63 = vld [vmem:[#allocation7 + $0x20] sm:$0xff]  ;;  %v5563_v0 = vld [vmem:[#allocation7 + $0x38] sm:$0xff]  ;;  %v1485_v3 = vsel %vm1450_vm5, %v4768_v62, 0 }
 0x1ef   : > { %1326 = vperm.xlu1 %4751, %v5547_v56   ;;  %1316 = vperm.xlu0 %4750, %v5553_v58   ;;  %v1272_v1 = vld [vmem:[#allocation7 + $0x30] sm:$0xff]  ;;  %v5567_v2 = vld [vmem:[#allocation7 + $0x48] sm:$0xff]  ;;  %v4769_v4 = vld [vmem:[%s5305_s23 + $0x20] sm:$0xff]  }
 0x1f0   : > { %v5571_v5 = vld [vmem:[#allocation7 + $0x40] sm:$0xff]  ;;  %v5574_v6 = vld [vmem:[#allocation7 + $0x58] sm:$0xff]  ;;  %v5578_v7 = vld [vmem:[#allocation7 + $0x50] sm:$0xff]  ;;  %v1488_v9 = vsel %vm1450_vm5, %v4769_v4, 0 }
 0x1f1   : > { %v5581_v8 = vld [vmem:[#allocation7 + $0x68] sm:$0xff]  ;;  %v5586_v11 = vld [vmem:[#allocation7 + $0x60] sm:$0xff]  ;;  %v5589_v12 = vld [vmem:[#allocation7 + $0x78] sm:$0xff] }
 0x1f2   : > { %v4770_v10 = vld [vmem:[%s5305_s23 + $0x28] sm:$0xff]   ;;  %v5593_v13 = vld [vmem:[#allocation7 + $0x70] sm:$0xff]  ;;  %v4772_v19 = vld [vmem:[%s5305_s23 + $0x38] sm:$0xff]  }
 0x1f3   : > { %1331 = vperm.xlu1 %4751, %v5551_v57   ;;  %1321 = vperm.xlu0 %4750, %v1267_v59   ;;  %v1491_v14 = vsel %vm1450_vm5, %v4770_v10, 0  ;;  %v4771_v15 = vld [vmem:[%s5305_s23 + $0x30] sm:$0xff]   ;;  %v1497_v20 = vsel %vm1450_vm5, %v4772_v19, 0  ;;  %v1259_v21 = vld [vmem:[#allocation6 + $0x8] sm:$0xff]  ;;  %v1261_v25 = vld [vmem:[#allocation6 + $0x18] sm:$0xff] }
 0x1f4   : > { %v1494_v18 = vsel %vm1450_vm5, %v4771_v15, 0  ;;  %v1260_v22 = vld [vmem:[#allocation6 + $0x10] sm:$0xff]  ;;  %v1262_v26 = vld [vmem:[#allocation6 + $0x20] sm:$0xff]  ;;  %v1263_v27 = vld [vmem:[#allocation6 + $0x28] sm:$0xff] }
 0x1f5   : > { %4528 = vmatpush3.bf16.xpose.msra.mxu0 %v1479_v53  ;;  %v1264_v28 = vld [vmem:[#allocation6 + $0x30] sm:$0xff]  ;;  %v1265_v29 = vld [vmem:[#allocation6 + $0x38] sm:$0xff] }
 0x1f6   : > { %4675 = vmatprep.subr.msk.bf16.mxu0 %vm1450_vm5, %v4767_v54 }
 0x1f7   : > { %1341 = vperm.xlu1 %4751, %v5558_v60   ;;  %1336 = vperm.xlu0 %4750, %v1270_v63  }
 0x1fb   : > { %1351 = vperm.xlu1 %4751, %v5563_v0   ;;  %1346 = vperm.xlu0 %4750, %v1272_v1  }
 0x1fd   : > { %4530 = vmatpush3.bf16.xpose.msra.mxu0 %v1482_v61  ;;  %v5707_v61 = vld [vmem:[%s5314_s28] sm:$0xff]  }
 0x1fe   : > { %4676 = vmatprep.subr.msk.bf16.mxu0 %vm1450_vm5, %v4768_v62  ;;  %v5710_v62 = vld [vmem:[%s5314_s28 + $0x10] sm:$0xff]  }
 0x1ff   : > { %1361 = vperm.xlu1 %4751, %v5567_v2   ;;  %1356 = vperm.xlu0 %4750, %v5571_v5  }
 0x203   : > { %1371 = vperm.xlu1 %4751, %v5574_v6   ;;  %1366 = vperm.xlu0 %4750, %v5578_v7  }
 0x205   : > { %4532 = vmatpush3.bf16.xpose.msra.mxu0 %v1485_v3 }
 0x206   : > { %4677 = vmatprep.subr.msk.bf16.mxu0 %vm1450_vm5, %v4769_v4  ;;  %v5781_v4 = vld [vmem:[%s5314_s28 + $0x60] sm:$0xff]  }
 0x207   : > { %1381 = vperm.xlu1 %4751, %v5581_v8   ;;  %1376 = vperm.xlu0 %4750, %v5586_v11   ;;  %7034 = vst [vmem:[#allocation28_spill] sm:$0xff] %v5781_v4 }
 0x20b   : > { %1391 = vperm.xlu1 %4751, %v5589_v12   ;;  %1386 = vperm.xlu0 %4750, %v5593_v13  }
 0x20d   : > { %4534 = vmatpush3.bf16.xpose.msra.mxu0 %v1488_v9 }
 0x20e   : > { %4678 = vmatprep.subr.msk.bf16.mxu0 %vm1450_vm5, %v4770_v10  ;;  %v4217_v10 = vunpack.c.h.bf16 %v5707_v61 }
 0x20f   : > { %4752 = vset.pattern.permute.xlu1 %v5036_v16  ;;  %4753 = vset.pattern.permute.xlu0 %v5037_v17 }
 0x210   : > { %1634 = vperm.xlu1 %4752, %v1267_v59   ;;  %1759 = vperm.xlu0 %4753, %v5553_v58  }
 0x214   : > { %1638 = vperm.xlu1 %4752, %v5547_v56   ;;  %1771 = vperm.xlu0 %4753, %v5551_v57  }
 0x215   : > { %4536 = vmatpush3.bf16.xpose.msra.mxu0 %v1491_v14  ;;  %v5741_v14 = vld [vmem:[%s5314_s28 + $0x48] sm:$0xff]  }
 0x216   : > { %4679 = vmatprep.subr.msk.bf16.mxu0 %vm1450_vm5, %v4771_v15  ;;  %v5744_v15 = vld [vmem:[%s5314_s28 + $0x50] sm:$0xff]  }
 0x218   : > { %1646 = vperm.xlu1 %4752, %v1270_v63   ;;  %1775 = vperm.xlu0 %4753, %v1270_v63   ;;  %v5713_v63 = vld [vmem:[%s5314_s28 + $0x18] sm:$0xff]  }
 0x21c   : > { %1654 = vperm.xlu1 %4752, %v1272_v1   ;;  %1783 = vperm.xlu0 %4753, %v1272_v1   ;;  %v5719_v1 = vld [vmem:[%s5314_s28 + $0x28] sm:$0xff]  }
 0x21d   : > { %4538 = vmatpush3.bf16.xpose.msra.mxu0 %v1494_v18  ;;  %v5769_v18 = vld [vmem:[%s5314_s28 + $0x98] sm:$0xff]  }
 0x21e   : > { %4680 = vmatprep.subr.msk.bf16.mxu0 %vm1450_vm5, %v4772_v19  ;;  %7033 = vst [vmem:[#allocation27_spill] sm:$0xff] %v5769_v18  ;;  %v5799_v19 = vld [vmem:[%s5314_s28 + $0x70] sm:$0xff]  }
 0x220   : > { %4754 = vset.pattern.permute.xlu1 %v5037_v17  ;;  %4757 = vset.pattern.permute.xlu0 %v5036_v16 }
 0x221   : > { %1763 = vperm.xlu1 %4754, %v1267_v59   ;;  %1630 = vperm.xlu0 %4757, %v5553_v58  }
 0x225   : > { %4540 = vmatpush3.bf16.xpose.msra.mxu0 %v1497_v20  ;;  %1767 = vperm.xlu1 %4754, %v5547_v56   ;;  %v1222_v20 = vld [vmem:[%s5312_s27] sm:$0xff] }
 0x226   : > { %1642 = vperm.xlu0 %4757, %v5551_v57  }
 0x229   : > { %4755 = vset.pattern.permute.xlu1 %v5036_v16 }
 0x22a   : > { %1658 = vperm.xlu1 %4755, %v5563_v0   ;;  %1650 = vperm.xlu0 %4757, %v5558_v60  }
 0x22c   : > { %4542 = vmatmul.mubr.msk.bf16.vlgmr.msra.gmra.mrb[0].mxu0 %vm1450_vm5, %v1259_v21  ;;  %v5754_v21 = vld [vmem:[%s5314_s28 + $0x58] sm:$0xff]  }
 0x22d   : > { %4545 = vmatprep.mubr.msk.bf16.mxu0 %vm1450_vm5, %v1260_v22  ;;  %v5757_v22 = vld [vmem:[%s5314_s28 + $0x88] sm:$0xff]  }
 0x22e   : > { %4756 = vset.pattern.permute.xlu1 %v5037_v17  ;;  %1662 = vperm.xlu0 %4757, %v5571_v5  }
 0x22f   : > { %1779 = vperm.xlu1 %4756, %v5558_v60   ;;  %v5704_v60 = vld [vmem:[%s5314_s28 + $0x8] sm:$0xff]  }
 0x230   : > { %v4220_v3 = vunpack.c.l.bf16 %v5704_v60 }
 0x232   : > { %1674 = vperm.xlu0 %4757, %v5574_v6  }
 0x233   : > { %1787 = vperm.xlu1 %4756, %v5563_v0   ;;  %v5716_v0 = vld [vmem:[%s5314_s28 + $0x20] sm:$0xff]  }
 0x234   : > { %4546 = vmatmul.mubr.msk.bf16.gmra.mrb[4].mxu0 %vm1450_vm5, %v1261_v25 }
 0x235   : > { %4549 = vmatprep.mubr.msk.bf16.mxu0 %vm1450_vm5, %v1262_v26  ;;  %v5789_v26 = vld [vmem:[%s5314_s28 + $0x68] sm:$0xff]  }
 0x236   : > { %1678 = vperm.xlu0 %4757, %v5586_v11   ;;  %7036 = vst [vmem:[#allocation30_spill] sm:$0xff] %v5789_v26  ;;  %v7040_v26 = vunpack.c.h.bf16 %v5710_v62 }
 0x237   : > { %4758 = vset.pattern.permute.xlu1 %v5036_v16 }
 0x238   : > { %1666 = vperm.xlu1 %4758, %v5567_v2  }
 0x23a   : > { %1690 = vperm.xlu0 %4757, %v5589_v12  }
 0x23c   : > { %4550 = vmatmul.mubr.msk.bf16.gmra.mrb[8].mxu0 %vm1450_vm5, %v1263_v27  ;;  %1670 = vperm.xlu1 %4758, %v5578_v7   ;;  %v5792_v27 = vld [vmem:[%s5314_s28 + $0xa0] sm:$0xff]  }
 0x23d   : > { %4553 = vmatprep.mubr.msk.bf16.mxu0 %vm1450_vm5, %v1264_v28 }
 0x23e   : > { %4761 = vset.pattern.permute.xlu0 %v5037_v17 }
 0x23f   : > { %1795 = vperm.xlu0 %4761, %v5567_v2   ;;  %v5722_v2 = vld [vmem:[%s5314_s28 + $0x30] sm:$0xff]  }
 0x240   : > { %4759 = vset.pattern.permute.xlu1 %v5037_v17 }
 0x241   : > { %1791 = vperm.xlu1 %4759, %v5571_v5   ;;  %v7039_v5 = vunpack.c.l.bf16 %v5707_v61 }
 0x243   : > { %1811 = vperm.xlu0 %4761, %v5581_v8  }
 0x244   : > { %4554 = vmatmul.mubr.msk.bf16.gmra.mrb[12].mxu0 %vm1450_vm5, %v1265_v29  ;;  %v1228_v29 = vunpack.c.2.s8 %v1222_v20 }
 0x245   : > { %1799 = vperm.xlu1 %4759, %v5578_v7   ;;  %v5729_v7 = vld [vmem:[%s5314_s28 + $0x38] sm:$0xff]  }
 0x247   : > { %4764 = vset.pattern.permute.xlu0 %v5035_v52 }
 0x249   : > { %1803 = vperm.xlu1 %4759, %v5574_v6  }
 0x24d   : > { %4760 = vset.pattern.permute.xlu1 %v5036_v16  ;;  %v5747_v16 = vld [vmem:[%s5314_s28 + $0x80] sm:$0xff]  }
 0x24e   : > { %1682 = vperm.xlu1 %4760, %v5581_v8   ;;  %v5732_v8 = vld [vmem:[%s5314_s28 + $0x40] sm:$0xff]  }
 0x24f   : > { %v4248_v28 = vunpack.c.l.bf16 %v5732_v8 }
 0x252   : > { %1686 = vperm.xlu1 %4760, %v5593_v13  }
 0x256   : > { %4762 = vset.pattern.permute.xlu1 %v5037_v17  ;;  %v4228_v17 = vunpack.c.l.bf16 %v5713_v63 }
 0x257   : > { %1807 = vperm.xlu1 %4762, %v5586_v11   ;;  %v4229_v11 = vunpack.c.h.bf16 %v5713_v63  ;;  %v5766_v63 = vld [vmem:[%s5314_s28 + $0x90] sm:$0xff]  }
 0x258   : > { %7032 = vst [vmem:[#allocation26_spill] sm:$0xff] %v5766_v63  ;;  %v1226_v63 = vunpack.c.0.s8 %v1222_v20 }
 0x25b   : > { %1815 = vperm.xlu1 %4762, %v5593_v13  }
 0x25f   : > { %1819 = vperm.xlu1 %4762, %v5589_v12   ;;  %v4224_v12 = vunpack.c.l.bf16 %v5710_v62  ;;  %v7042_v62 = vunpack.c.l.bf16 %v5716_v0 }
 0x263   : > { %4763 = vset.pattern.permute.xlu1 %v5035_v52 }
 0x26e   : > { %v5639_v30 = vpop.permute.xlu1 %1326  ;;  %v5651_v35 = vpop.permute.xlu0 %1316 }
 0x272   : > { %v5641_v31 = vpop.permute.xlu1 %1331  ;;  %v5655_v36 = vpop.permute.xlu0 %1321 }
 0x276   : > { %v5643_v32 = vpop.permute.xlu1 %1341  ;;  %v5659_v38 = vpop.permute.xlu0 %1336 }
 0x277   : > { %v5828_v18 = vmul.f32 %v7040_v26, %v5643_v32 }
 0x27a   : > { %v5645_v33 = vpop.permute.xlu1 %1351  ;;  %v5663_v40 = vpop.permute.xlu0 %1346 }
 0x27e   : > { %v5647_v34 = vpop.permute.xlu1 %1361  ;;  %v5667_v42 = vpop.permute.xlu0 %1356 }
 0x282   : > { %v5649_v23 = vpop.permute.xlu1 %1371  ;;  %v5671_v44 = vpop.permute.xlu0 %1366 }
 0x286   : > { %v5653_v24 = vpop.permute.xlu1 %1381  ;;  %v5675_v46 = vpop.permute.xlu0 %1376 }
 0x28a   : > { %v5657_v37 = vpop.permute.xlu1 %1391  ;;  %v5679_v48 = vpop.permute.xlu0 %1386 }
 0x28f   : > { %v5661_v39 = vpop.permute.xlu1 %1634  ;;  %v5683_v50 = vpop.permute.xlu0 %1759 }
 0x293   : > { %v5665_v41 = vpop.permute.xlu1 %1638  ;;  %v5687_v52 = vpop.permute.xlu0 %1771 }
 0x297   : > { %v5669_v43 = vpop.permute.xlu1 %1646  ;;  %v5691_v54 = vpop.permute.xlu0 %1775 }
 0x298   : > { %7027 = vst [vmem:[#allocation21_spill] sm:$0xff] %v5691_v54 }
 0x29b   : > { %v5673_v45 = vpop.permute.xlu1 %1654  ;;  %v5695_v56 = vpop.permute.xlu0 %1783 }
 0x2a0   : > { %v5677_v47 = vpop.permute.xlu1 %1763  ;;  %v5699_v58 = vpop.permute.xlu0 %1630 }
 0x2a4   : > { %v5681_v49 = vpop.permute.xlu1 %1767 }
 0x2a5   : > { %v5734_v9 = vpop.permute.xlu0 %1642 }
 0x2a9   : > { %v5685_v51 = vpop.permute.xlu1 %1658  ;;  %v5786_v6 = vpop.permute.xlu0 %1650 }
 0x2aa   : > { %7025 = vst [vmem:[#allocation19_spill] sm:$0xff] %v5685_v51  ;;  %7035 = vst [vmem:[#allocation29_spill] sm:$0xff] %v5786_v6  ;;  %v1227_v6 = vunpack.c.1.s8 %v1222_v20  ;;  %v1396_v51 = vmul.f32 %v4220_v3, %v5639_v30  ;;  %v1395_v30 = vmul.f32 %v4217_v10, %v5655_v36  ;;  %v5832_v3 = vmul.f32 %v4229_v11, %v5645_v33 }
 0x2ab   : > { %v5849_v36 = vcvt.s32.f32 %v1226_v63  ;;  %v7043_v10 = vunpack.c.h.bf16 %v5719_v1  ;;  %v5889_v63 = vld [vmem:[%s5312_s27 + $0x10] sm:$0xff] }
 0x2ad   : > { %v5870_v11 = vmul.f32 %v7043_v10, %v5649_v23  ;;  %v1693_v10 = vmul.f32 %v4248_v28, %v5699_v58  ;;  %vm1854_vm8 = vcmp.gt.f32.partialorder %v5849_v36, 0.0  ;;  %v7068_v36 = vld [vmem:[#allocation21_spill] sm:$0xff] }
 0x2ae   : > { %v5689_v53 = vpop.permute.xlu1 %1779 }
 0x2af   : > { %7026 = vst [vmem:[#allocation20_spill] sm:$0xff] %v5689_v53  ;;  %v7038_v53 = vunpack.c.h.bf16 %v5704_v60  ;;  %v5846_v60 = vmul.f32 %v4228_v17, %v5663_v40 }
 0x2b1   : > { %v1397_v4 = vmul.f32 %v7038_v53, %v5641_v31  ;;  %v5840_v31 = vld [vmem:[%s5314_s28 + $0xa8] sm:$0xff]   ;;  %v5842_v53 = vcvt.s32.f32 %v1227_v6 }
 0x2b2   : > { %v5693_v55 = vpop.permute.xlu1 %1787 }
 0x2b3   : > { %7028 = vst [vmem:[#allocation22_spill] sm:$0xff] %v5693_v55  ;;  %v5817_v55 = vcvt.s32.f32 %v1228_v29  ;;  %v5837_v29 = vpop.permute.xlu0 %1662  ;;  %vm1855_vm7 = vcmp.gt.f32.partialorder %v5842_v53, 0.0 }
 0x2b5   : > { %vm1856_vm6 = vcmp.gt.f32.partialorder %v5817_v55, 0.0  ;;  %v7056_v55 = vunpack.c.l.bf16 %v5744_v15 }
 0x2b7   : > { %v5697_v57 = vpop.permute.xlu1 %1666 }
 0x2b8   : > { %7029 = vst [vmem:[#allocation23_spill] sm:$0xff] %v5697_v57  ;;  %v1394_v57 = vmul.f32 %v7039_v5, %v5651_v35  ;;  %v5860_v5 = vmul.f32 %v7042_v62, %v5667_v42  ;;  %v7044_v42 = vunpack.c.h.bf16 %v5722_v2 }
 0x2bb   : > { %v5701_v59 = vpop.permute.xlu1 %1670 }
 0x2bc   : > { %7030 = vst [vmem:[#allocation24_spill] sm:$0xff] %v5701_v59  ;;  %v5815_v59 = vld [vmem:[%s5314_s28 + $0x78] sm:$0xff]  }
 0x2c0   : > { %v5759_v25 = vpop.permute.xlu1 %1791 }
 0x2c1   : > { %7031 = vst [vmem:[#allocation25_spill] sm:$0xff] %v5759_v25  ;;  %v5810_v25 = vld [vmem:[%s5312_s27 + $0x8] sm:$0xff] }
 0x2c2   : > { %v1232_v35 = vunpack.c.2.s8 %v5810_v25  ;;  %v1230_v33 = vunpack.c.0.s8 %v5810_v25  ;;  %v1231_v17 = vunpack.c.1.s8 %v5810_v25 }
 0x2c4   : > { %v5804_v54 = vpop.permute.xlu1 %1799  ;;  %v5886_v23 = vcvt.s32.f32 %v1232_v35 }
 0x2c5   : > { %7037 = vst [vmem:[#allocation31_spill] sm:$0xff] %v5804_v54  ;;  %v1229_v54 = vunpack.c.3.s8 %v1222_v20  ;;  %v5835_v20 = vmul.f32 %v4224_v12, %v5659_v38  ;;  %v7041_v38 = vunpack.c.h.bf16 %v5716_v0  ;;  %v5878_v0 = vmul.f32 %v7044_v42, %v5653_v24 }
 0x2c6   : > { %v5898_v42 = vcvt.s32.f32 %v1230_v33  ;;  %v1236_v33 = vunpack.c.2.s8 %v5889_v63  ;;  %vm1860_vm9 = vcmp.gt.f32.partialorder %v5886_v23, 0.0  ;;  %v7075_v23 = vld [vmem:[#allocation28_spill] sm:$0xff] }
 0x2c7   : > { %v5855_v61 = vmul.f32 %v7041_v38, %v5647_v34  ;;  %v5865_v40 = vcvt.s32.f32 %v1229_v54  ;;  %7045 = vst [vmem:[#allocation32_spill] sm:$0xff] %v5878_v0  ;;  %v7046_v54 = vunpack.c.l.bf16 %v5719_v1  ;;  %v7047_v38 = vunpack.c.l.bf16 %v5722_v2 }
 0x2c8   : > { %v5862_v6 = vpop.permute.xlu1 %1803  ;;  %v7048_v1 = vunpack.c.l.bf16 %v5741_v14  ;;  %v7049_v34 = vunpack.c.l.bf16 %v5757_v22  ;;  %vm1858_vm12 = vcmp.gt.f32.partialorder %v5898_v42, 0.0 }
 0x2c9   : > { %v5883_v26 = vmul.f32 %v7046_v54, %v5671_v44  ;;  %v5894_v62 = vmul.f32 %v7047_v38, %v5675_v46  ;;  %v1233_v44 = vunpack.c.3.s8 %v5810_v25  ;;  %v5904_v54 = vpop.permute.xlu0 %1674  ;;  %v5908_v38 = vcvt.s32.f32 %v1231_v17 }
 0x2ca   : > { %v1695_v35 = vmul.f32 %v7048_v1, %v5665_v41  ;;  %v1234_v25 = vunpack.c.0.s8 %v5889_v63  ;;  %v1824_v41 = vmul.f32 %v7049_v34, %v5681_v49  ;;  %vm1857_vm10 = vcmp.gt.f32.partialorder %v5865_v40, 0.0 }
 0x2cb   : > { %v1235_v49 = vunpack.c.1.s8 %v5889_v63  ;;  %vm1859_vm11 = vcmp.gt.f32.partialorder %v5908_v38, 0.0 }
 0x2cd   : > { %v5918_v2 = vpop.permute.xlu1 %1682 }
 0x2ff   : > { %v4543_v24 = vpop.f32.mrb[0].mxu0 }
 0x300   : > { %v1542_v32 = vadd.f32 %v4543_v24, %v1396_v51  ;;  %v1533_v13 = vpop.f32.mrb[1].mxu0  ;;  %v7050_v51 = vunpack.c.h.bf16 %v5741_v14 }
 0x301   : > { %v1534_v58 = vadd.f32 %v1533_v13, %v1394_v57  ;;  %v4544_v28 = vpop.f32.mrb[2].mxu0  ;;  %v7051_v57 = vunpack.c.h.bf16 %v5732_v8  ;;  %v5934_v8 = vcvt.s32.f32 %v1233_v44 }
 0x302   : > { %v1696_v24 = vmul.f32 %v7050_v51, %v5734_v9  ;;  %v1711_v1 = vadd.f32 %v1695_v35, %v1542_v32  ;;  %v1545_v46 = vadd.f32 %v4544_v28, %v1397_v4  ;;  %v1536_v12 = vpop.f32.mrb[3].mxu0  ;;  %v7052_v9 = vunpack.c.h.bf16 %v5729_v7  ;;  %v5945_v28 = vpop.permute.xlu0 %1678 }
 0x303   : > { %v1694_v13 = vmul.f32 %v7051_v57, %v5661_v39  ;;  %v1709_v17 = vadd.f32 %v1693_v10, %v1534_v58  ;;  %v1537_v0 = vadd.f32 %v1536_v12, %v1395_v30  ;;  %v7053_v4 = vunpack.c.l.bf16 %v5747_v16 }
 0x304   : > { %v5929_v32 = vmul.f32 %v7052_v9, %v5657_v37  ;;  %v1840_v35 = vadd.f32 %v1824_v41, %v1711_v1  ;;  %v7054_v39 = vunpack.c.l.bf16 %v5729_v7  ;;  %v7055_v12 = vunpack.c.h.bf16 %v5747_v16 }
 0x305   : > { %v1822_v34 = vmul.f32 %v7053_v4, %v5683_v50  ;;  %v1710_v58 = vadd.f32 %v1694_v13, %v1537_v0  ;;  %v4297_v37 = vunpack.c.h.bf16 %v5792_v27  ;;  %v1712_v51 = vadd.f32 %v1696_v24, %v1545_v46  ;;  %v7061_v4 = vld [vmem:[#allocation19_spill] sm:$0xff] }
 0x306   : > { %v5939_v30 = vmul.f32 %v7054_v39, %v5679_v48  ;;  %v1823_v10 = vmul.f32 %v7055_v12, %v5677_v47  ;;  %v5949_v50 = vsel %vm1856_vm6, %v1840_v35, -1e+30  ;;  %v5952_v7 = vcvt.s32.f32 %v1236_v33 }
 0x307   : > { %v1838_v44 = vadd.f32 %v1822_v34, %v1709_v17  ;;  %1906 = vmax.xlane.f32.xlu0 %v5949_v50  ;;  %v4547_v48 = vpop.f32.mrb[4].mxu0  ;;  %v5956_v47 = vcvt.s32.f32 %v1234_v25  ;;  %v5958_v0 = vcvt.s32.f32 %v1235_v49  ;;  %v1237_v46 = vunpack.c.3.s8 %v5889_v63  ;;  %v5971_v17 = vpop.permute.xlu1 %1686  ;;  %v7059_v63 = vld [vmem:[#allocation27_spill] sm:$0xff] }
 0x308   : > { %v1839_v16 = vadd.f32 %v1823_v10, %v1710_v58  ;;  %v1697_v41 = vmul.f32 %v7056_v55, %v5669_v43  ;;  %v7057_v33 = vunpack.c.l.bf16 %v5754_v21  ;;  %v7058_v1 = vunpack.c.h.bf16 %v5757_v22  ;;  %v1549_v13 = vpop.f32.mrb[5].mxu0  ;;  %v5991_v10 = vld [vmem:[%s5314_s28 + $0xb0] sm:$0xff]   ;;  %v7064_v58 = vld [vmem:[#allocation26_spill] sm:$0xff] }
 0x309   : > { %v1558_v25 = vadd.f32 %v4547_v48, %v5846_v60  ;;  %v7060_v49 = vunpack.c.l.bf16 %v7059_v63  ;;  %v7062_v43 = vunpack.c.h.bf16 %v5754_v21  ;;  %v4548_v35 = vpop.f32.mrb[6].mxu0  ;;  %v7065_v48 = vunpack.c.h.bf16 %v7064_v58 }
 0x30a   : > { %v1699_v24 = vmul.f32 %v7057_v33, %v5673_v45  ;;  %v1825_v57 = vmul.f32 %v7058_v1, %v5687_v52  ;;  %v1550_v45 = vadd.f32 %v1549_v13, %v5835_v20  ;;  %v5982_v39 = vsel %vm1855_vm7, %v1839_v16, -1e+30  ;;  %v1552_v12 = vpop.f32.mrb[7].mxu0  ;;  %v7063_v20 = vld [vmem:[#allocation20_spill] sm:$0xff]  ;;  %v7066_v16 = vld [vmem:[#allocation29_spill] sm:$0xff]  ;;  %v6005_v1 = vpop.permute.xlu0 %1690 }
 0x30b   : > { %v1828_v9 = vmul.f32 %v7060_v49, %v5695_v56  ;;  %v1700_v34 = vmul.f32 %v7062_v43, %v7061_v4  ;;  %v1561_v60 = vadd.f32 %v4548_v35, %v5832_v3  ;;  %1904 = vmax.xlane.f32.xlu1 %v5982_v39  ;;  %v5988_v56 = vsel %vm1854_vm8, %v1838_v44, -1e+30  ;;  %v7072_v49 = vld [vmem:[#allocation24_spill] sm:$0xff]  ;;  %v7073_v4 = vld [vmem:[#allocation30_spill] sm:$0xff] }
 0x30c   : > { %v1715_v52 = vadd.f32 %v1699_v24, %v1558_v25  ;;  %v1841_v21 = vadd.f32 %v1825_v57, %v1712_v51  ;;  %v1827_v53 = vmul.f32 %v7065_v48, %v7063_v20  ;;  %v7067_v55 = vunpack.c.h.bf16 %v5744_v15  ;;  %1902 = vmax.xlane.f32.xlu0 %v5988_v56  ;;  %v6008_v25 = vld [vmem:[%s5314_s28 + $0xb8] sm:$0xff]  }
 0x30d   : > { %v1713_v3 = vadd.f32 %v1697_v41, %v1550_v45  ;;  %v1553_v24 = vadd.f32 %v1552_v12, %v5828_v18  ;;  %vm1861_vm13 = vcmp.gt.f32.partialorder %v5934_v8, 0.0  ;;  %v7069_v51 = vunpack.c.l.bf16 %v7064_v58  ;;  %v7070_v41 = vld [vmem:[#allocation22_spill] sm:$0xff] }
 0x30e   : > { %v1698_v33 = vmul.f32 %v7067_v55, %v7066_v16  ;;  %v1844_v57 = vadd.f32 %v1828_v9, %v1715_v52  ;;  %vm1864_vm14 = vcmp.gt.f32.partialorder %v5952_v7, 0.0  ;;  %v6011_v15 = vcvt.s32.f32 %v1237_v46  ;;  %v6021_v20 = vld [vmem:[%s5312_s27 + $0x18] sm:$0xff] }
 0x30f   : > { %v1826_v44 = vmul.f32 %v7069_v51, %v7068_v36  ;;  %v7071_v18 = vunpack.c.h.bf16 %v7059_v63  ;;  %v7074_v43 = vunpack.c.l.bf16 %v7073_v4  ;;  %v4304_v12 = vunpack.c.l.bf16 %v5991_v10  ;;  %v1808_v63 = vpop.permute.xlu1 %1807  ;;  %v4551_v48 = vpop.f32.mrb[8].mxu0  ;;  %v7079_v51 = vld [vmem:[#allocation23_spill] sm:$0xff] }
 0x310   : > { %v1714_v35 = vadd.f32 %v1698_v33, %v1553_v24  ;;  %v1716_v9 = vadd.f32 %v1700_v34, %v1561_v60  ;;  %v6025_v52 = vsel %vm1860_vm9, %v1844_v57, -1e+30  ;;  %v6029_v46 = vsel %vm1857_vm10, %v1841_v21, -1e+30  ;;  %v7077_v60 = vld [vmem:[#allocation31_spill] sm:$0xff]  ;;  %v1565_v24 = vpop.f32.mrb[9].mxu0  ;;  %v1796_v36 = vpop.permute.xlu0 %1795 }
 0x311   : > { %v1829_v13 = vmul.f32 %v7071_v18, %v7070_v41  ;;  %v1703_v45 = vmul.f32 %v7074_v43, %v7072_v49  ;;  %v1842_v58 = vadd.f32 %v1826_v44, %v1713_v3  ;;  %1914 = vmax.xlane.f32.xlu1 %v6025_v52  ;;  %1908 = vmax.xlane.f32.xlu0 %v6029_v46  ;;  %v4308_v55 = vunpack.c.l.bf16 %v6008_v25  ;;  %v7081_v41 = vld [vmem:[#allocation25_spill] sm:$0xff]  ;;  %v4552_v43 = vpop.f32.mrb[10].mxu0 }
 0x312   : > { %v1843_v16 = vadd.f32 %v1827_v53, %v1714_v35  ;;  %vm1862_vm15 = vcmp.gt.f32.partialorder %v5956_v47, 0.0  ;;  %vm1863_vm0 = vcmp.gt.f32.partialorder %v5958_v0, 0.0  ;;  %v7076_v34 = vunpack.c.l.bf16 %v7075_v23 }
 0x313   : > { %v7078_v21 = vunpack.c.l.bf16 %v5840_v31  ;;  %v1574_v3 = vadd.f32 %v4551_v48, %v5883_v26  ;;  %v1240_v53 = vunpack.c.2.s8 %v6021_v20  ;;  %v7080_v44 = vunpack.c.h.bf16 %v7075_v23 }
 0x314   : > { %v1701_v40 = vmul.f32 %v7076_v34, %v5837_v29  ;;  %v7082_v18 = vunpack.c.l.bf16 %v5792_v27  ;;  %v1566_v29 = vadd.f32 %v1565_v24, %v5860_v5  ;;  %v6053_v35 = vsel %vm1859_vm11, %v1843_v16, -1e+30  ;;  %v1568_v34 = vpop.f32.mrb[11].mxu0 }
 0x315   : > { %v1832_v33 = vmul.f32 %v7078_v21, %v7077_v60  ;;  %v1702_v57 = vmul.f32 %v7080_v44, %v7079_v51  ;;  %v1719_v26 = vadd.f32 %v1703_v45, %v1574_v3  ;;  %v1577_v48 = vadd.f32 %v4552_v43, %v5870_v11  ;;  %1912 = vmax.xlane.f32.xlu0 %v6053_v35  ;;  %v1816_v45 = vpop.permute.xlu1 %1815 }
 0x316   : > { %v1830_v49 = vmul.f32 %v7082_v18, %v7081_v41  ;;  %v6058_v60 = vsel %vm1858_vm12, %v1842_v58, -1e+30  ;;  %v1845_v23 = vadd.f32 %v1829_v13, %v1716_v9  ;;  %v1717_v21 = vadd.f32 %v1701_v40, %v1566_v29  ;;  %v1812_v18 = vpop.permute.xlu0 %1811 }
 0x317   : > { %v1569_v51 = vadd.f32 %v1568_v34, %v5855_v61  ;;  %1910 = vmax.xlane.f32.xlu1 %v6058_v60  ;;  %v1831_v5 = vmul.f32 %v4297_v37, %v1796_v36  ;;  %vm1865_vm1 = vcmp.gt.f32.partialorder %v6011_v15, 0.0  ;;  %v1238_v11 = vunpack.c.0.s8 %v6021_v20 }
 0x318   : > { %v7083_v42 = vunpack.c.h.bf16 %v7073_v4  ;;  %v1848_v13 = vadd.f32 %v1832_v33, %v1719_v26  ;;  %v4309_v9 = vunpack.c.h.bf16 %v6008_v25  ;;  %v1239_v61 = vunpack.c.1.s8 %v6021_v20  ;;  %v4555_v33 = vpop.f32.mrb[12].mxu0 }
 0x319   : > { %v7084_v58 = vunpack.c.h.bf16 %v5840_v31  ;;  %v7085_v27 = vunpack.c.l.bf16 %v5815_v59  ;;  %v1718_v40 = vadd.f32 %v1702_v57, %v1569_v51  ;;  %v4305_v3 = vunpack.c.h.bf16 %v5991_v10  ;;  %v1581_v41 = vpop.f32.mrb[13].mxu0  ;;  %v1820_v34 = vpop.permute.xlu1 %1819  ;;  %v7088_v10 = vld [vmem:[#allocation32_spill] sm:$0xff] }
 0x31a   : > { %v1704_v38 = vmul.f32 %v7083_v42, %v5904_v54  ;;  %v6081_v54 = vsel %vm1864_vm14, %v1848_v13, -1e+30  ;;  %v6085_v25 = vsel %vm1861_vm13, %v1845_v23, -1e+30  ;;  %v1846_v4 = vadd.f32 %v1830_v49, %v1717_v21 }
 0x31b   : > { %v1833_v16 = vmul.f32 %v7084_v58, %v5862_v6  ;;  %v1707_v37 = vmul.f32 %v7085_v27, %v5971_v17  ;;  %1922 = vmax.xlane.f32.xlu1 %v6081_v54  ;;  %1916 = vmax.xlane.f32.xlu0 %v6085_v25  ;;  %v1847_v31 = vadd.f32 %v1831_v5, %v1718_v40  ;;  %v1256_v6 = vcvt.s32.f32 %v1240_v53  ;;  %v6134_v58 = vld [vmem:[#allocation2 + $0x10] sm:$0xff]  ;;  %v6141_v40 = vld [vmem:[#allocation2] sm:$0xff] }
 0x31c   : > { %v1720_v24 = vadd.f32 %v1704_v38, %v1577_v48  ;;  %v1254_v17 = vcvt.s32.f32 %v1238_v11  ;;  %v1241_v36 = vunpack.c.3.s8 %v6021_v20  ;;  %v7086_v7 = vunpack.c.l.bf16 %v5799_v19  ;;  %v4556_v20 = vpop.f32.mrb[14].mxu0 }
 0x31d   : > { %v1836_v57 = vmul.f32 %v4308_v55, %v1816_v45  ;;  %v1590_v8 = vadd.f32 %v4555_v33, %v5939_v30  ;;  %v1255_v49 = vcvt.s32.f32 %v1239_v61  ;;  %v7087_v29 = vunpack.c.h.bf16 %v5799_v19  ;;  %v1584_v55 = vpop.f32.mrb[15].mxu0  ;;  %v4774_v61 = vld [vmem:[%s5310_s24 + $0x8] sm:$0xff]  }
 0x31e   : > { %v1705_v44 = vmul.f32 %v7086_v7, %v5945_v28  ;;  %v1834_v53 = vmul.f32 %v4304_v12, %v1808_v63  ;;  %v1582_v26 = vadd.f32 %v1581_v41, %v5894_v62  ;;  %v6102_v48 = vsel %vm1863_vm0, %v1847_v31, -1e+30  ;;  %v6150_v31 = vld [vmem:[#allocation2 + $0x30] sm:$0xff]  ;;  %v6164_v41 = vld [vmem:[#allocation2 + $0x28] sm:$0xff] }
 0x31f   : > { %v1706_v43 = vmul.f32 %v7087_v29, %v5918_v2  ;;  %v1723_v28 = vadd.f32 %v1707_v37, %v1590_v8  ;;  %v1593_v30 = vadd.f32 %v4556_v20, %v5929_v32  ;;  %v6107_v23 = vsel %vm1862_vm15, %v1846_v4, -1e+30  ;;  %1920 = vmax.xlane.f32.xlu0 %v6102_v48  ;;  %v6139_v37 = vld [vmem:[#allocation2 + $0x8] sm:$0xff]  ;;  %v1890_v8 = vld [vmem:[#allocation2 + $0x20] sm:$0xff]  ;;  %v6177_v20 = vld [vmem:[#allocation2 + $0x38] sm:$0xff] }
 0x320   : > { %v1849_v19 = vadd.f32 %v1833_v16, %v1720_v24  ;;  %v1721_v2 = vadd.f32 %v1705_v44, %v1582_v26  ;;  %v1585_v12 = vadd.f32 %v1584_v55, %v7088_v10  ;;  %1918 = vmax.xlane.f32.xlu1 %v6107_v23  ;;  %v1835_v62 = vmul.f32 %v4305_v3, %v1812_v18  ;;  %v4776_v18 = vld [vmem:[%s5310_s24 + $0x18] sm:$0xff]   ;;  %v6175_v26 = vld [vmem:[#allocation2 + $0x50] sm:$0xff]  ;;  %v6190_v10 = vld [vmem:[#allocation2 + $0x48] sm:$0xff] }
 0x321   : > { %vm1868_vm2 = vcmp.gt.f32.partialorder %v1256_v6, 0.0  ;;  %v7089_v0 = vunpack.c.h.bf16 %v5815_v59  ;;  %v1852_v63 = vadd.f32 %v1836_v57, %v1723_v28  ;;  %v1837_v51 = vmul.f32 %v4309_v9, %v1820_v34  ;;  %v4773_v9 = vld [vmem:[%s5310_s24] sm:$0xff]   ;;  %v6152_v6 = vld [vmem:[#allocation2 + $0x18] sm:$0xff] }
 0x322   : > { %v1722_v21 = vadd.f32 %v1706_v43, %v1585_v12  ;;  %vm1867_vm3 = vcmp.gt.f32.partialorder %v1255_v49, 0.0  ;;  %v6119_v11 = vsel %vm1865_vm1, %v1849_v19, -1e+30  ;;  %v1850_v42 = vadd.f32 %v1834_v53, %v1721_v2  ;;  %4557 = vmatprep.subr.bf16.mxu1 %v4773_v9  ;;  %v4777_v28 = vld [vmem:[%s5310_s24 + $0x20] sm:$0xff]   ;;  %v4778_v12 = vld [vmem:[%s5310_s24 + $0x28] sm:$0xff]  }
 0x323   : > { %v1708_v32 = vmul.f32 %v7089_v0, %v6005_v1  ;;  %v6115_v5 = vsel %vm1868_vm2, %v1852_v63, -1e+30  ;;  %1924 = vmax.xlane.f32.xlu0 %v6119_v11  ;;  %vm1866_vm4 = vcmp.gt.f32.partialorder %v1254_v17, 0.0  ;;  %v1257_v1 = vcvt.s32.f32 %v1241_v36  ;;  %4558 = vmatpush3.bf16.msra.mxu1 %v4773_v9  ;;  %v4775_v17 = vld [vmem:[%s5310_s24 + $0x10] sm:$0xff]   ;;  %v6188_v2 = vld [vmem:[#allocation2 + $0x40] sm:$0xff] }
 0x324   : > { %1930 = vmax.xlane.f32.xlu1 %v6115_v5  ;;  %v1851_v59 = vadd.f32 %v1835_v62, %v1722_v21  ;;  %v6125_v45 = vsel %vm1866_vm4, %v1850_v42, -1e+30  ;;  %4559 = vmatprep.subr.bf16.mxu1 %v4774_v61  ;;  %vm2206_vm6 = vcmask 7168   ;;  %v4779_v42 = vld [vmem:[%s5310_s24 + $0x30] sm:$0xff]   ;;  %vm2776_vm7 = vcmask 15360  }
 0x325   : > { %v1724_v47 = vadd.f32 %v1708_v32, %v1593_v30  ;;  %vm1869_vm5 = vcmp.gt.f32.partialorder %v1257_v1, 0.0  ;;  %vm2841_vm8 = vcmask 23552  }
 0x326   : > { %v6123_v38 = vsel %vm1867_vm3, %v1851_v59, -1e+30 }
 0x327   : > { %v1853_v13 = vadd.f32 %v1837_v51, %v1724_v47  ;;  %1928 = vmax.xlane.f32.xlu0 %v6123_v38  ;;  %4560 = vmatpush3.bf16.msra.mxu1 %v4774_v61  ;;  %v1900_v51 = vld [vmem:[#allocation2 + $0x70] sm:$0xff]  ;;  %v6202_v47 = vld [vmem:[#allocation2 + $0x58] sm:$0xff] }
 0x328   : > { %1926 = vmax.xlane.f32.xlu1 %v6125_v45  ;;  %4561 = vmatprep.subr.bf16.mxu1 %v4775_v17 }
 0x329   : > { %v6129_v15 = vsel %vm1869_vm5, %v1853_v13, -1e+30 }
 0x32b   : > { %1932 = vmax.xlane.f32.xlu0 %v6129_v15  ;;  %4562 = vmatpush3.bf16.msra.mxu1 %v4775_v17 }
 0x32c   : > { %4563 = vmatprep.subr.bf16.mxu1 %v4776_v18 }
 0x32f   : > { %4564 = vmatpush3.bf16.msra.mxu1 %v4776_v18 }
 0x330   : > { %4565 = vmatprep.subr.bf16.mxu1 %v4777_v28 }
 0x333   : > { %4566 = vmatpush3.bf16.msra.mxu1 %v4777_v28 }
 0x334   : > { %4567 = vmatprep.subr.bf16.mxu1 %v4778_v12 }
 0x337   : > { %4568 = vmatpush3.bf16.msra.mxu1 %v4778_v12 }
 0x338   : > { %4569 = vmatprep.subr.bf16.mxu1 %v4779_v42 }
 0x33b   : > { %4570 = vmatpush3.bf16.msra.mxu1 %v4779_v42 }
 0x394   : > { %v1907_v16 = vpop.xlane.xlu0 %1906 }
 0x395   : > { %v6137_v27 = vmax.f32 %v6134_v58, %v1907_v16 }
 0x397   : > { %2860 = vst.msk [vmem:[#allocation2 + $0x10] sm:$0xff] %vm2206_vm6, %v6137_v27 }
 0x398   : > { %v1905_v3 = vpop.xlane.xlu1 %1904 }
 0x399   : > { %v1935_v24 = vmax.f32 %v6139_v37, %v1905_v3  ;;  %v1903_v4 = vpop.xlane.xlu0 %1902  ;;  %v6211_v3 = vld [vmem:[#allocation2 + $0x68] sm:$0xff] }
 0x39a   : > { %v6147_v33 = vmax.f32 %v6141_v40, %v1903_v4 }
 0x39b   : > { %2859 = vst.msk [vmem:[#allocation2 + $0x8] sm:$0xff] %vm2206_vm6, %v1935_v24  ;;  %2005 = vperm.xlu0 %4764, %v1935_v24   ;;  %v1951_v62 = vsub.f32 %v6139_v37, %v1935_v24  ;;  %v1898_v37 = vld [vmem:[#allocation2 + $0x60] sm:$0xff]  ;;  %v4780_v24 = vld [vmem:[%s5310_s24 + $0x38] sm:$0xff]  }
 0x39c   : > { %2858 = vst.msk [vmem:[#allocation2] sm:$0xff] %vm2206_vm6, %v6147_v33  ;;  %2000 = vperm.xlu1 %4763, %v6147_v33   ;;  %4571 = vmatprep.subr.bf16.mxu1 %v4780_v24  ;;  %v1950_v28 = vsub.f32 %v6141_v40, %v6147_v33 }
 0x39d   : > { %v1968_v59 = vmul.f32 1.442695, %v1951_v62  ;;  %4572 = vmatpush3.bf16.msra.mxu1 %v4780_v24 }
 0x39e   : > { %v1915_v36 = vpop.xlane.xlu1 %1914  ;;  %v1909_v7 = vpop.xlane.xlu0 %1908 }
 0x39f   : > { %v6159_v44 = vmax.f32 %v6150_v31, %v1915_v36  ;;  %v6162_v57 = vmax.f32 %v6152_v6, %v1909_v7  ;;  %4781 = vpow2.f32 %v1968_v59 }
 0x3a0   : > { %2010 = vperm.xlu1 %4763, %v6137_v27  }
 0x3a1   : > { %2864 = vst.msk [vmem:[#allocation2 + $0x30] sm:$0xff] %vm2206_vm6, %v6159_v44  ;;  %2861 = vst.msk [vmem:[#allocation2 + $0x18] sm:$0xff] %vm2206_vm6, %v6162_v57  ;;  %v1956_v4 = vsub.f32 %v6150_v31, %v6159_v44 }
 0x3a2   : > { %v1913_v29 = vpop.xlane.xlu0 %1912 }
 0x3a3   : > { %v6173_v53 = vmax.f32 %v6164_v41, %v1913_v29  ;;  %v1978_v31 = vmul.f32 1.442695, %v1956_v4 }
 0x3a4   : > { %v1911_v49 = vpop.xlane.xlu1 %1910  ;;  %2015 = vperm.xlu1 %4763, %v6162_v57  }
 0x3a5   : > { %v1938_v43 = vmax.f32 %v1890_v8, %v1911_v49  ;;  %2863 = vst.msk [vmem:[#allocation2 + $0x28] sm:$0xff] %vm2206_vm6, %v6173_v53  ;;  %v6223_v49 = vld [vmem:[#allocation2 + $0x78] sm:$0xff] }
 0x3a7   : > { %2862 = vst.msk [vmem:[#allocation2 + $0x20] sm:$0xff] %vm2206_vm6, %v1938_v43  ;;  %v1954_v1 = vsub.f32 %v1890_v8, %v1938_v43 }
 0x3a8   : > { %v1923_v30 = vpop.xlane.xlu1 %1922  ;;  %v1917_v55 = vpop.xlane.xlu0 %1916  ;;  %2030 = vperm.xlu1 %4763, %v6159_v44  }
 0x3a9   : > { %v1944_v34 = vmax.f32 %v6175_v26, %v1923_v30  ;;  %v6186_v19 = vmax.f32 %v6177_v20, %v1917_v55  ;;  %v1974_v17 = vmul.f32 1.442695, %v1954_v1  ;;  %v6238_v12 = vpop.eup %4781 }
 0x3ab   : > { %2868 = vst.msk [vmem:[#allocation2 + $0x50] sm:$0xff] %vm2206_vm6, %v1944_v34  ;;  %2865 = vst.msk [vmem:[#allocation2 + $0x38] sm:$0xff] %vm2206_vm6, %v6186_v19  ;;  %2050 = vperm.xlu0 %4764, %v1944_v34   ;;  %4783 = vpow2.f32 %v1974_v17  ;;  %v1960_v44 = vsub.f32 %v6175_v26, %v1944_v34  ;;  %v1952_v26 = vsub.f32 %v6134_v58, %v6137_v27  ;;  %v1966_v34 = vmul.f32 1.442695, %v1950_v28 }
 0x3ac   : > { %v1921_v32 = vpop.xlane.xlu0 %1920  ;;  %2020 = vperm.xlu1 %4763, %v1938_v43   ;;  %4785 = vpow2.f32 %v1978_v31  ;;  %v1957_v59 = vsub.f32 %v6177_v20, %v6186_v19 }
 0x3ad   : > { %v1919_v0 = vpop.xlane.xlu1 %1918  ;;  %v6200_v21 = vmax.f32 %v6190_v10, %v1921_v32  ;;  %v1986_v30 = vmul.f32 1.442695, %v1960_v44 }
 0x3ae   : > { %v1942_v63 = vmax.f32 %v6188_v2, %v1919_v0  ;;  %v1970_v0 = vmul.f32 1.442695, %v1952_v26 }
 0x3af   : > { %2867 = vst.msk [vmem:[#allocation2 + $0x48] sm:$0xff] %vm2206_vm6, %v6200_v21  ;;  %4787 = vpow2.f32 %v1986_v30  ;;  %v1959_v20 = vsub.f32 %v6190_v10, %v6200_v21 }
 0x3b0   : > { %2866 = vst.msk [vmem:[#allocation2 + $0x40] sm:$0xff] %vm2206_vm6, %v1942_v63  ;;  %v1925_v9 = vpop.xlane.xlu0 %1924  ;;  %2035 = vperm.xlu1 %4763, %v6186_v19   ;;  %v1958_v55 = vsub.f32 %v6188_v2, %v1942_v63  ;;  %4789 = vpow2.f32 %v1966_v34  ;;  %v1953_v2 = vsub.f32 %v6152_v6, %v6162_v57 }
 0x3b1   : > { %v1931_v13 = vpop.xlane.xlu1 %1930  ;;  %v6209_v16 = vmax.f32 %v6202_v47, %v1925_v9 }
 0x3b2   : > { %v1948_v61 = vmax.f32 %v1900_v51, %v1931_v13  ;;  %v1982_v40 = vmul.f32 1.442695, %v1958_v55 }
 0x3b3   : > { %2869 = vst.msk [vmem:[#allocation2 + $0x58] sm:$0xff] %vm2206_vm6, %v6209_v16 }
 0x3b4   : > { %2872 = vst.msk [vmem:[#allocation2 + $0x70] sm:$0xff] %vm2206_vm6, %v1948_v61  ;;  %v1929_v7 = vpop.xlane.xlu0 %1928  ;;  %2025 = vperm.xlu1 %4763, %v6173_v53   ;;  %v1964_v33 = vsub.f32 %v1900_v51, %v1948_v61  ;;  %4791 = vpow2.f32 %v1982_v40  ;;  %v1955_v51 = vsub.f32 %v6164_v41, %v6173_v53  ;;  %v1980_v41 = vmul.f32 1.442695, %v1957_v59 }
 0x3b5   : > { %v1927_v36 = vpop.xlane.xlu1 %1926  ;;  %v6221_v18 = vmax.f32 %v6211_v3, %v1929_v7  ;;  %v6244_v62 = vpop.eup %4783  ;;  %4793 = vpow2.f32 %v1970_v0  ;;  %v1961_v53 = vsub.f32 %v6202_v47, %v6209_v16  ;;  %v1984_v47 = vmul.f32 1.442695, %v1959_v20 }
 0x3b6   : > { %v1946_v8 = vmax.f32 %v1898_v37, %v1927_v36  ;;  %v1994_v58 = vmul.f32 1.442695, %v1964_v33  ;;  %v6250_v32 = vpop.eup %4785  ;;  %v1976_v42 = vmul.f32 1.442695, %v1955_v51  ;;  %v7090_v51 = vunpack.c.l.bf16 %v5741_v14 }
 0x3b7   : > { %2871 = vst.msk [vmem:[#allocation2 + $0x68] sm:$0xff] %vm2206_vm6, %v6221_v18  ;;  %v1988_v19 = vmul.f32 1.442695, %v1961_v53  ;;  %v1963_v10 = vsub.f32 %v6211_v3, %v6221_v18  ;;  %v4429_v53 = vld [vmem:[%s5314_s28 + $0x8] sm:$0xff]  }
 0x3b8   : > { %2870 = vst.msk [vmem:[#allocation2 + $0x60] sm:$0xff] %vm2206_vm6, %v1946_v8  ;;  %2060 = vperm.xlu0 %4764, %v1946_v8   ;;  %v1933_v29 = vpop.xlane.xlu0 %1932  ;;  %2040 = vperm.xlu1 %4763, %v1942_v63   ;;  %v1962_v27 = vsub.f32 %v1898_v37, %v1946_v8  ;;  %v1972_v63 = vmul.f32 1.442695, %v1953_v2  ;;  %4795 = vpow2.f32 %v1994_v58 }
 0x3b9   : > { %v6231_v43 = vmax.f32 %v6223_v49, %v1933_v29  ;;  %v6256_v57 = vpop.eup %4787  ;;  %v1992_v36 = vmul.f32 1.442695, %v1963_v10  ;;  %v4316_v10 = vunpack.c.l.bf16 %v4429_v53 }
 0x3ba   : > { %v1990_v6 = vmul.f32 1.442695, %v1962_v27  ;;  %4797 = vpow2.f32 %v1972_v63  ;;  %v6262_v1 = vpop.eup %4789 }
 0x3bb   : > { %2873 = vst.msk [vmem:[#allocation2 + $0x78] sm:$0xff] %vm2206_vm6, %v6231_v43 }
 0x3bc   : > { %2070 = vperm.xlu0 %4764, %v1948_v61   ;;  %2045 = vperm.xlu1 %4763, %v6200_v21   ;;  %4799 = vpow2.f32 %v1990_v6 }
 0x3bd   : > { %4801 = vpow2.f32 %v1976_v42 }
 0x3be   : > { %v6264_v13 = vpop.eup %4791  ;;  %4803 = vpow2.f32 %v1980_v41 }
 0x3bf   : > { %v6270_v9 = vpop.eup %4793  ;;  %4805 = vpow2.f32 %v1988_v19 }
 0x3c0   : > { %2246 = vperm.xlu0 %4764, %v6238_v12   ;;  %2055 = vperm.xlu1 %4763, %v6209_v16   ;;  %v1965_v16 = vsub.f32 %v6223_v49, %v6231_v43  ;;  %4807 = vpow2.f32 %v1984_v47 }
 0x3c2   : > { %v6272_v61 = vpop.eup %4795  ;;  %v1996_v21 = vmul.f32 1.442695, %v1965_v16 }
 0x3c4   : > { %2261 = vperm.xlu0 %4764, %v6244_v62   ;;  %2065 = vperm.xlu1 %4763, %v6221_v18   ;;  %v6278_v37 = vpop.eup %4797  ;;  %4809 = vpow2.f32 %v1996_v21 }
 0x3c5   : > { %4811 = vpow2.f32 %v1992_v36 }
 0x3c6   : > { %v6280_v24 = vpop.eup %4799 }
 0x3c7   : > { %v6286_v4 = vpop.eup %4801 }
 0x3c8   : > { %2271 = vperm.xlu0 %4764, %v6250_v32   ;;  %2075 = vperm.xlu1 %4763, %v6231_v43   ;;  %v6291_v17 = vpop.eup %4803 }
 0x3c9   : > { %v6294_v7 = vpop.eup %4805 }
 0x3ca   : > { %v6297_v8 = vpop.eup %4807 }
 0x3cc   : > { %2291 = vperm.xlu0 %4764, %v6256_v57   ;;  %2241 = vperm.xlu1 %4763, %v6262_v1  }
 0x3ce   : > { %v6300_v49 = vpop.eup %4809 }
 0x3cf   : > { %v6303_v3 = vpop.eup %4811 }
 0x3d0   : > { %2281 = vperm.xlu0 %4764, %v6264_v13   ;;  %2251 = vperm.xlu1 %4763, %v6270_v9  }
 0x3d4   : > { %2311 = vperm.xlu0 %4764, %v6272_v61   ;;  %2256 = vperm.xlu1 %4763, %v6278_v37  }
 0x3d8   : > { %2301 = vperm.xlu0 %4764, %v6280_v24   ;;  %2266 = vperm.xlu1 %4763, %v6286_v4  }
 0x3dc   : > { %2276 = vperm.xlu1 %4763, %v6291_v17  }
 0x3e0   : > { %2296 = vperm.xlu1 %4763, %v6294_v7  }
 0x3e4   : > { %2286 = vperm.xlu1 %4763, %v6297_v8  }
 0x3e8   : > { %2316 = vperm.xlu1 %4763, %v6300_v49  }
 0x3ec   : > { %2306 = vperm.xlu1 %4763, %v6303_v3  }
 0x41a   : > { %v2006_v18 = vpop.permute.xlu0 %2005 }
 0x41b   : > { %v2079_v31 = vsub.f32 %v5982_v39, %v2006_v18  ;;  %v2001_v44 = vpop.permute.xlu1 %2000  ;;  %v4311_v18 = vld [vmem:[%s5314_s28] sm:$0xff]  }
 0x41c   : > { %v2078_v29 = vsub.f32 %v5988_v56, %v2001_v44  ;;  %v6333_v44 = vld [vmem:[%s5314_s28 + $0x80] sm:$0xff]  }
 0x41d   : > { %v2096_v43 = vmul.f32 1.442695, %v2079_v31 }
 0x41e   : > { %v2094_v28 = vmul.f32 1.442695, %v2078_v29 }
 0x41f   : > { %4813 = vpow2.f32 %v2096_v43  ;;  %v2011_v30 = vpop.permute.xlu1 %2010  ;;  %v4312_v43 = vunpack.c.l.bf16 %v4311_v18 }
 0x420   : > { %4815 = vpow2.f32 %v2094_v28  ;;  %v2080_v55 = vsub.f32 %v5949_v50, %v2011_v30 }
 0x422   : > { %v2098_v26 = vmul.f32 1.442695, %v2080_v55 }
 0x423   : > { %v2016_v34 = vpop.permute.xlu1 %2015 }
 0x424   : > { %4817 = vpow2.f32 %v2098_v26  ;;  %v2081_v40 = vsub.f32 %v6029_v46, %v2016_v34 }
 0x426   : > { %v2100_v33 = vmul.f32 1.442695, %v2081_v40  ;;  %v4376_v40 = vunpack.c.l.bf16 %v6333_v44 }
 0x427   : > { %v2031_v0 = vpop.permute.xlu1 %2030 }
 0x428   : > { %4819 = vpow2.f32 %v2100_v33  ;;  %v2084_v42 = vsub.f32 %v6025_v52, %v2031_v0  ;;  %v4317_v0 = vunpack.c.h.bf16 %v4429_v53 }
 0x429   : > { %v6310_v39 = vpop.eup %4813 }
 0x42a   : > { %v4816_v2 = vpop.eup %4815  ;;  %v2106_v52 = vmul.f32 1.442695, %v2084_v42  ;;  %v2051_v21 = vpop.permute.xlu0 %2050 }
 0x42b   : > { %v2021_v56 = vpop.permute.xlu1 %2020  ;;  %v2335_v58 = vpack.c.bf16 %v6310_v39, %v4816_v2  ;;  %v2088_v30 = vsub.f32 %v6081_v54, %v2051_v21  ;;  %v4846_v21 = vld [vmem:[%s5314_s28 + $0x88] sm:$0xff]  }
 0x42c   : > { %v2082_v63 = vsub.f32 %v6058_v60, %v2021_v56  ;;  %v7091_v60 = vunpack.c.l.bf16 %v5757_v22 }
 0x42d   : > { %4573 = vmatprep.mubr.bf16.mxu1 %v2335_v58  ;;  %v4313_v58 = vunpack.c.h.bf16 %v4311_v18 }
 0x42e   : > { %v4818_v27 = vpop.eup %4817  ;;  %v2102_v41 = vmul.f32 1.442695, %v2082_v63  ;;  %v2114_v63 = vmul.f32 1.442695, %v2088_v30 }
 0x42f   : > { %2162 = vadd.xlane.f32.xlu0 %v4818_v27  ;;  %v2036_v50 = vpop.permute.xlu1 %2035  ;;  %v2634_v46 = vmul.f32 %v4818_v27, %v7090_v51  ;;  %v2714_v47 = vmul.f32 %v4818_v27, %v7091_v60  ;;  %v2554_v29 = vmul.f32 %v4818_v27, %v4316_v10 }
 0x430   : > { %v2085_v6 = vsub.f32 %v6085_v25, %v2036_v50  ;;  %v6326_v25 = vld [vmem:[%s5314_s28 + $0x40] sm:$0xff]   ;;  %4821 = vpow2.f32 %v2102_v41  ;;  %v2712_v50 = vmul.f32 %v4816_v2, %v4376_v40  ;;  %v4845_v41 = vld [vmem:[%s5314_s28 + $0x48] sm:$0xff]  }
 0x431   : > { %2652 = vadd.xlane.f32.xlu1 %v2634_v46  ;;  %v4344_v31 = vunpack.c.l.bf16 %v6326_v25  ;;  %v4349_v53 = vunpack.c.h.bf16 %v4845_v41 }
 0x432   : > { %v6318_v59 = vpop.eup %4819  ;;  %v2108_v20 = vmul.f32 1.442695, %v2085_v6 }
 0x433   : > { %2158 = vadd.xlane.f32.xlu0 %v4816_v2  ;;  %v2026_v19 = vpop.permute.xlu1 %2025  ;;  %v2336_v16 = vpack.c.bf16 %v6318_v59, %v4818_v27  ;;  %v2632_v34 = vmul.f32 %v4816_v2, %v4344_v31  ;;  %v2555_v42 = vmul.f32 %v6318_v59, %v4317_v0  ;;  %v2635_v10 = vmul.f32 %v6318_v59, %v4349_v53 }
 0x434   : > { %v2083_v14 = vsub.f32 %v6053_v35, %v2026_v19  ;;  %4823 = vpow2.f32 %v2108_v20  ;;  %v2553_v19 = vmul.f32 %v6310_v39, %v4313_v58 }
 0x435   : > { %2732 = vadd.xlane.f32.xlu1 %v2714_v47  ;;  %4574 = vmatmul.mubr.bf16.vlgmr.msra.gmra.mrb[0].mxu1 %v2336_v16 }
 0x436   : > { %v2104_v36 = vmul.f32 1.442695, %v2083_v14 }
 0x437   : > { %2164 = vadd.xlane.f32.xlu0 %v6318_v59  ;;  %v2041_v22 = vpop.permute.xlu1 %2040  ;;  %v2061_v28 = vpop.permute.xlu0 %2060 }
 0x438   : > { %4825 = vpow2.f32 %v2104_v36  ;;  %v2086_v35 = vsub.f32 %v6107_v23, %v2041_v22  ;;  %v2552_v23 = vmul.f32 %v4816_v2, %v4312_v43  ;;  %v2090_v27 = vsub.f32 %v6125_v45, %v2061_v28 }
 0x439   : > { %4827 = vpow2.f32 %v2106_v52  ;;  %2160 = vadd.xlane.f32.xlu1 %v6310_v39  ;;  %v4381_v36 = vunpack.c.h.bf16 %v4846_v21  ;;  %v4345_v43 = vunpack.c.h.bf16 %v6326_v25  ;;  %v4377_v25 = vunpack.c.h.bf16 %v6333_v44 }
 0x43a   : > { %v2110_v55 = vmul.f32 1.442695, %v2086_v35  ;;  %v6340_v51 = vpop.eup %4821  ;;  %v2118_v60 = vmul.f32 1.442695, %v2090_v27  ;;  %v4431_v35 = vld [vmem:[%s5314_s28 + $0x18] sm:$0xff]  }
 0x43b   : > { %2572 = vadd.xlane.f32.xlu0 %v2554_v29  ;;  %v2046_v26 = vpop.permute.xlu1 %2045  ;;  %v2071_v46 = vpop.permute.xlu0 %2070  ;;  %v2715_v29 = vmul.f32 %v6318_v59, %v4381_v36  ;;  %v2633_v59 = vmul.f32 %v6310_v39, %v4345_v43  ;;  %v4441_v43 = vld [vmem:[%s5314_s28 + $0x68] sm:$0xff]  }
 0x43c   : > { %v2087_v33 = vsub.f32 %v6102_v48, %v2046_v26  ;;  %4829 = vpow2.f32 %v2110_v55  ;;  %v2092_v47 = vsub.f32 %v6115_v5, %v2071_v46  ;;  %v4324_v26 = vunpack.c.l.bf16 %v4431_v35  ;;  %v4430_v46 = vld [vmem:[%s5314_s28 + $0x10] sm:$0xff]  }
 0x43d   : > { %2648 = vadd.xlane.f32.xlu1 %v2632_v34  ;;  %v4320_v53 = vunpack.c.l.bf16 %v4430_v46 }
 0x43e   : > { %v2112_v56 = vmul.f32 1.442695, %v2087_v33  ;;  %v6343_v48 = vpop.eup %4823  ;;  %v2122_v5 = vmul.f32 1.442695, %v2092_v47 }
 0x43f   : > { %2568 = vadd.xlane.f32.xlu0 %v2552_v23  ;;  %v2056_v54 = vpop.permute.xlu1 %2055 }
 0x440   : > { %4831 = vpow2.f32 %v2112_v56  ;;  %v2089_v6 = vsub.f32 %v6119_v11, %v2056_v54  ;;  %v4447_v56 = vld [vmem:[%s5314_s28 + $0x98] sm:$0xff]  }
 0x441   : > { %2728 = vadd.xlane.f32.xlu1 %v2712_v50  ;;  %4833 = vpow2.f32 %v2114_v63  ;;  %v2713_v63 = vmul.f32 %v6310_v39, %v4377_v25  ;;  %v4388_v50 = vunpack.c.l.bf16 %v4447_v56  ;;  %v4389_v21 = vunpack.c.h.bf16 %v4447_v56  ;;  %v4440_v56 = vld [vmem:[%s5314_s28 + $0x60] sm:$0xff]  }
 0x442   : > { %v6347_v20 = vpop.eup %4825  ;;  %v2116_v45 = vmul.f32 1.442695, %v2089_v6 }
 0x443   : > { %v4828_v2 = vpop.eup %4827  ;;  %2574 = vadd.xlane.f32.xlu0 %v2555_v42  ;;  %v2066_v11 = vpop.permute.xlu1 %2065  ;;  %v2337_v16 = vpack.c.bf16 %v6347_v20, %v6340_v51 }
 0x444   : > { %4835 = vpow2.f32 %v2116_v45  ;;  %v2091_v14 = vsub.f32 %v6123_v38, %v2066_v11  ;;  %v2338_v52 = vpack.c.bf16 %v6343_v48, %v4828_v2  ;;  %v2558_v33 = vmul.f32 %v4828_v2, %v4324_v26  ;;  %v4438_v45 = vld [vmem:[%s5314_s28 + $0x50] sm:$0xff]   ;;  %v4449_v26 = vld [vmem:[%s5314_s28 + $0xa8] sm:$0xff]  }
 0x445   : > { %2570 = vadd.xlane.f32.xlu1 %v2553_v19  ;;  %4577 = vmatprep.mubr.bf16.mxu1 %v2337_v16  ;;  %4837 = vpow2.f32 %v2118_v60  ;;  %v2718_v41 = vmul.f32 %v4828_v2, %v4388_v50  ;;  %v4325_v19 = vunpack.c.h.bf16 %v4431_v35  ;;  %v2556_v60 = vmul.f32 %v6340_v51, %v4320_v53  ;;  %v4446_v11 = vld [vmem:[%s5314_s28 + $0x90] sm:$0xff]  }
 0x446   : > { %v2120_v18 = vmul.f32 1.442695, %v2091_v14  ;;  %4578 = vmatmul.mubr.bf16.gmra.mrb[4].mxu1 %v2338_v52  ;;  %v6359_v38 = vpop.eup %4829  ;;  %v4352_v47 = vunpack.c.l.bf16 %v4438_v45  ;;  %v4384_v52 = vunpack.c.l.bf16 %v4446_v11  ;;  %v4353_v35 = vunpack.c.h.bf16 %v4438_v45 }
 0x447   : > { %2654 = vadd.xlane.f32.xlu0 %v2635_v10  ;;  %v2076_v22 = vpop.permute.xlu1 %2075  ;;  %v2559_v16 = vmul.f32 %v6343_v48, %v4325_v19  ;;  %v4396_v25 = vunpack.c.l.bf16 %v4449_v26  ;;  %v4397_v53 = vunpack.c.h.bf16 %v4449_v26 }
 0x448   : > { %4839 = vpow2.f32 %v2120_v18  ;;  %v2093_v31 = vsub.f32 %v6129_v15, %v2076_v22  ;;  %v4439_v15 = vld [vmem:[%s5314_s28 + $0x58] sm:$0xff]   ;;  %v2716_v36 = vmul.f32 %v6340_v51, %v4384_v52  ;;  %v2719_v18 = vmul.f32 %v6343_v48, %v4389_v21  ;;  %v4433_v22 = vld [vmem:[%s5314_s28 + $0x28] sm:$0xff]  }
 0x449   : > { %2170 = vadd.xlane.f32.xlu1 %v4828_v2  ;;  %4841 = vpow2.f32 %v2122_v5  ;;  %v4356_v0 = vunpack.c.l.bf16 %v4439_v15  ;;  %v4357_v14 = vunpack.c.h.bf16 %v4439_v15  ;;  %v4321_v5 = vunpack.c.h.bf16 %v4430_v46  ;;  %v4443_v52 = vld [vmem:[%s5314_s28 + $0x78] sm:$0xff]  }
 0x44a   : > { %v6363_v28 = vpop.eup %4831  ;;  %v2124_v30 = vmul.f32 1.442695, %v2093_v31  ;;  %v4365_v46 = vunpack.c.h.bf16 %v4441_v43  ;;  %v4372_v21 = vunpack.c.l.bf16 %v4443_v52 }
 0x44b   : > { %2734 = vadd.xlane.f32.xlu0 %v2715_v29  ;;  %v2339_v55 = vpack.c.bf16 %v6363_v28, %v6359_v38  ;;  %v6368_v34 = vpop.eup %4833  ;;  %v2638_v44 = vmul.f32 %v4828_v2, %v4356_v0  ;;  %v2636_v2 = vmul.f32 %v6340_v51, %v4352_v47  ;;  %v2639_v10 = vmul.f32 %v6343_v48, %v4357_v14  ;;  %v4435_v47 = vld [vmem:[%s5314_s28 + $0x38] sm:$0xff]   ;;  %v6427_v14 = vpop.permute.xlu1 %2241 }
 0x44c   : > { %4843 = vpow2.f32 %v2124_v30  ;;  %v2557_v31 = vmul.f32 %v6347_v20, %v4321_v5  ;;  %v4332_v29 = vunpack.c.l.bf16 %v4433_v22  ;;  %v4385_v30 = vunpack.c.h.bf16 %v4446_v11 }
 0x44d   : > { %2166 = vadd.xlane.f32.xlu1 %v6340_v51  ;;  %4581 = vmatprep.mubr.bf16.mxu1 %v2339_v55  ;;  %v2637_v51 = vmul.f32 %v6347_v20, %v4353_v35  ;;  %v4364_v55 = vunpack.c.l.bf16 %v4441_v43  ;;  %v6438_v35 = vpop.permute.xlu0 %2246 }
 0x44e   : > { %v6373_v40 = vpop.eup %4835  ;;  %v2717_v15 = vmul.f32 %v6347_v20, %v4385_v30 }
 0x44f   : > { %2650 = vadd.xlane.f32.xlu0 %v2633_v59  ;;  %v2340_v23 = vpack.c.bf16 %v6373_v40, %v6368_v34  ;;  %v6378_v58 = vpop.eup %4837  ;;  %v2642_v59 = vmul.f32 %v6368_v34, %v4364_v55  ;;  %v2723_v19 = vmul.f32 %v6373_v40, %v4397_v53  ;;  %v4341_v55 = vunpack.c.h.bf16 %v4435_v47 }
 0x451   : > { %2580 = vadd.xlane.f32.xlu1 %v2558_v33  ;;  %4582 = vmatmul.mubr.bf16.gmra.mrb[8].mxu1 %v2340_v23  ;;  %v4432_v33 = vld [vmem:[%s5314_s28 + $0x20] sm:$0xff]   ;;  %v2722_v23 = vmul.f32 %v6368_v34, %v4396_v25  ;;  %v4451_v25 = vld [vmem:[%s5314_s28 + $0xb8] sm:$0xff]  }
 0x452   : > { %v6381_v27 = vpop.eup %4839  ;;  %v4328_v0 = vunpack.c.l.bf16 %v4432_v33 }
 0x453   : > { %2730 = vadd.xlane.f32.xlu0 %v2713_v63  ;;  %v2341_v54 = vpack.c.bf16 %v6381_v27, %v6378_v58  ;;  %v6386_v6 = vpop.eup %4841  ;;  %v4333_v63 = vunpack.c.h.bf16 %v4433_v22 }
 0x454   : > { %v2646_v22 = vmul.f32 %v6386_v6, %v4372_v21 }
 0x455   : > { %2660 = vadd.xlane.f32.xlu1 %v2638_v44  ;;  %4585 = vmatprep.mubr.bf16.mxu1 %v2341_v54  ;;  %v2560_v44 = vmul.f32 %v6359_v38, %v4328_v0  ;;  %v4360_v54 = vunpack.c.l.bf16 %v4440_v56  ;;  %v2563_v50 = vmul.f32 %v6373_v40, %v4333_v63 }
 0x456   : > { %v6388_v42 = vpop.eup %4843 }
 0x457   : > { %2172 = vadd.xlane.f32.xlu0 %v6343_v48  ;;  %v2342_v39 = vpack.c.bf16 %v6388_v42, %v6386_v6  ;;  %v2562_v48 = vmul.f32 %v6368_v34, %v4332_v29  ;;  %v4442_v29 = vld [vmem:[%s5314_s28 + $0x70] sm:$0xff]  }
 0x458   : > { %v4368_v30 = vunpack.c.l.bf16 %v4442_v29 }
 0x459   : > { %2740 = vadd.xlane.f32.xlu1 %v2718_v41  ;;  %4586 = vmatmul.mubr.bf16.gmra.mrb[12].mxu1 %v2342_v39  ;;  %v2640_v41 = vmul.f32 %v6359_v38, %v4360_v54 }
 0x45a   : > { %v2644_v26 = vmul.f32 %v6378_v58, %v4368_v30 }
 0x45b   : > { %2168 = vadd.xlane.f32.xlu0 %v6347_v20  ;;  %v4448_v20 = vld [vmem:[%s5314_s28 + $0xa0] sm:$0xff]  }
 0x45c   : > { %v4392_v39 = vunpack.c.l.bf16 %v4448_v20 }
 0x45d   : > { %2576 = vadd.xlane.f32.xlu1 %v2556_v60  ;;  %v4329_v60 = vunpack.c.h.bf16 %v4432_v33  ;;  %v2567_v33 = vmul.f32 %v6388_v42, %v4341_v55 }
 0x45e   : > { %v2720_v45 = vmul.f32 %v6359_v38, %v4392_v39 }
 0x45f   : > { %2582 = vadd.xlane.f32.xlu0 %v2559_v16  ;;  %v2561_v11 = vmul.f32 %v6363_v28, %v4329_v60  ;;  %v4361_v16 = vunpack.c.h.bf16 %v4440_v56  ;;  %v4404_v56 = vunpack.c.l.bf16 %v4451_v25  ;;  %v4405_v60 = vunpack.c.h.bf16 %v4451_v25 }
 0x461   : > { %2656 = vadd.xlane.f32.xlu1 %v2636_v2  ;;  %v4340_v2 = vunpack.c.l.bf16 %v4435_v47 }
 0x463   : > { %2662 = vadd.xlane.f32.xlu0 %v2639_v10  ;;  %v2566_v10 = vmul.f32 %v6386_v6, %v4340_v2 }
 0x465   : > { %2736 = vadd.xlane.f32.xlu1 %v2716_v36  ;;  %v6433_v36 = vpop.permute.xlu1 %2251 }
 0x467   : > { %2742 = vadd.xlane.f32.xlu0 %v2719_v18  ;;  %v4434_v18 = vld [vmem:[%s5314_s28 + $0x30] sm:$0xff]  }
 0x468   : > { %v4337_v54 = vunpack.c.h.bf16 %v4434_v18 }
 0x469   : > { %2178 = vadd.xlane.f32.xlu1 %v6368_v34  ;;  %v2643_v34 = vmul.f32 %v6373_v40, %v4365_v46  ;;  %v6441_v43 = vpop.permute.xlu1 %2256 }
 0x46a   : > { %v2565_v46 = vmul.f32 %v6381_v27, %v4337_v54 }
 0x46b   : > { %2578 = vadd.xlane.f32.xlu0 %v2557_v31  ;;  %v4336_v31 = vunpack.c.l.bf16 %v4434_v18 }
 0x46d   : > { %2174 = vadd.xlane.f32.xlu1 %v6359_v38  ;;  %v2641_v38 = vmul.f32 %v6363_v28, %v4361_v16 }
 0x46f   : > { %2658 = vadd.xlane.f32.xlu0 %v2637_v51  ;;  %v2564_v51 = vmul.f32 %v6378_v58, %v4336_v31 }
 0x471   : > { %2588 = vadd.xlane.f32.xlu1 %v2562_v48  ;;  %v4450_v48 = vld [vmem:[%s5314_s28 + $0xb0] sm:$0xff]  }
 0x472   : > { %v4401_v53 = vunpack.c.h.bf16 %v4450_v48 }
 0x473   : > { %2738 = vadd.xlane.f32.xlu0 %v2717_v15  ;;  %v4400_v15 = vunpack.c.l.bf16 %v4450_v48 }
 0x475   : > { %2668 = vadd.xlane.f32.xlu1 %v2642_v59  ;;  %v6450_v59 = vpop.permute.xlu1 %2266  ;;  %v2724_v0 = vmul.f32 %v6378_v58, %v4400_v15 }
 0x477   : > { %2180 = vadd.xlane.f32.xlu0 %v6373_v40  ;;  %v4393_v40 = vunpack.c.h.bf16 %v4448_v20 }
 0x479   : > { %2748 = vadd.xlane.f32.xlu1 %v2722_v23  ;;  %v2721_v5 = vmul.f32 %v6363_v28, %v4393_v40  ;;  %v4373_v23 = vunpack.c.h.bf16 %v4443_v52  ;;  %v6458_v20 = vpop.permute.xlu1 %2276  ;;  %v2128_v52 = vld [vmem:[#allocation3 + $0x10] sm:$0xff] }
 0x47a   : > { %v2144_v40 = vmul.f32 %v6270_v9, %v2128_v52  ;;  %v2796_v52 = vld [vmem:[#allocation5 + $0x18] sm:$0xff] }
 0x47b   : > { %2176 = vadd.xlane.f32.xlu0 %v6363_v28  ;;  %v6446_v28 = vpop.permute.xlu0 %2261 }
 0x47d   : > { %2584 = vadd.xlane.f32.xlu1 %v2560_v44  ;;  %v2647_v44 = vmul.f32 %v6388_v42, %v4373_v23 }
 0x47f   : > { %2590 = vadd.xlane.f32.xlu0 %v2563_v50  ;;  %v6455_v63 = vpop.permute.xlu0 %2271  ;;  %v2726_v50 = vmul.f32 %v6386_v6, %v4404_v56  ;;  %v2793_v56 = vld [vmem:[#allocation5] sm:$0xff] }
 0x481   : > { %2664 = vadd.xlane.f32.xlu1 %v2640_v41  ;;  %v4369_v41 = vunpack.c.h.bf16 %v4442_v29 }
 0x483   : > { %2670 = vadd.xlane.f32.xlu0 %v2643_v34  ;;  %v6462_v39 = vpop.permute.xlu0 %2291  ;;  %v2645_v34 = vmul.f32 %v6381_v27, %v4369_v41 }
 0x485   : > { %2744 = vadd.xlane.f32.xlu1 %v2720_v45 }
 0x487   : > { %2750 = vadd.xlane.f32.xlu0 %v2723_v19  ;;  %v6467_v45 = vpop.permute.xlu0 %2281  ;;  %v2725_v19 = vmul.f32 %v6381_v27, %v4401_v53 }
 0x489   : > { %2186 = vadd.xlane.f32.xlu1 %v6386_v6  ;;  %v2727_v6 = vmul.f32 %v6388_v42, %v4405_v60  ;;  %v2132_v60 = vld [vmem:[#allocation3 + $0x30] sm:$0xff] }
 0x48b   : > { %2586 = vadd.xlane.f32.xlu0 %v2561_v11  ;;  %v6473_v11 = vpop.permute.xlu0 %2311 }
 0x48d   : > { %2182 = vadd.xlane.f32.xlu1 %v6378_v58  ;;  %v6464_v58 = vpop.permute.xlu1 %2296 }
 0x48f   : > { %2666 = vadd.xlane.f32.xlu0 %v2641_v38  ;;  %v6477_v2 = vpop.permute.xlu0 %2301 }
 0x491   : > { %2596 = vadd.xlane.f32.xlu1 %v2566_v10  ;;  %v6470_v47 = vpop.permute.xlu1 %2286 }
 0x493   : > { %2746 = vadd.xlane.f32.xlu0 %v2721_v5 }
 0x495   : > { %2676 = vadd.xlane.f32.xlu1 %v2646_v22  ;;  %v6475_v16 = vpop.permute.xlu1 %2316  ;;  %v2129_v22 = vld [vmem:[#allocation3 + $0x18] sm:$0xff] }
 0x496   : > { %v2145_v30 = vmul.f32 %v6278_v37, %v2129_v22 }
 0x497   : > { %2188 = vadd.xlane.f32.xlu0 %v6388_v42 }
 0x499   : > { %2592 = vadd.xlane.f32.xlu1 %v2564_v51  ;;  %v6479_v38 = vpop.permute.xlu1 %2306  ;;  %v2127_v51 = vld [vmem:[#allocation3 + $0x8] sm:$0xff] }
 0x49a   : > { %v2143_v9 = vmul.f32 %v6238_v12, %v2127_v51 }
 0x49b   : > { %2184 = vadd.xlane.f32.xlu0 %v6381_v27  ;;  %v2126_v27 = vld [vmem:[#allocation3] sm:$0xff] }
 0x49c   : > { %v2142_v42 = vmul.f32 %v6262_v1, %v2126_v27  ;;  %v2130_v27 = vld [vmem:[#allocation3 + $0x20] sm:$0xff] }
 0x49d   : > { %2672 = vadd.xlane.f32.xlu1 %v2644_v26  ;;  %v2795_v26 = vld [vmem:[#allocation5 + $0x10] sm:$0xff] }
 0x49f   : > { %2598 = vadd.xlane.f32.xlu0 %v2567_v33  ;;  %v2811_v33 = vmul.f32 %v2795_v26, %v6433_v36 }
 0x4a1   : > { %2752 = vadd.xlane.f32.xlu1 %v2724_v0 }
 0x4a3   : > { %2678 = vadd.xlane.f32.xlu0 %v2647_v44 }
 0x4a5   : > { %2756 = vadd.xlane.f32.xlu1 %v2726_v50  ;;  %v2809_v50 = vmul.f32 %v2793_v56, %v6427_v14  ;;  %v2131_v56 = vld [vmem:[#allocation3 + $0x28] sm:$0xff] }
 0x4a7   : > { %2594 = vadd.xlane.f32.xlu0 %v2565_v46 }
 0x4ab   : > { %2674 = vadd.xlane.f32.xlu0 %v2645_v34 }
 0x4af   : > { %2754 = vadd.xlane.f32.xlu0 %v2725_v19 }
 0x4b3   : > { %2758 = vadd.xlane.f32.xlu0 %v2727_v6 }
 0x4bc   : > { %v2163_v10 = vpop.xlane.xlu0 %2162 }
 0x4bd   : > { %v2192_v21 = vadd.f32 %v2163_v10, %v2144_v40  ;;  %v2148_v40 = vmul.f32 %v6250_v32, %v2132_v60 }
 0x4be   : > { %v2653_v18 = vpop.xlane.xlu1 %2652 }
 0x4bf   : > { %2209 = vst.msk [vmem:[#allocation3 + $0x10] sm:$0xff] %vm2206_vm6, %v2192_v21 }
 0x4c0   : > { %v2159_v5 = vpop.xlane.xlu0 %2158 }
 0x4c1   : > { %v2190_v31 = vadd.f32 %v2159_v5, %v2142_v42 }
 0x4c2   : > { %v2733_v29 = vpop.xlane.xlu1 %2732 }
 0x4c3   : > { %2207 = vst.msk [vmem:[#allocation3] sm:$0xff] %vm2206_vm6, %v2190_v31  ;;  %v2146_v31 = vmul.f32 %v6244_v62, %v2130_v27 }
 0x4c4   : > { %v2165_v48 = vpop.xlane.xlu0 %2164 }
 0x4c5   : > { %v2193_v55 = vadd.f32 %v2165_v48, %v2145_v30  ;;  %v2794_v48 = vld [vmem:[#allocation5 + $0x8] sm:$0xff] }
 0x4c6   : > { %v2161_v15 = vpop.xlane.xlu1 %2160 }
 0x4c7   : > { %2210 = vst.msk [vmem:[#allocation3 + $0x18] sm:$0xff] %vm2206_vm6, %v2193_v55  ;;  %v2191_v25 = vadd.f32 %v2161_v15, %v2143_v9  ;;  %v2810_v9 = vmul.f32 %v2794_v48, %v6438_v35 }
 0x4c8   : > { %v2573_v1 = vpop.xlane.xlu0 %2572 }
 0x4c9   : > { %2208 = vst.msk [vmem:[#allocation3 + $0x8] sm:$0xff] %vm2206_vm6, %v2191_v25  ;;  %v2762_v23 = vsel %vm2206_vm6, %v2573_v1, %v2653_v18  ;;  %v2812_v18 = vmul.f32 %v2796_v52, %v6441_v43  ;;  %v2133_v25 = vld [vmem:[#allocation3 + $0x38] sm:$0xff]  ;;  %v2797_v52 = vld [vmem:[#allocation5 + $0x20] sm:$0xff] }
 0x4ca   : > { %v2779_v37 = vsel %vm2776_vm7, %v2762_v23, %v2733_v29  ;;  %v2649_v0 = vpop.xlane.xlu1 %2648  ;;  %v2799_v23 = vld [vmem:[#allocation5 + $0x30] sm:$0xff]  ;;  %v2813_v27 = vmul.f32 %v2797_v52, %v6446_v28 }
 0x4cb   : > { %v2827_v44 = vadd.f32 %v2811_v33, %v2779_v37  ;;  %v2149_v37 = vmul.f32 %v6291_v17, %v2133_v25 }
 0x4cc   : > { %v2569_v12 = vpop.xlane.xlu0 %2568 }
 0x4cd   : > { %2844 = vst.msk [vmem:[#allocation5 + $0x10] sm:$0xff] %vm2841_vm8, %v2827_v44  ;;  %v2760_v54 = vsel %vm2206_vm6, %v2569_v12, %v2649_v0  ;;  %v2815_v12 = vmul.f32 %v2799_v23, %v6455_v63 }
 0x4ce   : > { %v2729_v46 = vpop.xlane.xlu1 %2728 }
 0x4cf   : > { %v2777_v41 = vsel %vm2776_vm7, %v2760_v54, %v2729_v46 }
 0x4d0   : > { %v2825_v34 = vadd.f32 %v2809_v50, %v2777_v41  ;;  %v2575_v53 = vpop.xlane.xlu0 %2574  ;;  %v2147_v41 = vmul.f32 %v6286_v4, %v2131_v56  ;;  %v2137_v56 = vld [vmem:[#allocation3 + $0x58] sm:$0xff] }
 0x4d2   : > { %2842 = vst.msk [vmem:[#allocation5] sm:$0xff] %vm2841_vm8, %v2825_v34  ;;  %v2571_v19 = vpop.xlane.xlu1 %2570 }
 0x4d4   : > { %v2655_v6 = vpop.xlane.xlu0 %2654 }
 0x4d5   : > { %v2763_v42 = vsel %vm2206_vm6, %v2575_v53, %v2655_v6 }
 0x4d6   : > { %v2171_v10 = vpop.xlane.xlu1 %2170 }
 0x4d7   : > { %v2196_v21 = vadd.f32 %v2171_v10, %v2148_v40  ;;  %v2800_v10 = vld [vmem:[#allocation5 + $0x38] sm:$0xff] }
 0x4d8   : > { %v2735_v5 = vpop.xlane.xlu0 %2734 }
 0x4d9   : > { %2213 = vst.msk [vmem:[#allocation3 + $0x30] sm:$0xff] %vm2206_vm6, %v2196_v21  ;;  %v2780_v22 = vsel %vm2776_vm7, %v2763_v42, %v2735_v5  ;;  %v2136_v42 = vld [vmem:[#allocation3 + $0x50] sm:$0xff]  ;;  %v2816_v5 = vmul.f32 %v2800_v10, %v6458_v20 }
 0x4da   : > { %v2828_v29 = vadd.f32 %v2812_v18, %v2780_v22  ;;  %v2167_v51 = vpop.xlane.xlu1 %2166 }
 0x4db   : > { %v2194_v30 = vadd.f32 %v2167_v51, %v2146_v31 }
 0x4dc   : > { %2845 = vst.msk [vmem:[#allocation5 + $0x18] sm:$0xff] %vm2841_vm8, %v2828_v29  ;;  %v2651_v32 = vpop.xlane.xlu0 %2650 }
 0x4dd   : > { %2211 = vst.msk [vmem:[#allocation3 + $0x20] sm:$0xff] %vm2206_vm6, %v2194_v30  ;;  %v2761_v26 = vsel %vm2206_vm6, %v2571_v19, %v2651_v32  ;;  %v2152_v30 = vmul.f32 %v6256_v57, %v2136_v42 }
 0x4de   : > { %v2581_v55 = vpop.xlane.xlu1 %2580 }
 0x4e0   : > { %v2731_v15 = vpop.xlane.xlu0 %2730 }
 0x4e1   : > { %v2778_v1 = vsel %vm2776_vm7, %v2761_v26, %v2731_v15 }
 0x4e2   : > { %v2826_v33 = vadd.f32 %v2810_v9, %v2778_v1  ;;  %v2661_v62 = vpop.xlane.xlu1 %2660 }
 0x4e3   : > { %v2766_v54 = vsel %vm2206_vm6, %v2581_v55, %v2661_v62  ;;  %v2134_v55 = vld [vmem:[#allocation3 + $0x40] sm:$0xff]  ;;  %v2798_v62 = vld [vmem:[#allocation5 + $0x28] sm:$0xff] }
 0x4e4   : > { %2843 = vst.msk [vmem:[#allocation5 + $0x8] sm:$0xff] %vm2841_vm8, %v2826_v33  ;;  %v2173_v0 = vpop.xlane.xlu0 %2172  ;;  %v2150_v15 = vmul.f32 %v6264_v13, %v2134_v55  ;;  %v2814_v23 = vmul.f32 %v2798_v62, %v6450_v59  ;;  %v2153_v13 = vmul.f32 %v6294_v7, %v2137_v56  ;;  %v2229_v56 = vld [vmem:[#allocation4 + $0x30] sm:$0xff] }
 0x4e5   : > { %v2197_v44 = vadd.f32 %v2173_v0, %v2149_v37 }
 0x4e6   : > { %v2741_v50 = vpop.xlane.xlu1 %2740 }
 0x4e7   : > { %2214 = vst.msk [vmem:[#allocation3 + $0x38] sm:$0xff] %vm2206_vm6, %v2197_v44  ;;  %v2783_v46 = vsel %vm2776_vm7, %v2766_v54, %v2741_v50  ;;  %v2803_v50 = vld [vmem:[#allocation5 + $0x50] sm:$0xff] }
 0x4e8   : > { %v2831_v34 = vadd.f32 %v2815_v12, %v2783_v46  ;;  %v2169_v53 = vpop.xlane.xlu0 %2168  ;;  %v2225_v46 = vld [vmem:[#allocation4 + $0x10] sm:$0xff] }
 0x4e9   : > { %v2195_v19 = vadd.f32 %v2169_v53, %v2147_v41  ;;  %v2223_v53 = vld [vmem:[#allocation4] sm:$0xff]  ;;  %v2321_v10 = vmul.f32 %v6433_v36, %v2225_v46 }
 0x4ea   : > { %2848 = vst.msk [vmem:[#allocation5 + $0x30] sm:$0xff] %vm2841_vm8, %v2831_v34  ;;  %v2577_v17 = vpop.xlane.xlu1 %2576  ;;  %v2135_v34 = vld [vmem:[#allocation3 + $0x48] sm:$0xff]  ;;  %v2138_v46 = vld [vmem:[#allocation3 + $0x60] sm:$0xff] }
 0x4eb   : > { %2212 = vst.msk [vmem:[#allocation3 + $0x28] sm:$0xff] %vm2206_vm6, %v2195_v19 }
 0x4ec   : > { %v2583_v60 = vpop.xlane.xlu0 %2582 }
 0x4ee   : > { %v2657_v6 = vpop.xlane.xlu1 %2656 }
 0x4ef   : > { %v2764_v21 = vsel %vm2206_vm6, %v2577_v17, %v2657_v6  ;;  %v2819_v17 = vmul.f32 %v2803_v50, %v6462_v39 }
 0x4f0   : > { %v2663_v40 = vpop.xlane.xlu0 %2662 }
 0x4f1   : > { %v2767_v22 = vsel %vm2206_vm6, %v2583_v60, %v2663_v40  ;;  %v2226_v60 = vld [vmem:[#allocation4 + $0x18] sm:$0xff]  ;;  %v2224_v40 = vld [vmem:[#allocation4 + $0x8] sm:$0xff] }
 0x4f2   : > { %v2737_v18 = vpop.xlane.xlu1 %2736 }
 0x4f3   : > { %v2781_v4 = vsel %vm2776_vm7, %v2764_v21, %v2737_v18  ;;  %v2319_v21 = vmul.f32 %v6427_v14, %v2223_v53  ;;  %v2325_v53 = vmul.f32 %v6455_v63, %v2229_v56  ;;  %v2237_v56 = vld [vmem:[#allocation4 + $0x70] sm:$0xff] }
 0x4f4   : > { %v2829_v31 = vadd.f32 %v2813_v27, %v2781_v4  ;;  %v2743_v29 = vpop.xlane.xlu0 %2742  ;;  %v2151_v27 = vmul.f32 %v6297_v8, %v2135_v34 }
 0x4f5   : > { %v2784_v51 = vsel %vm2776_vm7, %v2767_v22, %v2743_v29 }
 0x4f6   : > { %2846 = vst.msk [vmem:[#allocation5 + $0x20] sm:$0xff] %vm2841_vm8, %v2829_v31  ;;  %v2832_v32 = vadd.f32 %v2816_v5, %v2784_v51  ;;  %v2179_v48 = vpop.xlane.xlu1 %2178  ;;  %v2322_v5 = vmul.f32 %v6441_v43, %v2226_v60  ;;  %v2320_v51 = vmul.f32 %v6438_v35, %v2224_v40 }
 0x4f7   : > { %v2200_v9 = vadd.f32 %v2179_v48, %v2152_v30 }
 0x4f8   : > { %2849 = vst.msk [vmem:[#allocation5 + $0x38] sm:$0xff] %vm2841_vm8, %v2832_v32  ;;  %v2579_v26 = vpop.xlane.xlu0 %2578 }
 0x4f9   : > { %2217 = vst.msk [vmem:[#allocation3 + $0x50] sm:$0xff] %vm2206_vm6, %v2200_v9  ;;  %v2801_v9 = vld [vmem:[#allocation5 + $0x40] sm:$0xff] }
 0x4fa   : > { %v2175_v25 = vpop.xlane.xlu1 %2174  ;;  %v2817_v35 = vmul.f32 %v2801_v9, %v6467_v45 }
 0x4fb   : > { %v2198_v1 = vadd.f32 %v2175_v25, %v2150_v15  ;;  %v2804_v15 = vld [vmem:[#allocation5 + $0x58] sm:$0xff] }
 0x4fc   : > { %v2659_v33 = vpop.xlane.xlu0 %2658 }
 0x4fd   : > { %2215 = vst.msk [vmem:[#allocation3 + $0x40] sm:$0xff] %vm2206_vm6, %v2198_v1  ;;  %v2765_v37 = vsel %vm2206_vm6, %v2579_v26, %v2659_v33  ;;  %v2140_v33 = vld [vmem:[#allocation3 + $0x70] sm:$0xff] }
 0x4fe   : > { %v2589_v57 = vpop.xlane.xlu1 %2588 }
 0x500   : > { %v2739_v0 = vpop.xlane.xlu0 %2738 }
 0x501   : > { %v2782_v44 = vsel %vm2776_vm7, %v2765_v37, %v2739_v0 }
 0x502   : > { %v2830_v12 = vadd.f32 %v2814_v23, %v2782_v44  ;;  %v2669_v54 = vpop.xlane.xlu1 %2668 }
 0x503   : > { %v2770_v6 = vsel %vm2206_vm6, %v2589_v57, %v2669_v54  ;;  %v2820_v57 = vmul.f32 %v2804_v15, %v6464_v58  ;;  %v2227_v54 = vld [vmem:[#allocation4 + $0x20] sm:$0xff] }
 0x504   : > { %2847 = vst.msk [vmem:[#allocation5 + $0x28] sm:$0xff] %vm2841_vm8, %v2830_v12  ;;  %v2181_v41 = vpop.xlane.xlu0 %2180  ;;  %v2156_v12 = vmul.f32 %v6272_v61, %v2140_v33  ;;  %v2323_v60 = vmul.f32 %v6446_v28, %v2227_v54  ;;  %v2154_v61 = vmul.f32 %v6280_v24, %v2138_v46  ;;  %v2802_v28 = vld [vmem:[#allocation5 + $0x48] sm:$0xff]  ;;  %v2805_v46 = vld [vmem:[#allocation5 + $0x60] sm:$0xff] }
 0x505   : > { %v2201_v19 = vadd.f32 %v2181_v41, %v2153_v13  ;;  %v2230_v41 = vld [vmem:[#allocation4 + $0x38] sm:$0xff] }
 0x506   : > { %v2749_v52 = vpop.xlane.xlu1 %2748 }
 0x507   : > { %2218 = vst.msk [vmem:[#allocation3 + $0x58] sm:$0xff] %vm2206_vm6, %v2201_v19  ;;  %v2787_v7 = vsel %vm2776_vm7, %v2770_v6, %v2749_v52  ;;  %v2228_v19 = vld [vmem:[#allocation4 + $0x28] sm:$0xff]  ;;  %v2326_v52 = vmul.f32 %v6458_v20, %v2230_v41  ;;  %v2233_v20 = vld [vmem:[#allocation4 + $0x50] sm:$0xff] }
 0x508   : > { %v2835_v18 = vadd.f32 %v2819_v17, %v2787_v7  ;;  %v4575_v42 = vpop.f32.mrb[0].mxu1  ;;  %v2177_v4 = vpop.xlane.xlu0 %2176  ;;  %v2236_v41 = vld [vmem:[#allocation4 + $0x68] sm:$0xff] }
 0x509   : > { %v2490_v22 = vadd.f32 %v4575_v42, %v2321_v10  ;;  %v2199_v31 = vadd.f32 %v2177_v4, %v2151_v27  ;;  %v2425_v29 = vpop.f32.mrb[1].mxu1  ;;  %v2324_v27 = vmul.f32 %v6450_v59, %v2228_v19 }
 0x50a   : > { %2852 = vst.msk [vmem:[#allocation5 + $0x50] sm:$0xff] %vm2841_vm8, %v2835_v18  ;;  %v2488_v36 = vadd.f32 %v2425_v29, %v2319_v21  ;;  %v4576_v30 = vpop.f32.mrb[2].mxu1  ;;  %v2585_v32 = vpop.xlane.xlu1 %2584 }
 0x50b   : > { %2506 = vst [vmem:[#allocation4 + $0x10] sm:$0xff] %v2490_v22  ;;  %2216 = vst.msk [vmem:[#allocation3 + $0x48] sm:$0xff] %vm2206_vm6, %v2199_v31  ;;  %v2491_v8 = vadd.f32 %v4576_v30, %v2322_v5  ;;  %v2428_v14 = vpop.f32.mrb[3].mxu1  ;;  %v2818_v31 = vmul.f32 %v2802_v28, %v6470_v47 }
 0x50c   : > { %2504 = vst [vmem:[#allocation4] sm:$0xff] %v2488_v36  ;;  %v2489_v48 = vadd.f32 %v2428_v14, %v2320_v51  ;;  %v2591_v55 = vpop.xlane.xlu0 %2590  ;;  %v2141_v51 = vld [vmem:[#allocation3 + $0x78] sm:$0xff]  ;;  %v2231_v36 = vld [vmem:[#allocation4 + $0x40] sm:$0xff] }
 0x50d   : > { %2507 = vst [vmem:[#allocation4 + $0x18] sm:$0xff] %v2491_v8  ;;  %v2327_v9 = vmul.f32 %v6467_v45, %v2231_v36 }
 0x50e   : > { %2505 = vst [vmem:[#allocation4 + $0x8] sm:$0xff] %v2489_v48  ;;  %v2665_v43 = vpop.xlane.xlu1 %2664  ;;  %v2329_v48 = vmul.f32 %v6462_v39, %v2233_v20 }
 0x50f   : > { %v2768_v25 = vsel %vm2206_vm6, %v2585_v32, %v2665_v43  ;;  %v2234_v32 = vld [vmem:[#allocation4 + $0x58] sm:$0xff]  ;;  %v2157_v43 = vmul.f32 %v6300_v49, %v2141_v51  ;;  %v2806_v51 = vld [vmem:[#allocation5 + $0x68] sm:$0xff] }
 0x510   : > { %v2671_v26 = vpop.xlane.xlu0 %2670  ;;  %v2822_v36 = vmul.f32 %v2806_v51, %v6479_v38 }
 0x511   : > { %v2771_v23 = vsel %vm2206_vm6, %v2591_v55, %v2671_v26  ;;  %v2232_v55 = vld [vmem:[#allocation4 + $0x48] sm:$0xff] }
 0x512   : > { %v2745_v1 = vpop.xlane.xlu1 %2744 }
 0x513   : > { %v2785_v62 = vsel %vm2776_vm7, %v2768_v25, %v2745_v1  ;;  %v2330_v25 = vmul.f32 %v6464_v58, %v2234_v32  ;;  %v2235_v58 = vld [vmem:[#allocation4 + $0x60] sm:$0xff]  ;;  %v2808_v32 = vld [vmem:[#allocation5 + $0x78] sm:$0xff] }
 0x514   : > { %v2833_v37 = vadd.f32 %v2817_v35, %v2785_v62  ;;  %v2751_v0 = vpop.xlane.xlu0 %2750  ;;  %v2139_v35 = vld [vmem:[#allocation3 + $0x68] sm:$0xff] }
 0x515   : > { %v2788_v44 = vsel %vm2776_vm7, %v2771_v23, %v2751_v0  ;;  %v2155_v0 = vmul.f32 %v6303_v3, %v2139_v35 }
 0x516   : > { %2850 = vst.msk [vmem:[#allocation5 + $0x40] sm:$0xff] %vm2841_vm8, %v2833_v37  ;;  %v2836_v50 = vadd.f32 %v2820_v57, %v2788_v44  ;;  %v2187_v13 = vpop.xlane.xlu1 %2186  ;;  %v2328_v57 = vmul.f32 %v6470_v47, %v2232_v55 }
 0x517   : > { %v2204_v34 = vadd.f32 %v2187_v13, %v2156_v12  ;;  %v2333_v13 = vmul.f32 %v6473_v11, %v2237_v56 }
 0x518   : > { %2853 = vst.msk [vmem:[#allocation5 + $0x58] sm:$0xff] %vm2841_vm8, %v2836_v50  ;;  %v2587_v17 = vpop.xlane.xlu0 %2586  ;;  %v2238_v50 = vld [vmem:[#allocation4 + $0x78] sm:$0xff] }
 0x519   : > { %2221 = vst.msk [vmem:[#allocation3 + $0x70] sm:$0xff] %vm2206_vm6, %v2204_v34  ;;  %v4579_v6 = vpop.f32.mrb[4].mxu1  ;;  %v2331_v34 = vmul.f32 %v6477_v2, %v2235_v58  ;;  %v2334_v19 = vmul.f32 %v6475_v16, %v2238_v50 }
 0x51a   : > { %v2494_v40 = vadd.f32 %v4579_v6, %v2325_v53  ;;  %v2441_v10 = vpop.f32.mrb[5].mxu1  ;;  %v2183_v7 = vpop.xlane.xlu1 %2182  ;;  %v2821_v6 = vmul.f32 %v2805_v46, %v6477_v2 }
 0x51b   : > { %v2492_v21 = vadd.f32 %v2441_v10, %v2323_v60  ;;  %v2202_v63 = vadd.f32 %v2183_v7, %v2154_v61  ;;  %v4580_v18 = vpop.f32.mrb[6].mxu1  ;;  %v2332_v61 = vmul.f32 %v6479_v38, %v2236_v41 }
 0x51c   : > { %2510 = vst [vmem:[#allocation4 + $0x30] sm:$0xff] %v2494_v40  ;;  %v2495_v42 = vadd.f32 %v4580_v18, %v2326_v52  ;;  %v2444_v4 = vpop.f32.mrb[7].mxu1  ;;  %v2667_v5 = vpop.xlane.xlu0 %2666 }
 0x51d   : > { %2508 = vst [vmem:[#allocation4 + $0x20] sm:$0xff] %v2492_v21  ;;  %2219 = vst.msk [vmem:[#allocation3 + $0x60] sm:$0xff] %vm2206_vm6, %v2202_v63  ;;  %v2493_v22 = vadd.f32 %v2444_v4, %v2324_v27  ;;  %v2769_v59 = vsel %vm2206_vm6, %v2587_v17, %v2667_v5  ;;  %v2807_v27 = vld [vmem:[#allocation5 + $0x70] sm:$0xff] }
 0x51e   : > { %2511 = vst [vmem:[#allocation4 + $0x38] sm:$0xff] %v2495_v42  ;;  %v6561_v24 = vpop.xlane.xlu1 %2596  ;;  %v2823_v2 = vmul.f32 %v2807_v27, %v6473_v11 }
 0x51f   : > { %2509 = vst [vmem:[#allocation4 + $0x28] sm:$0xff] %v2493_v22 }
 0x520   : > { %v2747_v29 = vpop.xlane.xlu0 %2746 }
 0x521   : > { %v2786_v30 = vsel %vm2776_vm7, %v2769_v59, %v2747_v29 }
 0x522   : > { %v2834_v8 = vadd.f32 %v2818_v31, %v2786_v30  ;;  %v2677_v14 = vpop.xlane.xlu1 %2676 }
 0x523   : > { %v2774_v28 = vsel %vm2206_vm6, %v6561_v24, %v2677_v14  ;;  %v2824_v14 = vmul.f32 %v2808_v32, %v6475_v16 }
 0x524   : > { %2851 = vst.msk [vmem:[#allocation5 + $0x48] sm:$0xff] %vm2841_vm8, %v2834_v8  ;;  %v4583_v26 = vpop.f32.mrb[8].mxu1  ;;  %v2189_v15 = vpop.xlane.xlu0 %2188 }
 0x525   : > { %v2498_v1 = vadd.f32 %v4583_v26, %v2329_v48  ;;  %v2205_v33 = vadd.f32 %v2189_v15, %v2157_v43  ;;  %v2457_v62 = vpop.f32.mrb[9].mxu1 }
 0x526   : > { %v2496_v23 = vadd.f32 %v2457_v62, %v2327_v9  ;;  %v4584_v37 = vpop.f32.mrb[10].mxu1  ;;  %v2593_v39 = vpop.xlane.xlu1 %2592 }
 0x527   : > { %2514 = vst [vmem:[#allocation4 + $0x50] sm:$0xff] %v2498_v1  ;;  %2222 = vst.msk [vmem:[#allocation3 + $0x78] sm:$0xff] %vm2206_vm6, %v2205_v33  ;;  %v2499_v49 = vadd.f32 %v4584_v37, %v2330_v25  ;;  %v2460_v45 = vpop.f32.mrb[11].mxu1 }
 0x528   : > { %2512 = vst [vmem:[#allocation4 + $0x40] sm:$0xff] %v2496_v23  ;;  %v2497_v44 = vadd.f32 %v2460_v45, %v2328_v57  ;;  %v2185_v12 = vpop.xlane.xlu0 %2184 }
 0x529   : > { %2515 = vst [vmem:[#allocation4 + $0x58] sm:$0xff] %v2499_v49  ;;  %v2203_v54 = vadd.f32 %v2185_v12, %v2155_v0 }
 0x52a   : > { %2513 = vst [vmem:[#allocation4 + $0x48] sm:$0xff] %v2497_v44  ;;  %v2673_v47 = vpop.xlane.xlu1 %2672 }
 0x52b   : > { %2220 = vst.msk [vmem:[#allocation3 + $0x68] sm:$0xff] %vm2206_vm6, %v2203_v54  ;;  %v2772_v52 = vsel %vm2206_vm6, %v2593_v39, %v2673_v47 }
 0x52c   : > { %v4587_v53 = vpop.f32.mrb[12].mxu1  ;;  %v2599_v3 = vpop.xlane.xlu0 %2598 }
 0x52d   : > { %v2502_v17 = vadd.f32 %v4587_v53, %v2333_v13  ;;  %v2473_v60 = vpop.f32.mrb[13].mxu1 }
 0x52e   : > { %v2500_v40 = vadd.f32 %v2473_v60, %v2331_v34  ;;  %v2753_v10 = vpop.xlane.xlu1 %2752  ;;  %v4588_v7 = vpop.f32.mrb[14].mxu1 }
 0x52f   : > { %2518 = vst [vmem:[#allocation4 + $0x70] sm:$0xff] %v2502_v17  ;;  %v2789_v21 = vsel %vm2776_vm7, %v2772_v52, %v2753_v10  ;;  %v2503_v63 = vadd.f32 %v4588_v7, %v2334_v19  ;;  %v2476_v18 = vpop.f32.mrb[15].mxu1 }
 0x530   : > { %2516 = vst [vmem:[#allocation4 + $0x60] sm:$0xff] %v2500_v40  ;;  %v2837_v42 = vadd.f32 %v2821_v6, %v2789_v21  ;;  %v2501_v4 = vadd.f32 %v2476_v18, %v2332_v61  ;;  %v2679_v5 = vpop.xlane.xlu0 %2678 }
 0x531   : > { %2519 = vst [vmem:[#allocation4 + $0x78] sm:$0xff] %v2503_v63  ;;  %v2775_v48 = vsel %vm2206_vm6, %v2599_v3, %v2679_v5 }
 0x532   : > { %2854 = vst.msk [vmem:[#allocation5 + $0x60] sm:$0xff] %vm2841_vm8, %v2837_v42  ;;  %2517 = vst [vmem:[#allocation4 + $0x68] sm:$0xff] %v2501_v4  ;;  %v2757_v22 = vpop.xlane.xlu1 %2756 }
 0x533   : > { %v2791_v20 = vsel %vm2776_vm7, %v2774_v28, %v2757_v22 }
 0x534   : > { %v2839_v31 = vadd.f32 %v2823_v2, %v2791_v20  ;;  %v2595_v59 = vpop.xlane.xlu0 %2594 }
 0x536   : > { %2856 = vst.msk [vmem:[#allocation5 + $0x70] sm:$0xff] %vm2841_vm8, %v2839_v31 }
 0x538   : > { %v2675_v29 = vpop.xlane.xlu0 %2674 }
 0x539   : > { %v2773_v30 = vsel %vm2206_vm6, %v2595_v59, %v2675_v29 }
 0x53c   : > { %v2755_v11 = vpop.xlane.xlu0 %2754 }
 0x53d   : > { %v2790_v24 = vsel %vm2776_vm7, %v2773_v30, %v2755_v11 }
 0x53e   : > { %v2838_v8 = vadd.f32 %v2822_v36, %v2790_v24 }
 0x540   : > { %2855 = vst.msk [vmem:[#allocation5 + $0x68] sm:$0xff] %vm2841_vm8, %v2838_v8  ;;  %v2759_v55 = vpop.xlane.xlu0 %2758 }
 0x541   : > { %v2792_v43 = vsel %vm2776_vm7, %v2775_v48, %v2759_v55 }
 0x542   : > { %v2840_v9 = vadd.f32 %v2824_v14, %v2792_v43 }
 0x544   : > { %2857 = vst.msk [vmem:[#allocation5 + $0x78] sm:$0xff] %vm2841_vm8, %v2840_v9 }
 0x545 PF: > { %p4183_p5 = scmp.ne.s32.totalorder %s5013_s15, 1 }
 0x546   : > { %v2982_v38 = vld [vmem:[%s6996_s8] sm:$0x3] (!%p4183_p5)  ;;  %vm3008_vm9 = vcmask (!%p4183_p5), 1040384   ;;  %vm3009_vm10 = vcmask (!%p4183_p5), 1041408   ;;  %v5038_v26 = vmov (!%p4183_p5), 65535   ;;  %v2959_v35 = vld [vmem:[#allocation5 + $0x8] sm:$0xff] (!%p4183_p5) }
 0x547   : > { %2877 = sbr.rel (%p4183_p5) target bundleno = 2107 (0x83b), region = 159  ;;  %v2958_v16 = vld [vmem:[#allocation5] sm:$0xff] (!%p4183_p5)  ;;  %v3010_v15 = vsel (!%p4183_p5), %vm3008_vm9, 4294967295, %v5038_v26  ;;  %vm2983_vm11 = vcmask (!%p4183_p5), 23552   ;;  %v2960_v33 = vld [vmem:[#allocation5 + $0x10] sm:$0xff] (!%p4183_p5)  ;;  %v2961_v62 = vld [vmem:[#allocation5 + $0x18] sm:$0xff] (!%p4183_p5) }
 0x548   : > { %v3011_v25 = vsel (!%p4183_p5), %vm3009_vm10, %v3010_v15, 0  ;;  %v2974_v1 = vpack.c.bf16 (!%p4183_p5), %v2959_v35, %v2958_v16  ;;  %v5039_v57 = vmov (!%p4183_p5), 0   ;;  %v2962_v37 = vld [vmem:[#allocation5 + $0x20] sm:$0xff] (!%p4183_p5)  ;;  %v2963_v39 = vld [vmem:[#allocation5 + $0x28] sm:$0xff] (!%p4183_p5)  ;;  %v2975_v49 = vpack.c.bf16 (!%p4183_p5), %v2961_v62, %v2960_v33  ;;  %v2880_v56 = vld [vmem:[#allocation3 + $0x10] sm:$0xff] (!%p4183_p5)  ;;  %s7092_s15 = sld [smem:[#allocation35_spill]] (!%p4183_p5) }
 0x549   : > { %4847 = vset.pattern.permute.xlu0 (!%p4183_p5), %v5039_v57  ;;  %4848 = vset.pattern.permute.xlu1 (!%p4183_p5), %v5039_v57  ;;  %v3013_v23 = vand.u32 (!%p4183_p5), %v3011_v25, %v2982_v38  ;;  %v2976_v45 = vpack.c.bf16 (!%p4183_p5), %v2963_v39, %v2962_v37  ;;  %v2878_v0 = vld [vmem:[#allocation3] sm:$0xff] (!%p4183_p5)  ;;  %v2879_v44 = vld [vmem:[#allocation3 + $0x8] sm:$0xff] (!%p4183_p5)  ;;  %vm2896_vm13 = vcmp.gt.f32.partialorder (!%p4183_p5), %v2880_v56, 0.0  ;;  %v2881_v12 = vld [vmem:[#allocation3 + $0x18] sm:$0xff] (!%p4183_p5) }
 0x54a   : > { %4591 = vmatprep.mubr.msk.bf16.mxu0 (!%p4183_p5), %vm2983_vm11, %v2974_v1  ;;  %vm2894_vm12 = vcmp.gt.f32.partialorder (!%p4183_p5), %v2878_v0, 0.0  ;;  %vm2895_vm14 = vcmp.gt.f32.partialorder (!%p4183_p5), %v2879_v44, 0.0  ;;  %v2882_v58 = vld [vmem:[#allocation3 + $0x20] sm:$0xff] (!%p4183_p5)  ;;  %v2883_v54 = vld [vmem:[#allocation3 + $0x28] sm:$0xff] (!%p4183_p5)  ;;  %v2964_v50 = vld [vmem:[#allocation5 + $0x30] sm:$0xff] (!%p4183_p5)  ;;  %v2912_v13 = vsel (!%p4183_p5), %vm2896_vm13, %v2880_v56, 1.0 }
 0x54b   : > { %4589 = vmatprep.subr.bf16.mxu0 (!%p4183_p5), %v3013_v23  ;;  %v2910_v47 = vsel (!%p4183_p5), %vm2894_vm12, %v2878_v0, 1.0  ;;  %v2911_v46 = vsel (!%p4183_p5), %vm2895_vm14, %v2879_v44, 1.0  ;;  %vm2897_vm15 = vcmp.gt.f32.partialorder (!%p4183_p5), %v2881_v12, 0.0  ;;  %v2965_v41 = vld [vmem:[#allocation5 + $0x38] sm:$0xff] (!%p4183_p5)  ;;  %v2966_v34 = vld [vmem:[#allocation5 + $0x40] sm:$0xff] (!%p4183_p5)  ;;  %vm2898_vm0 = vcmp.gt.f32.partialorder (!%p4183_p5), %v2882_v58, 0.0 }
 0x54c   : > { %4590 = vmatpush3.bf16.msra.mxu0 (!%p4183_p5), %v3013_v23  ;;  %4865 = vrcp.f32 (!%p4183_p5), %v2910_v47  ;;  %v2913_v53 = vsel (!%p4183_p5), %vm2897_vm15, %v2881_v12, 1.0  ;;  %v2884_v3 = vld [vmem:[#allocation3 + $0x30] sm:$0xff] (!%p4183_p5)  ;;  %vm2899_vm1 = vcmp.gt.f32.partialorder (!%p4183_p5), %v2883_v54, 0.0  ;;  %v2885_v19 = vld [vmem:[#allocation3 + $0x38] sm:$0xff] (!%p4183_p5)  ;;  %v2886_v17 = vld [vmem:[#allocation3 + $0x40] sm:$0xff] (!%p4183_p5)  ;;  %v2977_v40 = vpack.c.bf16 (!%p4183_p5), %v2965_v41, %v2964_v50 }
 0x54d   : > { %4867 = vrcp.f32 (!%p4183_p5), %v2912_v13  ;;  %v2887_v60 = vld [vmem:[#allocation3 + $0x48] sm:$0xff] (!%p4183_p5)  ;;  %v2888_v61 = vld [vmem:[#allocation3 + $0x50] sm:$0xff] (!%p4183_p5)  ;;  %v2889_v52 = vld [vmem:[#allocation3 + $0x58] sm:$0xff] (!%p4183_p5)  ;;  %v2914_v10 = vsel (!%p4183_p5), %vm2898_vm0, %v2882_v58, 1.0  ;;  %vm2900_vm2 = vcmp.gt.f32.partialorder (!%p4183_p5), %v2884_v3, 0.0  ;;  %v2915_v7 = vsel (!%p4183_p5), %vm2899_vm1, %v2883_v54, 1.0 }
 0x54e   : > { %v2967_v6 = vld [vmem:[#allocation5 + $0x48] sm:$0xff]  ;;  %4869 = vrcp.f32 %v2911_v46  ;;  %vm2901_vm3 = vcmp.gt.f32.partialorder %v2885_v19, 0.0  ;;  %vm2902_vm4 = vcmp.gt.f32.partialorder %v2886_v17, 0.0  ;;  %vm2903_vm5 = vcmp.gt.f32.partialorder %v2887_v60, 0.0  ;;  %v2968_v63 = vld [vmem:[#allocation5 + $0x50] sm:$0xff]  ;;  %v2969_v18 = vld [vmem:[#allocation5 + $0x58] sm:$0xff] }
 0x54f   : > { %4592 = vmatmul.mubr.msk.bf16.vlgmr.msra.gmra.mrb[0].mxu0 %vm2983_vm11, %v2975_v49  ;;  %4871 = vrcp.f32 %v2913_v53  ;;  %v2978_v27 = vpack.c.bf16 %v2967_v6, %v2966_v34  ;;  %vm2904_vm6 = vcmp.gt.f32.partialorder %v2888_v61, 0.0  ;;  %vm2905_vm7 = vcmp.gt.f32.partialorder %v2889_v52, 0.0  ;;  %v2970_v2 = vld [vmem:[#allocation5 + $0x60] sm:$0xff]  ;;  %v2971_v28 = vld [vmem:[#allocation5 + $0x68] sm:$0xff]  ;;  %v2972_v24 = vld [vmem:[#allocation5 + $0x70] sm:$0xff] }
 0x550   : > { %4595 = vmatprep.mubr.msk.bf16.mxu0 %vm2983_vm11, %v2976_v45  ;;  %4873 = vrcp.f32 %v2914_v10  ;;  %v2916_v21 = vsel %vm2900_vm2, %v2884_v3, 1.0  ;;  %v2917_v42 = vsel %vm2901_vm3, %v2885_v19, 1.0  ;;  %v2918_v4 = vsel %vm2902_vm4, %v2886_v17, 1.0  ;;  %v2890_v59 = vld [vmem:[#allocation3 + $0x60] sm:$0xff]  ;;  %v2891_v30 = vld [vmem:[#allocation3 + $0x68] sm:$0xff]  ;;  %v2973_v8 = vld [vmem:[#allocation5 + $0x78] sm:$0xff] }
 0x551   : > { %4875 = vrcp.f32 %v2915_v7  ;;  %v2919_v5 = vsel %vm2903_vm5, %v2887_v60, 1.0  ;;  %v2920_v22 = vsel %vm2904_vm6, %v2888_v61, 1.0  ;;  %v2921_v20 = vsel %vm2905_vm7, %v2889_v52, 1.0  ;;  %v4849_v14 = vld [vmem:[%s6997_s9] sm:$0xff]   ;;  %v2892_v43 = vld [vmem:[#allocation3 + $0x70] sm:$0xff]  ;;  %v2893_v9 = vld [vmem:[#allocation3 + $0x78] sm:$0xff] }
 0x552   : > { %4877 = vrcp.f32 %v2916_v21  ;;  %v2979_v36 = vpack.c.bf16 %v2969_v18, %v2968_v63  ;;  %v2980_v32 = vpack.c.bf16 %v2971_v28, %v2970_v2  ;;  %vm2906_vm8 = vcmp.gt.f32.partialorder %v2890_v59, 0.0  ;;  %4607 = vmatprep.subr.bf16.mxu1 %v4849_v14  ;;  %v4850_v16 = vld [vmem:[%s6997_s9 + $0x8] sm:$0xff]   ;;  %v4851_v33 = vld [vmem:[%s6997_s9 + $0x10] sm:$0xff]   ;;  %v4852_v37 = vld [vmem:[%s6997_s9 + $0x18] sm:$0xff]  }
 0x553   : > { %4879 = vrcp.f32 %v2917_v42  ;;  %vm2907_vm9 = vcmp.gt.f32.partialorder %v2891_v30, 0.0  ;;  %4608 = vmatpush3.bf16.msra.mxu1 %v4849_v14  ;;  %v2922_v38 = vsel %vm2906_vm8, %v2890_v59, 1.0  ;;  %v2981_v15 = vpack.c.bf16 %v2973_v8, %v2972_v24  ;;  %v4853_v45 = vld [vmem:[%s6997_s9 + $0x20] sm:$0xff]   ;;  %v4854_v58 = vld [vmem:[%s6997_s9 + $0x28] sm:$0xff]   ;;  %v4855_v54 = vld [vmem:[%s6997_s9 + $0x30] sm:$0xff]  }
 0x554   : > { %4881 = vrcp.f32 %v2918_v4  ;;  %v2923_v35 = vsel %vm2907_vm9, %v2891_v30, 1.0  ;;  %vm2908_vm10 = vcmp.gt.f32.partialorder %v2892_v43, 0.0  ;;  %vm2909_vm12 = vcmp.gt.f32.partialorder %v2893_v9, 0.0  ;;  %4609 = vmatprep.subr.bf16.mxu1 %v4850_v16  ;;  %v4856_v50 = vld [vmem:[%s6997_s9 + $0x38] sm:$0xff]   ;;  %v2944_v3 = vld [vmem:[#allocation4 + $0x10] sm:$0xff]  ;;  %v2942_v19 = vld [vmem:[#allocation4] sm:$0xff] }
 0x555   : > { %4883 = vrcp.f32 %v2919_v5  ;;  %v2924_v1 = vsel %vm2908_vm10, %v2892_v43, 1.0  ;;  %v2925_v57 = vsel %vm2909_vm12, %v2893_v9, 1.0  ;;  %v2945_v60 = vld [vmem:[#allocation4 + $0x18] sm:$0xff]  ;;  %v2943_v52 = vld [vmem:[#allocation4 + $0x8] sm:$0xff]  ;;  %v3224_v28 = vld [vmem:[#allocation8] sm:$0xff] }
 0x556   : > { %v4866_v31 = vpop.eup %4865  ;;  %4885 = vrcp.f32 %v2920_v22  ;;  %v3227_v42 = vld [vmem:[#allocation8 + $0x18] sm:$0xff]  ;;  %v3225_v22 = vld [vmem:[#allocation8 + $0x8] sm:$0xff]  ;;  %v2948_v59 = vld [vmem:[#allocation4 + $0x30] sm:$0xff] }
 0x557   : > { %4596 = vmatmul.mubr.msk.bf16.gmra.mrb[4].mxu0 %vm2983_vm11, %v2977_v40  ;;  %v4868_v29 = vpop.eup %4867  ;;  %3130 = vperm.xlu0 %4847, %v4866_v31   ;;  %4887 = vrcp.f32 %v2921_v20  ;;  %v3226_v20 = vld [vmem:[#allocation8 + $0x10] sm:$0xff]  ;;  %v2949_v30 = vld [vmem:[#allocation4 + $0x38] sm:$0xff] }
 0x558   : > { %4599 = vmatprep.mubr.msk.bf16.mxu0 %vm2983_vm11, %v2978_v27  ;;  %v4870_v51 = vpop.eup %4869  ;;  %3140 = vperm.xlu1 %4848, %v4868_v29   ;;  %4889 = vrcp.f32 %v2922_v38 }
 0x559   : > { %v4872_v11 = vpop.eup %4871  ;;  %4610 = vmatpush3.bf16.msra.mxu1 %v4850_v16  ;;  %4891 = vrcp.f32 %v2923_v35 }
 0x55a   : > { %v4874_v48 = vpop.eup %4873  ;;  %4611 = vmatprep.subr.bf16.mxu1 %v4851_v33  ;;  %4893 = vrcp.f32 %v2924_v1  ;;  %v3231_v1 = vld [vmem:[#allocation8 + $0x38] sm:$0xff] }
 0x55b   : > { %3135 = vperm.xlu0 %4847, %v4870_v51   ;;  %v4876_v55 = vpop.eup %4875  ;;  %4895 = vrcp.f32 %v2925_v57  ;;  %v2946_v51 = vld [vmem:[#allocation4 + $0x20] sm:$0xff] }
 0x55c   : > { %3145 = vperm.xlu1 %4848, %v4872_v11   ;;  %v4878_v26 = vpop.eup %4877  ;;  %v3228_v57 = vld [vmem:[#allocation8 + $0x20] sm:$0xff] }
 0x55d   : > { %v4880_v25 = vpop.eup %4879  ;;  %4612 = vmatpush3.bf16.msra.mxu1 %v4851_v33 }
 0x55e   : > { %v4882_v62 = vpop.eup %4881  ;;  %4613 = vmatprep.subr.bf16.mxu1 %v4852_v37 }
 0x55f   : > { %4600 = vmatmul.mubr.msk.bf16.gmra.mrb[8].mxu0 %vm2983_vm11, %v2979_v36  ;;  %3150 = vperm.xlu0 %4847, %v4874_v48   ;;  %v4884_v23 = vpop.eup %4883 }
 0x560   : > { %4603 = vmatprep.mubr.msk.bf16.mxu0 %vm2983_vm11, %v2980_v32  ;;  %3155 = vperm.xlu1 %4848, %v4876_v55   ;;  %v4886_v39 = vpop.eup %4885  ;;  %v2947_v55 = vld [vmem:[#allocation4 + $0x28] sm:$0xff] }
 0x561   : > { %v4888_v49 = vpop.eup %4887  ;;  %4614 = vmatpush3.bf16.msra.mxu1 %v4852_v37  ;;  %v3229_v37 = vld [vmem:[#allocation8 + $0x28] sm:$0xff] }
 0x562   : > { %v4890_v0 = vpop.eup %4889  ;;  %4615 = vmatprep.subr.bf16.mxu1 %v4853_v45 }
 0x563   : > { %3160 = vperm.xlu0 %4847, %v4878_v26   ;;  %v4892_v56 = vpop.eup %4891 }
 0x564   : > { %3165 = vperm.xlu1 %4848, %v4880_v25   ;;  %v4894_v44 = vpop.eup %4893 }
 0x565   : > { %4616 = vmatpush3.bf16.msra.mxu1 %v4853_v45  ;;  %v4896_v12 = vpop.eup %4895  ;;  %v2952_v45 = vld [vmem:[#allocation4 + $0x50] sm:$0xff] }
 0x566   : > { %4617 = vmatprep.subr.bf16.mxu1 %v4854_v58 }
 0x567   : > { %4604 = vmatmul.mubr.msk.bf16.gmra.mrb[12].mxu0 %vm2983_vm11, %v2981_v15  ;;  %3170 = vperm.xlu0 %4847, %v4882_v62  }
 0x568   : > { %3175 = vperm.xlu1 %4848, %v4884_v23  }
 0x569   : > { %4618 = vmatpush3.bf16.msra.mxu1 %v4854_v58 }
 0x56a   : > { %4619 = vmatprep.subr.bf16.mxu1 %v4855_v54 }
 0x56b   : > { %3180 = vperm.xlu0 %4847, %v4886_v39   ;;  %v3230_v39 = vld [vmem:[#allocation8 + $0x30] sm:$0xff] }
 0x56c   : > { %3185 = vperm.xlu1 %4848, %v4888_v49  }
 0x56d   : > { %4620 = vmatpush3.bf16.msra.mxu1 %v4855_v54 }
 0x56e   : > { %4621 = vmatprep.subr.bf16.mxu1 %v4856_v50 }
 0x56f   : > { %3190 = vperm.xlu0 %4847, %v4890_v0  }
 0x570   : > { %3195 = vperm.xlu1 %4848, %v4892_v56  }
 0x571   : > { %4622 = vmatpush3.bf16.msra.mxu1 %v4856_v50 }
 0x573   : > { %3200 = vperm.xlu0 %4847, %v4894_v44   ;;  %v2950_v44 = vld [vmem:[#allocation4 + $0x40] sm:$0xff] }
 0x574   : > { %3205 = vperm.xlu1 %4848, %v4896_v12  }
 0x5d6   : > { %v3131_v47 = vpop.permute.xlu0 %3130 }
 0x5d7   : > { %v3141_v13 = vpop.permute.xlu1 %3140 }
 0x5da   : > { %v3136_v46 = vpop.permute.xlu0 %3135 }
 0x5db   : > { %v3146_v41 = vpop.permute.xlu1 %3145 }
 0x5de   : > { %v3151_v34 = vpop.permute.xlu0 %3150 }
 0x5df   : > { %v3156_v53 = vpop.permute.xlu1 %3155 }
 0x5e2   : > { %v3161_v7 = vpop.permute.xlu0 %3160 }
 0x5e3   : > { %v3166_v63 = vpop.permute.xlu1 %3165 }
 0x5e6   : > { %v3171_v24 = vpop.permute.xlu0 %3170 }
 0x5e7   : > { %v3176_v43 = vpop.permute.xlu1 %3175 }
 0x5ea   : > { %v3181_v0 = vpop.permute.xlu0 %3180 }
 0x5eb   : > { %v3186_v12 = vpop.permute.xlu1 %3185 }
 0x622   : > { %v4593_v17 = vpop.f32.mrb[0].mxu0 }
 0x623   : > { %v3114_v6 = vadd.f32 %v4593_v17, %v2944_v3  ;;  %v3049_v61 = vpop.f32.mrb[1].mxu0 }
 0x624   : > { %v3112_v40 = vadd.f32 %v3049_v61, %v2942_v19  ;;  %v4594_v10 = vpop.f32.mrb[2].mxu0 }
 0x625   : > { %v3115_v27 = vadd.f32 %v4594_v10, %v2945_v60  ;;  %v3052_v21 = vpop.f32.mrb[3].mxu0  ;;  %v3210_v5 = vmul.f32 %v3141_v13, %v3114_v6 }
 0x626   : > { %v3208_v18 = vmul.f32 %v3131_v47, %v3112_v40  ;;  %v3113_v4 = vadd.f32 %v3052_v21, %v2943_v52  ;;  %v2953_v47 = vld [vmem:[#allocation4 + $0x58] sm:$0xff]  ;;  %v3233_v21 = vld [vmem:[#allocation8 + $0x48] sm:$0xff] }
 0x627   : > { %v3211_v2 = vmul.f32 %v3146_v41, %v3115_v27  ;;  %v6638_v8 = vadd.f32 %v3226_v20, %v3210_v5  ;;  %v3235_v52 = vld [vmem:[#allocation8 + $0x58] sm:$0xff]  ;;  %v2956_v5 = vld [vmem:[#allocation4 + $0x70] sm:$0xff] }
 0x628   : > { %v3209_v31 = vmul.f32 %v3136_v46, %v3113_v4  ;;  %v6634_v11 = vadd.f32 %v3224_v28, %v3208_v18  ;;  %v3196_v18 = vpop.permute.xlu1 %3195  ;;  %v2954_v28 = vld [vmem:[#allocation4 + $0x60] sm:$0xff] }
 0x629   : > { %v6632_v29 = vadd.f32 %v3227_v42, %v3211_v2  ;;  %v3234_v42 = vld [vmem:[#allocation8 + $0x50] sm:$0xff] }
 0x62a   : > { %v4597_v36 = vpop.f32.mrb[4].mxu0  ;;  %v6636_v32 = vadd.f32 %v3225_v22, %v3209_v31 }
 0x62b   : > { %v3118_v14 = vadd.f32 %v4597_v36, %v2948_v59  ;;  %v3065_v48 = vpop.f32.mrb[5].mxu0  ;;  %v3257_v35 = vpack.c.bf16 %v6632_v29, %v6638_v8  ;;  %v2957_v59 = vld [vmem:[#allocation4 + $0x78] sm:$0xff] }
 0x62c   : > { %v3116_v9 = vadd.f32 %v3065_v48, %v2946_v51  ;;  %v4598_v38 = vpop.f32.mrb[6].mxu0  ;;  %v3256_v16 = vpack.c.bf16 %v6636_v32, %v6634_v11 }
 0x62d   : > { %v3119_v26 = vadd.f32 %v4598_v38, %v2949_v30  ;;  %v3068_v15 = vpop.f32.mrb[7].mxu0  ;;  %v3214_v62 = vmul.f32 %v3161_v7, %v3118_v14  ;;  %v3232_v7 = vld [vmem:[#allocation8 + $0x40] sm:$0xff] }
 0x62e   : > { %v3212_v25 = vmul.f32 %v3151_v34, %v3116_v9  ;;  %v3117_v33 = vadd.f32 %v3068_v15, %v2947_v55  ;;  %4623 = vmatprep.mubr.bf16.mxu1 %v3256_v16  ;;  %v2951_v34 = vld [vmem:[#allocation4 + $0x48] sm:$0xff] }
 0x62f   : > { %v3215_v23 = vmul.f32 %v3166_v63, %v3119_v26  ;;  %4624 = vmatmul.mubr.bf16.vlgmr.msra.gmra.mrb[0].mxu1 %v3257_v35  ;;  %v6650_v13 = vadd.f32 %v3230_v39, %v3214_v62  ;;  %v3191_v63 = vpop.permute.xlu0 %3190  ;;  %v3206_v26 = vpop.permute.xlu1 %3205  ;;  %v3239_v35 = vld [vmem:[#allocation8 + $0x78] sm:$0xff] }
 0x630   : > { %v3213_v49 = vmul.f32 %v3156_v53, %v3117_v33  ;;  %v6646_v58 = vadd.f32 %v3228_v57, %v3212_v25  ;;  %v3236_v33 = vld [vmem:[#allocation8 + $0x60] sm:$0xff]  ;;  %v3237_v57 = vld [vmem:[#allocation8 + $0x68] sm:$0xff] }
 0x631   : > { %v6644_v56 = vadd.f32 %v3231_v1, %v3215_v23  ;;  %v3238_v23 = vld [vmem:[#allocation8 + $0x70] sm:$0xff] }
 0x632   : > { %v6648_v54 = vadd.f32 %v3229_v37, %v3213_v49  ;;  %v4601_v50 = vpop.f32.mrb[8].mxu0 }
 0x633   : > { %v3122_v46 = vadd.f32 %v4601_v50, %v2952_v45  ;;  %v3081_v41 = vpop.f32.mrb[9].mxu0  ;;  %v3259_v6 = vpack.c.bf16 %v6644_v56, %v6650_v13  ;;  %v3201_v16 = vpop.permute.xlu0 %3200  ;;  %v4857_v50 = vld [vmem:[%s6999_s11] sm:$0xff]  }
 0x634   : > { %v3120_v3 = vadd.f32 %v3081_v41, %v2950_v44  ;;  %v4602_v19 = vpop.f32.mrb[10].mxu0  ;;  %v3258_v53 = vpack.c.bf16 %v6648_v54, %v6646_v58  ;;  %4639 = vmatprep.subr.bf16.mxu0 %v4857_v50  ;;  %v4860_v41 = vld [vmem:[%s6999_s11 + $0x18] sm:$0xff]  }
 0x635   : > { %v3123_v17 = vadd.f32 %v4602_v19, %v2953_v47  ;;  %v3084_v60 = vpop.f32.mrb[11].mxu0  ;;  %v3218_v10 = vmul.f32 %v3181_v0, %v3122_v46  ;;  %4640 = vmatpush3.bf16.msra.mxu0 %v4857_v50  ;;  %v4858_v47 = vld [vmem:[%s6999_s11 + $0x8] sm:$0xff]   ;;  %v4859_v46 = vld [vmem:[%s6999_s11 + $0x10] sm:$0xff]  }
 0x636   : > { %v3216_v61 = vmul.f32 %v3171_v24, %v3120_v3  ;;  %v3121_v40 = vadd.f32 %v3084_v60, %v2951_v34  ;;  %4627 = vmatprep.mubr.bf16.mxu1 %v3258_v53  ;;  %v2955_v24 = vld [vmem:[#allocation4 + $0x68] sm:$0xff]  ;;  %4641 = vmatprep.subr.bf16.mxu0 %v4858_v47  ;;  %v4861_v34 = vld [vmem:[%s6999_s11 + $0x20] sm:$0xff]   ;;  %v4863_v19 = vld [vmem:[%s6999_s11 + $0x30] sm:$0xff]  }
 0x637   : > { %v3219_v27 = vmul.f32 %v3186_v12, %v3123_v17  ;;  %4628 = vmatmul.mubr.bf16.gmra.mrb[4].mxu1 %v3259_v6  ;;  %v6662_v51 = vadd.f32 %v3234_v42, %v3218_v10  ;;  %v4862_v3 = vld [vmem:[%s6999_s11 + $0x28] sm:$0xff]   ;;  %v4864_v53 = vld [vmem:[%s6999_s11 + $0x38] sm:$0xff]   ;;  %v6707_v17 = vld [vmem:[%s6998_s10] ss:$0 sm:$0xff] }
 0x638   : > { %v3217_v4 = vmul.f32 %v3176_v43, %v3121_v40  ;;  %v6658_v22 = vadd.f32 %v3232_v7, %v3216_v61 }
 0x639   : > { %v6656_v2 = vadd.f32 %v3235_v52, %v3219_v27  ;;  %4642 = vmatpush3.bf16.msra.mxu0 %v4858_v47 }
 0x63a   : > { %v6660_v20 = vadd.f32 %v3233_v21, %v3217_v4  ;;  %v4605_v31 = vpop.f32.mrb[12].mxu0  ;;  %4643 = vmatprep.subr.bf16.mxu0 %v4859_v46 }
 0x63b   : > { %v3126_v36 = vadd.f32 %v4605_v31, %v2956_v5  ;;  %v3097_v30 = vpop.f32.mrb[13].mxu0  ;;  %v3261_v38 = vpack.c.bf16 %v6656_v2, %v6662_v51 }
 0x63c   : > { %v3124_v14 = vadd.f32 %v3097_v30, %v2954_v28  ;;  %v4606_v48 = vpop.f32.mrb[14].mxu0  ;;  %v3260_v55 = vpack.c.bf16 %v6660_v20, %v6658_v22 }
 0x63d   : > { %v3127_v43 = vadd.f32 %v4606_v48, %v2957_v59  ;;  %v3100_v9 = vpop.f32.mrb[15].mxu0  ;;  %v3222_v1 = vmul.f32 %v3201_v16, %v3126_v36  ;;  %4644 = vmatpush3.bf16.msra.mxu0 %v4859_v46 }
 0x63e   : > { %v3220_v15 = vmul.f32 %v3191_v63, %v3124_v14  ;;  %v3125_v25 = vadd.f32 %v3100_v9, %v2955_v24  ;;  %4631 = vmatprep.mubr.bf16.mxu1 %v3260_v55  ;;  %4645 = vmatprep.subr.bf16.mxu0 %v4860_v41 }
 0x63f   : > { %v3223_v62 = vmul.f32 %v3206_v26, %v3127_v43  ;;  %4632 = vmatmul.mubr.bf16.gmra.mrb[8].mxu1 %v3261_v38  ;;  %v6674_v0 = vadd.f32 %v3238_v23, %v3222_v1 }
 0x640   : > { %v3221_v37 = vmul.f32 %v3196_v18, %v3125_v25  ;;  %v6670_v49 = vadd.f32 %v3236_v33, %v3220_v15 }
 0x641   : > { %v6668_v39 = vadd.f32 %v3239_v35, %v3223_v62  ;;  %4646 = vmatpush3.bf16.msra.mxu0 %v4860_v41 }
 0x642   : > { %v6672_v45 = vadd.f32 %v3237_v57, %v3221_v37  ;;  %4647 = vmatprep.subr.bf16.mxu0 %v4861_v34 }
 0x643   : > { %v3263_v12 = vpack.c.bf16 %v6668_v39, %v6674_v0 }
 0x644   : > { %v3262_v44 = vpack.c.bf16 %v6672_v45, %v6670_v49 }
 0x645   : > { %4648 = vmatpush3.bf16.msra.mxu0 %v4861_v34 }
 0x646   : > { %4635 = vmatprep.mubr.bf16.mxu1 %v3262_v44  ;;  %4649 = vmatprep.subr.bf16.mxu0 %v4862_v3 }
 0x647   : > { %4636 = vmatmul.mubr.bf16.gmra.mrb[12].mxu1 %v3263_v12 }
 0x649   : > { %4650 = vmatpush3.bf16.msra.mxu0 %v4862_v3 }
 0x64a   : > { %4651 = vmatprep.subr.bf16.mxu0 %v4863_v19 }
 0x64d   : > { %4652 = vmatpush3.bf16.msra.mxu0 %v4863_v19 }
 0x64e   : > { %4653 = vmatprep.subr.bf16.mxu0 %v4864_v53 }
 0x651   : > { %4654 = vmatpush3.bf16.msra.mxu0 %v4864_v53 }
 0x702   : > { %v4625_v60 = vpop.f32.mrb[0].mxu1 }
 0x703   : > { %v3378_v6 = vadd.f32 %v4625_v60, %v6707_v17  ;;  %v3369_v61 = vpop.f32.mrb[1].mxu1 }
 0x704   : > { %v3370_v52 = vadd.f32 %v6707_v17, %v3369_v61  ;;  %v4626_v40 = vpop.f32.mrb[2].mxu1 }
 0x705   : > { %v3450_v10 = vmul.f32 0.044715, %v3378_v6  ;;  %v6712_v7 = vadd.f32 %v4626_v40, %v6707_v17  ;;  %v3372_v27 = vpop.f32.mrb[3].mxu1  ;;  %v3434_v60 = vmul.f32 0.5, %v3378_v6 }
 0x706   : > { %v3448_v21 = vmul.f32 0.044715, %v3370_v52  ;;  %v6715_v63 = vadd.f32 %v6707_v17, %v3372_v27 }
 0x707   : > { %v3466_v18 = vmul.f32 %v3450_v10, %v3378_v6  ;;  %v3451_v42 = vmul.f32 0.044715, %v6712_v7 }
 0x708   : > { %v3464_v4 = vmul.f32 %v3448_v21, %v3370_v52  ;;  %v3449_v5 = vmul.f32 0.044715, %v6715_v63 }
 0x709   : > { %v3482_v28 = vmul.f32 %v3466_v18, %v3378_v6  ;;  %v3467_v31 = vmul.f32 %v3451_v42, %v6712_v7 }
 0x70a   : > { %v3480_v59 = vmul.f32 %v3464_v4, %v3370_v52  ;;  %v3465_v36 = vmul.f32 %v3449_v5, %v6715_v63  ;;  %v4629_v30 = vpop.f32.mrb[4].mxu1 }
 0x70b   : > { %v3498_v24 = vadd.f32 %v3482_v28, %v3378_v6  ;;  %v3483_v14 = vmul.f32 %v3467_v31, %v6712_v7  ;;  %v6723_v48 = vadd.f32 %v4629_v30, %v6707_v17  ;;  %v3385_v55 = vpop.f32.mrb[5].mxu1  ;;  %v3432_v31 = vmul.f32 0.5, %v3370_v52 }
 0x70c   : > { %v3481_v43 = vmul.f32 %v3465_v36, %v6715_v63  ;;  %v3386_v9 = vadd.f32 %v6707_v17, %v3385_v55  ;;  %v4630_v38 = vpop.f32.mrb[6].mxu1  ;;  %v3496_v16 = vadd.f32 %v3480_v59, %v3370_v52 }
 0x70d   : > { %v3514_v26 = vmul.f32 0.7978846, %v3498_v24  ;;  %v3499_v15 = vadd.f32 %v3483_v14, %v6712_v7  ;;  %v3454_v35 = vmul.f32 0.044715, %v6723_v48  ;;  %v6730_v25 = vadd.f32 %v4630_v38, %v6707_v17  ;;  %v3388_v1 = vpop.f32.mrb[7].mxu1 }
 0x70e   : > { %v3452_v33 = vmul.f32 0.044715, %v3386_v9  ;;  %v6733_v62 = vadd.f32 %v6707_v17, %v3388_v1  ;;  %v3497_v57 = vadd.f32 %v3481_v43, %v6715_v63  ;;  %v3512_v23 = vmul.f32 0.7978846, %v3496_v16 }
 0x70f   : > { %4897 = vtanh.f32 %v3514_v26  ;;  %v3515_v37 = vmul.f32 0.7978846, %v3499_v15  ;;  %v3470_v44 = vmul.f32 %v3454_v35, %v6723_v48  ;;  %v3455_v12 = vmul.f32 0.044715, %v6730_v25 }
 0x710   : > { %v3468_v50 = vmul.f32 %v3452_v33, %v3386_v9  ;;  %v3453_v47 = vmul.f32 0.044715, %v6733_v62  ;;  %v3513_v46 = vmul.f32 0.7978846, %v3497_v57  ;;  %4899 = vtanh.f32 %v3512_v23 }
 0x711   : > { %4901 = vtanh.f32 %v3515_v37  ;;  %v3486_v41 = vmul.f32 %v3470_v44, %v6723_v48  ;;  %v3471_v34 = vmul.f32 %v3455_v12, %v6730_v25  ;;  %v3435_v1 = vmul.f32 0.5, %v6712_v7 }
 0x712   : > { %v3484_v3 = vmul.f32 %v3468_v50, %v3386_v9  ;;  %v3469_v19 = vmul.f32 %v3453_v47, %v6733_v62  ;;  %v4633_v53 = vpop.f32.mrb[8].mxu1  ;;  %4903 = vtanh.f32 %v3513_v46  ;;  %v3433_v57 = vmul.f32 0.5, %v6715_v63 }
 0x713   : > { %v3487_v61 = vmul.f32 %v3471_v34, %v6730_v25  ;;  %v6744_v40 = vadd.f32 %v4633_v53, %v6707_v17  ;;  %v3401_v10 = vpop.f32.mrb[9].mxu1  ;;  %v3502_v4 = vadd.f32 %v3486_v41, %v6723_v48  ;;  %v3436_v50 = vmul.f32 0.5, %v3386_v9 }
 0x714   : > { %v3485_v27 = vmul.f32 %v3469_v19, %v6733_v62  ;;  %v6748_v21 = vadd.f32 %v6707_v17, %v3401_v10  ;;  %v4634_v18 = vpop.f32.mrb[10].mxu1  ;;  %v3500_v42 = vadd.f32 %v3484_v3, %v3386_v9 }
 0x715   : > { %v3458_v5 = vmul.f32 0.044715, %v6744_v40  ;;  %v6753_v28 = vadd.f32 %v4634_v18, %v6707_v17  ;;  %v3404_v6 = vpop.f32.mrb[11].mxu1  ;;  %v3503_v59 = vadd.f32 %v3487_v61, %v6730_v25  ;;  %v3518_v38 = vmul.f32 0.7978846, %v3502_v4 }
 0x716   : > { %v3456_v36 = vmul.f32 0.044715, %v6748_v21  ;;  %v6758_v30 = vadd.f32 %v6707_v17, %v3404_v6  ;;  %v3501_v24 = vadd.f32 %v3485_v27, %v6733_v62  ;;  %v3516_v14 = vmul.f32 0.7978846, %v3500_v42 }
 0x717   : > { %v3474_v55 = vmul.f32 %v3458_v5, %v6744_v40  ;;  %v3459_v43 = vmul.f32 0.044715, %v6753_v28  ;;  %v3519_v16 = vmul.f32 0.7978846, %v3503_v59 }
 0x718   : > { %v3472_v26 = vmul.f32 %v3456_v36, %v6748_v21  ;;  %v3457_v52 = vmul.f32 0.044715, %v6758_v30  ;;  %v3517_v15 = vmul.f32 0.7978846, %v3501_v24  ;;  %4905 = vtanh.f32 %v3516_v14 }
 0x719   : > { %v4898_v35 = vpop.eup %4897  ;;  %v3475_v33 = vmul.f32 %v3459_v43, %v6753_v28  ;;  %4907 = vtanh.f32 %v3518_v38  ;;  %v3490_v63 = vmul.f32 %v3474_v55, %v6744_v40 }
 0x71a   : > { %v4900_v23 = vpop.eup %4899  ;;  %v3473_v37 = vmul.f32 %v3457_v52, %v6758_v30  ;;  %v4637_v44 = vpop.f32.mrb[12].mxu1  ;;  %v3546_v12 = vadd.f32 1.0, %v4898_v35  ;;  %4909 = vtanh.f32 %v3517_v15  ;;  %v3488_v46 = vmul.f32 %v3472_v26, %v6748_v21 }
 0x71b   : > { %v4902_v47 = vpop.eup %4901  ;;  %v6771_v41 = vadd.f32 %v4637_v44, %v6707_v17  ;;  %v3417_v34 = vpop.f32.mrb[13].mxu1  ;;  %v3544_v7 = vadd.f32 1.0, %v4900_v23  ;;  %4911 = vtanh.f32 %v3519_v16  ;;  %v3491_v10 = vmul.f32 %v3475_v33, %v6753_v28 }
 0x71c   : > { %v4904_v3 = vpop.eup %4903  ;;  %v3489_v19 = vmul.f32 %v3473_v37, %v6758_v30  ;;  %v6776_v53 = vadd.f32 %v6707_v17, %v3417_v34  ;;  %v4638_v61 = vpop.f32.mrb[14].mxu1  ;;  %v3547_v9 = vadd.f32 1.0, %v4902_v47  ;;  %v3562_v59 = vmul.f32 %v3546_v12, %v3434_v60 }
 0x71d   : > { %v3462_v27 = vmul.f32 0.044715, %v6771_v41  ;;  %v6781_v18 = vadd.f32 %v4638_v61, %v6707_v17  ;;  %v3420_v42 = vpop.f32.mrb[15].mxu1  ;;  %v3545_v4 = vadd.f32 1.0, %v4904_v3  ;;  %v3560_v14 = vmul.f32 %v3544_v7, %v3432_v31 }
 0x71e   : > { %v3460_v5 = vmul.f32 0.044715, %v6776_v53  ;;  %v6785_v6 = vadd.f32 %v6707_v17, %v3420_v42  ;;  %v3563_v36 = vmul.f32 %v3547_v9, %v3435_v1  ;;  %v3504_v43 = vadd.f32 %v3488_v46, %v6748_v21 }
 0x71f   : > { %v3463_v24 = vmul.f32 0.044715, %v6781_v18  ;;  %v3561_v55 = vmul.f32 %v3545_v4, %v3433_v57  ;;  %v3505_v52 = vadd.f32 %v3489_v19, %v6758_v30  ;;  %v3478_v15 = vmul.f32 %v3462_v27, %v6771_v41 }
 0x720   : > { %v3476_v38 = vmul.f32 %v3460_v5, %v6776_v53  ;;  %v3461_v16 = vmul.f32 0.044715, %v6785_v6  ;;  %v3577_v26 = vpack.c.bf16 %v3563_v36, %v3562_v59  ;;  %v3437_v17 = vmul.f32 0.5, %v6733_v62 }
 0x721   : > { %v3576_v35 = vpack.c.bf16 %v3561_v55, %v3560_v14  ;;  %v3520_v60 = vmul.f32 0.7978846, %v3504_v43  ;;  %v3479_v33 = vmul.f32 %v3463_v24, %v6781_v18  ;;  %v3438_v57 = vmul.f32 0.5, %v6723_v48 }
 0x722   : > { %v4906_v1 = vpop.eup %4905  ;;  %v3477_v31 = vmul.f32 %v3461_v16, %v6785_v6  ;;  %v3521_v23 = vmul.f32 0.7978846, %v3505_v52  ;;  %v3492_v44 = vmul.f32 %v3476_v38, %v6776_v53  ;;  %v3506_v47 = vadd.f32 %v3490_v63, %v6744_v40 }
 0x723   : > { %v4908_v37 = vpop.eup %4907  ;;  %4655 = vmatprep.mubr.bf16.mxu0 %v3576_v35  ;;  %v3548_v12 = vadd.f32 1.0, %v4906_v1  ;;  %4913 = vtanh.f32 %v3520_v60  ;;  %v3507_v7 = vadd.f32 %v3491_v10, %v6753_v28  ;;  %v3494_v48 = vmul.f32 %v3478_v15, %v6771_v41 }
 0x724   : > { %v4910_v46 = vpop.eup %4909  ;;  %v3493_v62 = vmul.f32 %v3477_v31, %v6785_v6  ;;  %4656 = vmatmul.mubr.bf16.vlgmr.msra.gmra.mrb[16].mxu0 %v3577_v26  ;;  %v3550_v34 = vadd.f32 1.0, %v4908_v37  ;;  %4915 = vtanh.f32 %v3521_v23  ;;  %v3439_v61 = vmul.f32 0.5, %v6730_v25 }
 0x725   : > { %v4912_v3 = vpop.eup %4911  ;;  %v3549_v19 = vadd.f32 1.0, %v4910_v46  ;;  %v3522_v9 = vmul.f32 0.7978846, %v3506_v47  ;;  %v3495_v27 = vmul.f32 %v3479_v33, %v6781_v18  ;;  %v3564_v42 = vmul.f32 %v3548_v12, %v3436_v50 }
 0x726   : > { %v3551_v4 = vadd.f32 1.0, %v4912_v3  ;;  %v3523_v63 = vmul.f32 0.7978846, %v3507_v7  ;;  %v3508_v59 = vadd.f32 %v3492_v44, %v6776_v53  ;;  %v3509_v36 = vadd.f32 %v3493_v62, %v6785_v6 }
 0x727   : > { %v3565_v5 = vmul.f32 %v3549_v19, %v3437_v17  ;;  %4917 = vtanh.f32 %v3522_v9  ;;  %v3566_v24 = vmul.f32 %v3550_v34, %v3438_v57  ;;  %v3510_v25 = vadd.f32 %v3494_v48, %v6771_v41 }
 0x728   : > { %v3567_v10 = vmul.f32 %v3551_v4, %v3439_v61  ;;  %4919 = vtanh.f32 %v3523_v63  ;;  %v3524_v55 = vmul.f32 0.7978846, %v3508_v59  ;;  %v3525_v43 = vmul.f32 0.7978846, %v3509_v36 }
 0x729   : > { %v3578_v14 = vpack.c.bf16 %v3565_v5, %v3564_v42  ;;  %v3511_v16 = vadd.f32 %v3495_v27, %v6781_v18  ;;  %v3526_v50 = vmul.f32 0.7978846, %v3510_v25  ;;  %v3440_v17 = vmul.f32 0.5, %v6748_v21 }
 0x72a   : > { %v3579_v38 = vpack.c.bf16 %v3567_v10, %v3566_v24  ;;  %4921 = vtanh.f32 %v3524_v55  ;;  %v3441_v60 = vmul.f32 0.5, %v6758_v30  ;;  %v3442_v12 = vmul.f32 0.5, %v6744_v40 }
 0x72b   : > { %4659 = vmatprep.mubr.bf16.mxu0 %v3578_v14  ;;  %4923 = vtanh.f32 %v3525_v43  ;;  %v3527_v26 = vmul.f32 0.7978846, %v3511_v16  ;;  %v3443_v47 = vmul.f32 0.5, %v6753_v28  ;;  %v3444_v19 = vmul.f32 0.5, %v6776_v53  ;;  %v6819_v53 = vld [vmem:[%s7092_s15] ss:$0 sm:$0xff] }
 0x72c   : > { %4660 = vmatmul.mubr.bf16.gmra.mrb[20].mxu0 %v3579_v38  ;;  %4925 = vtanh.f32 %v3526_v50  ;;  %v3445_v61 = vmul.f32 0.5, %v6785_v6  ;;  %v3446_v42 = vmul.f32 0.5, %v6771_v41  ;;  %v3447_v63 = vmul.f32 0.5, %v6781_v18 }
 0x72d   : > { %v4914_v52 = vpop.eup %4913  ;;  %4927 = vtanh.f32 %v3527_v26 }
 0x72e   : > { %v4916_v15 = vpop.eup %4915  ;;  %v3552_v35 = vadd.f32 1.0, %v4914_v52 }
 0x72f   : > { %v3553_v1 = vadd.f32 1.0, %v4916_v15 }
 0x730   : > { %v3568_v31 = vmul.f32 %v3552_v35, %v3440_v17 }
 0x731   : > { %v4918_v33 = vpop.eup %4917  ;;  %v3569_v57 = vmul.f32 %v3553_v1, %v3441_v60 }
 0x732   : > { %v4920_v23 = vpop.eup %4919  ;;  %v3554_v37 = vadd.f32 1.0, %v4918_v33 }
 0x733   : > { %v3580_v44 = vpack.c.bf16 %v3569_v57, %v3568_v31  ;;  %v3555_v46 = vadd.f32 1.0, %v4920_v23 }
 0x734   : > { %v4922_v62 = vpop.eup %4921  ;;  %v3570_v34 = vmul.f32 %v3554_v37, %v3442_v12 }
 0x735   : > { %4663 = vmatprep.mubr.bf16.mxu0 %v3580_v44  ;;  %v3571_v7 = vmul.f32 %v3555_v46, %v3443_v47  ;;  %v4924_v3 = vpop.eup %4923  ;;  %v3556_v21 = vadd.f32 1.0, %v4922_v62 }
 0x736   : > { %v4926_v48 = vpop.eup %4925  ;;  %v3557_v9 = vadd.f32 1.0, %v4924_v3 }
 0x737   : > { %v3581_v30 = vpack.c.bf16 %v3571_v7, %v3570_v34  ;;  %v4928_v27 = vpop.eup %4927  ;;  %v3558_v40 = vadd.f32 1.0, %v4926_v48  ;;  %v3572_v28 = vmul.f32 %v3556_v21, %v3444_v19 }
 0x738   : > { %v3573_v4 = vmul.f32 %v3557_v9, %v3445_v61  ;;  %v3559_v5 = vadd.f32 1.0, %v4928_v27 }
 0x739   : > { %4664 = vmatmul.mubr.bf16.gmra.mrb[24].mxu0 %v3581_v30  ;;  %v3574_v36 = vmul.f32 %v3558_v40, %v3446_v42 }
 0x73a   : > { %v3582_v59 = vpack.c.bf16 %v3573_v4, %v3572_v28  ;;  %v3575_v24 = vmul.f32 %v3559_v5, %v3447_v63 }
 0x73c   : > { %4667 = vmatprep.mubr.bf16.mxu0 %v3582_v59  ;;  %v3583_v10 = vpack.c.bf16 %v3575_v24, %v3574_v36 }
 0x741   : > { %4668 = vmatmul.mubr.bf16.gmra.mrb[28].mxu0 %v3583_v10 }
 0x7f7   : > { %v4657_v6 = vpop.f32.mrb[16].mxu0 }
 0x7f8   : > { %v3698_v41 = vadd.f32 %v4657_v6, %v6819_v53  ;;  %v3689_v14 = vpop.f32.mrb[17].mxu0 }
 0x7f9   : > { %v3690_v55 = vadd.f32 %v6819_v53, %v3689_v14  ;;  %v4658_v43 = vpop.f32.mrb[18].mxu0 }
 0x7fa   : > { %v3770_v18 = vmul.f32 0.044715, %v3698_v41  ;;  %v6824_v25 = vadd.f32 %v4658_v43, %v6819_v53  ;;  %v3692_v38 = vpop.f32.mrb[19].mxu0 }
 0x7fb   : > { %v3768_v16 = vmul.f32 0.044715, %v3690_v55  ;;  %v6827_v50 = vadd.f32 %v6819_v53, %v3692_v38 }
 0x7fc   : > { %v3786_v26 = vmul.f32 %v3770_v18, %v3698_v41  ;;  %v3771_v52 = vmul.f32 0.044715, %v6824_v25 }
 0x7fd   : > { %v3784_v15 = vmul.f32 %v3768_v16, %v3690_v55  ;;  %v3769_v35 = vmul.f32 0.044715, %v6827_v50 }
 0x7fe   : > { %v3802_v17 = vmul.f32 %v3786_v26, %v3698_v41  ;;  %v3787_v60 = vmul.f32 %v3771_v52, %v6824_v25 }
 0x7ff   : > { %v3800_v1 = vmul.f32 %v3784_v15, %v3690_v55  ;;  %v3785_v33 = vmul.f32 %v3769_v35, %v6827_v50  ;;  %v4661_v31 = vpop.f32.mrb[20].mxu0 }
 0x800   : > { %v3818_v57 = vadd.f32 %v3802_v17, %v3698_v41  ;;  %v3803_v23 = vmul.f32 %v3787_v60, %v6824_v25  ;;  %v6835_v37 = vadd.f32 %v4661_v31, %v6819_v53  ;;  %v3705_v44 = vpop.f32.mrb[21].mxu0  ;;  %v3754_v60 = vmul.f32 0.5, %v3698_v41 }
 0x801   : > { %v3816_v12 = vadd.f32 %v3800_v1, %v3690_v55  ;;  %v3801_v47 = vmul.f32 %v3785_v33, %v6827_v50  ;;  %v6839_v46 = vadd.f32 %v6819_v53, %v3705_v44  ;;  %v4662_v62 = vpop.f32.mrb[22].mxu0  ;;  %v3752_v1 = vmul.f32 0.5, %v3690_v55 }
 0x802   : > { %v3834_v34 = vmul.f32 0.7978846, %v3818_v57  ;;  %v3819_v7 = vadd.f32 %v3803_v23, %v6824_v25  ;;  %v3774_v3 = vmul.f32 0.044715, %v6835_v37  ;;  %v3708_v21 = vpop.f32.mrb[23].mxu0  ;;  %v6847_v27 = vadd.f32 %v4662_v62, %v6819_v53 }
 0x803   : > { %v3832_v48 = vmul.f32 0.7978846, %v3816_v12  ;;  %v3817_v30 = vadd.f32 %v3801_v47, %v6827_v50  ;;  %v3772_v19 = vmul.f32 0.044715, %v6839_v46  ;;  %v6851_v28 = vadd.f32 %v6819_v53, %v3708_v21 }
 0x804   : > { %4929 = vtanh.f32 %v3834_v34  ;;  %v3835_v61 = vmul.f32 0.7978846, %v3819_v7  ;;  %v3790_v9 = vmul.f32 %v3774_v3, %v6835_v37  ;;  %v3775_v63 = vmul.f32 0.044715, %v6847_v27 }
 0x805   : > { %4931 = vtanh.f32 %v3832_v48  ;;  %v3833_v42 = vmul.f32 0.7978846, %v3817_v30  ;;  %v3788_v40 = vmul.f32 %v3772_v19, %v6839_v46  ;;  %v3773_v59 = vmul.f32 0.044715, %v6851_v28 }
 0x806   : > { %4933 = vtanh.f32 %v3835_v61  ;;  %v3806_v4 = vmul.f32 %v3790_v9, %v6835_v37  ;;  %v3791_v24 = vmul.f32 %v3775_v63, %v6847_v27  ;;  %v3755_v12 = vmul.f32 0.5, %v6824_v25 }
 0x807   : > { %4935 = vtanh.f32 %v3833_v42  ;;  %v3804_v5 = vmul.f32 %v3788_v40, %v6839_v46  ;;  %v3789_v6 = vmul.f32 %v3773_v59, %v6851_v28  ;;  %v3753_v3 = vmul.f32 0.5, %v6827_v50 }
 0x808   : > { %v3822_v36 = vadd.f32 %v3806_v4, %v6835_v37  ;;  %v3807_v43 = vmul.f32 %v3791_v24, %v6847_v27 }
 0x809   : > { %v3820_v10 = vadd.f32 %v3804_v5, %v6839_v46  ;;  %v3805_v38 = vmul.f32 %v3789_v6, %v6851_v28 }
 0x80a   : > { %v3838_v14 = vmul.f32 0.7978846, %v3822_v36  ;;  %v3823_v16 = vadd.f32 %v3807_v43, %v6847_v27  ;;  %v3758_v36 = vmul.f32 0.5, %v6835_v37 }
 0x80b   : > { %v3836_v18 = vmul.f32 0.7978846, %v3820_v10  ;;  %v3821_v52 = vadd.f32 %v3805_v38, %v6851_v28 }
 0x80c   : > { %4937 = vtanh.f32 %v3838_v14  ;;  %v4665_v26 = vpop.f32.mrb[24].mxu0  ;;  %v3839_v33 = vmul.f32 0.7978846, %v3823_v16 }
 0x80d   : > { %4939 = vtanh.f32 %v3836_v18  ;;  %v6866_v15 = vadd.f32 %v4665_v26, %v6819_v53  ;;  %v3721_v35 = vpop.f32.mrb[25].mxu0  ;;  %v3837_v47 = vmul.f32 0.7978846, %v3821_v52 }
 0x80e   : > { %v4930_v17 = vpop.eup %4929  ;;  %v6869_v31 = vadd.f32 %v6819_v53, %v3721_v35  ;;  %v4666_v57 = vpop.f32.mrb[26].mxu0  ;;  %4941 = vtanh.f32 %v3839_v33  ;;  %v3759_v35 = vmul.f32 0.5, %v6847_v27 }
 0x80f   : > { %v4932_v23 = vpop.eup %4931  ;;  %v3866_v44 = vadd.f32 1.0, %v4930_v17  ;;  %v3778_v62 = vmul.f32 0.044715, %v6866_v15  ;;  %v3724_v55 = vpop.f32.mrb[27].mxu0  ;;  %4943 = vtanh.f32 %v3837_v47  ;;  %v6878_v42 = vadd.f32 %v4666_v57, %v6819_v53 }
 0x810   : > { %v4934_v34 = vpop.eup %4933  ;;  %v3864_v7 = vadd.f32 1.0, %v4932_v23  ;;  %v3776_v41 = vmul.f32 0.044715, %v6869_v31  ;;  %v6883_v63 = vadd.f32 %v6819_v53, %v3724_v55 }
 0x811   : > { %v4936_v21 = vpop.eup %4935  ;;  %v3882_v48 = vmul.f32 %v3866_v44, %v3754_v60  ;;  %v3867_v30 = vadd.f32 1.0, %v4934_v34  ;;  %v3794_v19 = vmul.f32 %v3778_v62, %v6866_v15  ;;  %v3779_v43 = vmul.f32 0.044715, %v6878_v42 }
 0x812   : > { %v3880_v61 = vmul.f32 %v3864_v7, %v3752_v1  ;;  %v3865_v25 = vadd.f32 1.0, %v4936_v21  ;;  %v3792_v9 = vmul.f32 %v3776_v41, %v6869_v31  ;;  %v3777_v16 = vmul.f32 0.044715, %v6883_v63 }
 0x813   : > { %v3898_v50 = vadd.f32 %v3882_v48, %v6638_v8  ;;  %v3883_v40 = vmul.f32 %v3867_v30, %v3755_v12  ;;  %v3810_v4 = vmul.f32 %v3794_v19, %v6866_v15  ;;  %v3756_v8 = vmul.f32 0.5, %v6839_v46 }
 0x814   : > { %v3896_v5 = vadd.f32 %v3880_v61, %v6634_v11  ;;  %v3881_v59 = vmul.f32 %v3865_v25, %v3753_v3  ;;  %v3808_v24 = vmul.f32 %v3792_v9, %v6869_v31  ;;  %v4669_v10 = vpop.f32.mrb[28].mxu0  ;;  %v3795_v60 = vmul.f32 %v3779_v43, %v6878_v42 }
 0x815   : > { %3914 = vst [vmem:[%s5300_s2 + $0x10] sm:$0xff] %v3898_v50  ;;  %v3899_v6 = vadd.f32 %v3883_v40, %v6632_v29  ;;  %v3826_v14 = vadd.f32 %v3810_v4, %v6866_v15  ;;  %v3737_v18 = vpop.f32.mrb[29].mxu0  ;;  %v6898_v26 = vadd.f32 %v4669_v10, %v6819_v53  ;;  %v3793_v57 = vmul.f32 %v3777_v16, %v6883_v63 }
 0x816   : > { %v4938_v38 = vpop.eup %4937  ;;  %3912 = vst [vmem:[%s5300_s2] sm:$0xff] %v3896_v5  ;;  %v3897_v11 = vadd.f32 %v3881_v59, %v6636_v32  ;;  %v3824_v37 = vadd.f32 %v3808_v24, %v6869_v31  ;;  %v4670_v29 = vpop.f32.mrb[30].mxu0  ;;  %v6906_v23 = vadd.f32 %v6819_v53, %v3737_v18  ;;  %v3811_v12 = vmul.f32 %v3795_v60, %v6878_v42 }
 0x817   : > { %v4940_v52 = vpop.eup %4939  ;;  %3915 = vst [vmem:[%s5300_s2 + $0x18] sm:$0xff] %v3899_v6  ;;  %v3870_v46 = vadd.f32 1.0, %v4938_v38  ;;  %v3842_v17 = vmul.f32 0.7978846, %v3826_v14  ;;  %v3740_v1 = vpop.f32.mrb[31].mxu0  ;;  %v3757_v34 = vmul.f32 0.5, %v6851_v28  ;;  %v3809_v7 = vmul.f32 %v3793_v57, %v6883_v63 }
 0x818   : > { %3913 = vst [vmem:[%s5300_s2 + $0x8] sm:$0xff] %v3897_v11  ;;  %v3868_v33 = vadd.f32 1.0, %v4940_v52  ;;  %v3840_v32 = vmul.f32 0.7978846, %v3824_v37  ;;  %v3782_v47 = vmul.f32 0.044715, %v6898_v26  ;;  %v4942_v27 = vpop.eup %4941  ;;  %v3827_v21 = vadd.f32 %v3811_v12, %v6878_v42 }
 0x819   : > { %v3886_v44 = vmul.f32 %v3870_v46, %v3758_v36  ;;  %4945 = vtanh.f32 %v3842_v17  ;;  %v4944_v3 = vpop.eup %4943  ;;  %v3871_v55 = vadd.f32 1.0, %v4942_v27  ;;  %v3825_v61 = vadd.f32 %v3809_v7, %v6883_v63 }
 0x81a   : > { %v3884_v62 = vmul.f32 %v3868_v33, %v3756_v8  ;;  %4947 = vtanh.f32 %v3840_v32  ;;  %v3798_v48 = vmul.f32 %v3782_v47, %v6898_v26  ;;  %v3869_v19 = vadd.f32 1.0, %v4944_v3 }
 0x81b   : > { %v3902_v41 = vadd.f32 %v3886_v44, %v6650_v13  ;;  %v3780_v25 = vmul.f32 0.044715, %v6906_v23  ;;  %v3887_v28 = vmul.f32 %v3871_v55, %v3759_v35  ;;  %v3843_v9 = vmul.f32 0.7978846, %v3827_v21 }
 0x81c   : > { %v3900_v30 = vadd.f32 %v3884_v62, %v6646_v58  ;;  %v3814_v50 = vmul.f32 %v3798_v48, %v6898_v26  ;;  %v6921_v13 = vadd.f32 %v4670_v29, %v6819_v53  ;;  %v3885_v40 = vmul.f32 %v3869_v19, %v3757_v34 }
 0x81d   : > { %3918 = vst [vmem:[%s5300_s2 + $0x30] sm:$0xff] %v3902_v41  ;;  %v3841_v4 = vmul.f32 0.7978846, %v3825_v61  ;;  %v3796_v58 = vmul.f32 %v3780_v25, %v6906_v23  ;;  %v6926_v5 = vadd.f32 %v6819_v53, %v3740_v1  ;;  %v3903_v59 = vadd.f32 %v3887_v28, %v6644_v56 }
 0x81e   : > { %3916 = vst [vmem:[%s5300_s2 + $0x20] sm:$0xff] %v3900_v30  ;;  %4949 = vtanh.f32 %v3843_v9  ;;  %v3830_v36 = vadd.f32 %v3814_v50, %v6898_v26  ;;  %v3901_v24 = vadd.f32 %v3885_v40, %v6648_v54  ;;  %v3783_v6 = vmul.f32 0.044715, %v6921_v13 }
 0x81f   : > { %4951 = vtanh.f32 %v3841_v4  ;;  %v3812_v10 = vmul.f32 %v3796_v58, %v6906_v23  ;;  %3919 = vst [vmem:[%s5300_s2 + $0x38] sm:$0xff] %v3903_v59  ;;  %v3781_v14 = vmul.f32 0.044715, %v6926_v5  ;;  %v3762_v54 = vmul.f32 0.5, %v6866_v15 }
 0x820   : > { %v3846_v8 = vmul.f32 0.7978846, %v3830_v36  ;;  %3917 = vst [vmem:[%s5300_s2 + $0x28] sm:$0xff] %v3901_v24  ;;  %v3799_v43 = vmul.f32 %v3783_v6, %v6921_v13  ;;  %v3760_v29 = vmul.f32 0.5, %v6869_v31  ;;  %v3763_v31 = vmul.f32 0.5, %v6878_v42 }
 0x821   : > { %v3828_v53 = vadd.f32 %v3812_v10, %v6906_v23  ;;  %v3797_v18 = vmul.f32 %v3781_v14, %v6926_v5  ;;  %v3761_v27 = vmul.f32 0.5, %v6883_v63  ;;  %v3766_v3 = vmul.f32 0.5, %v6898_v26 }
 0x822   : > { %4953 = vtanh.f32 %v3846_v8  ;;  %v3815_v16 = vmul.f32 %v3799_v43, %v6921_v13  ;;  %v3764_v63 = vmul.f32 0.5, %v6906_v23  ;;  %v3765_v28 = vmul.f32 0.5, %v6926_v5 }
 0x823   : > { %v4946_v56 = vpop.eup %4945  ;;  %v3844_v37 = vmul.f32 0.7978846, %v3828_v53  ;;  %v3813_v46 = vmul.f32 %v3797_v18, %v6926_v5 }
 0x824   : > { %v4948_v38 = vpop.eup %4947  ;;  %v3874_v11 = vadd.f32 1.0, %v4946_v56  ;;  %v3831_v17 = vadd.f32 %v3815_v16, %v6921_v13 }
 0x825   : > { %v3872_v52 = vadd.f32 1.0, %v4948_v38  ;;  %4955 = vtanh.f32 %v3844_v37  ;;  %v3829_v1 = vadd.f32 %v3813_v46, %v6926_v5 }
 0x826   : > { %v3890_v35 = vmul.f32 %v3874_v11, %v3762_v54  ;;  %v3847_v33 = vmul.f32 0.7978846, %v3831_v17 }
 0x827   : > { %v3888_v60 = vmul.f32 %v3872_v52, %v3760_v29  ;;  %v3845_v44 = vmul.f32 0.7978846, %v3829_v1 }
 0x828   : > { %v3906_v15 = vadd.f32 %v3890_v35, %v6662_v51  ;;  %v4950_v32 = vpop.eup %4949  ;;  %4957 = vtanh.f32 %v3847_v33 }
 0x829   : > { %v3904_v57 = vadd.f32 %v3888_v60, %v6658_v22  ;;  %v4952_v12 = vpop.eup %4951  ;;  %v3875_v47 = vadd.f32 1.0, %v4950_v32  ;;  %4959 = vtanh.f32 %v3845_v44 }
 0x82a   : > { %3922 = vst [vmem:[%s5300_s2 + $0x50] sm:$0xff] %v3906_v15  ;;  %v3873_v62 = vadd.f32 1.0, %v4952_v12 }
 0x82b   : > { %3920 = vst [vmem:[%s5300_s2 + $0x40] sm:$0xff] %v3904_v57  ;;  %v3891_v34 = vmul.f32 %v3875_v47, %v3763_v31 }
 0x82c   : > { %v4954_v51 = vpop.eup %4953  ;;  %v3889_v7 = vmul.f32 %v3873_v62, %v3761_v27 }
 0x82d   : > { %v3907_v22 = vadd.f32 %v3891_v34, %v6656_v2  ;;  %v3878_v41 = vadd.f32 1.0, %v4954_v51 }
 0x82e   : > { %v3905_v55 = vadd.f32 %v3889_v7, %v6660_v20  ;;  %v3767_v20 = vmul.f32 0.5, %v6921_v13 }
 0x82f   : > { %v4956_v42 = vpop.eup %4955  ;;  %3923 = vst [vmem:[%s5300_s2 + $0x58] sm:$0xff] %v3907_v22  ;;  %v3894_v21 = vmul.f32 %v3878_v41, %v3766_v3 }
 0x830   : > { %3921 = vst [vmem:[%s5300_s2 + $0x48] sm:$0xff] %v3905_v55  ;;  %v3876_v48 = vadd.f32 1.0, %v4956_v42 }
 0x831   : > { %v3910_v30 = vadd.f32 %v3894_v21, %v6674_v0 }
 0x832   : > { %v3892_v19 = vmul.f32 %v3876_v48, %v3764_v63  ;;  %v4958_v61 = vpop.eup %4957 }
 0x833   : > { %3926 = vst [vmem:[%s5300_s2 + $0x70] sm:$0xff] %v3910_v30  ;;  %v4960_v2 = vpop.eup %4959  ;;  %v3879_v25 = vadd.f32 1.0, %v4958_v61 }
 0x834   : > { %v3908_v26 = vadd.f32 %v3892_v19, %v6670_v49  ;;  %v3877_v9 = vadd.f32 1.0, %v4960_v2 }
 0x835   : > { %v3895_v50 = vmul.f32 %v3879_v25, %v3767_v20 }
 0x836   : > { %3924 = vst [vmem:[%s5300_s2 + $0x60] sm:$0xff] %v3908_v26  ;;  %v3893_v23 = vmul.f32 %v3877_v9, %v3765_v28 }
 0x837   : > { %v3911_v40 = vadd.f32 %v3895_v50, %v6668_v39 }
 0x838   : > { %v3909_v0 = vadd.f32 %v3893_v23, %v6672_v45 }
 0x839   : > { %3927 = vst [vmem:[%s5300_s2 + $0x78] sm:$0xff] %v3911_v40 }
 0x83a   : > { %3925 = vst [vmem:[%s5300_s2 + $0x68] sm:$0xff] %v3909_v0 }
 0x83b PF: > { %s29_s18 = sadd.s32 1, %s5029_s18   ;;  %s7093_s23 = sld [smem:[#allocation18_spill]] }
 0x83c   : > { %p26_p6 = scmp.ge.s32.totalorder %s29_s18, 6   ;;  %s7094_s15 = sld [smem:[#allocation14_spill]] }
 0x83d   : > { %s7095_s0 = sld [smem:[#allocation15_spill]]  ;;  %s7096_s16 = sld [smem:[#allocation16_spill]] }
 0x83e   : > { %s7097_s17 = sld [smem:[#allocation17_spill]]  ;;  %s7098_s30 = smov %s5009_s14 }
 0x83f   :  { %28 = sbr.rel (!%p26_p6) target bundleno = 20 (0x14), region = 213 }
 0x841   : > { %s7099_s14 = smov %s7093_s23 }

</bundles_post_ra>
